<compile_context>
chip_gen: v5e
topology: v5e:2x2
jax: 0.10.0
libtpu: 0.0.40
codegen_flags: <defaults>
</compile_context>

<pallas_src>
import functools

import jax
import jax.numpy as jnp
from jax.experimental import pallas as pl
from jax.experimental.pallas import tpu as pltpu


# 3x3 neighborhood offsets shared by the 4 output phases of a k=4,s=2,p=1 deconv.
OFFSETS = [(-1, -1), (-1, 0), (-1, 1),
           (0, -1),  (0, 0),  (0, 1),
           (1, -1),  (1, 0),  (1, 1)]
# For output row-parity a: which input-row offset dh uses which kernel row kh.
# (ho = 2*i + a = 2*ih - 1 + kh  with  dh = ih - i)
PHASE_TAPS = {0: {0: 1, -1: 3}, 1: {1: 0, 0: 2}}


# ----------------------------------------------------------------------------
# Pallas kernel: fused matmul + (bias | BatchNorm pooled over phase groups) + act
# ----------------------------------------------------------------------------
def _layer_kernel(p_ref, w_ref, b_ref, g_ref, bt_ref, o_ref, *,
                  bn, act, add_bias, groups):
    # p: (M, Kd) bf16   w: (Kd, N) bf16   b/g/bt: (1, N) f32   o: (M, N)
    acc = jnp.dot(p_ref[...], w_ref[...], preferred_element_type=jnp.float32)
    if add_bias:
        acc = acc + b_ref[...]
    if bn:
        m_rows, n_cols = acc.shape
        c = n_cols // groups
        # Per-column sums / sums-of-squares, then pool the `groups` phase blocks
        # so statistics are per *channel* over all B*Hout*Wout positions
        # (identical to PyTorch BatchNorm2d training-mode batch stats).
        col_sum = jnp.sum(acc, axis=0, keepdims=True)        # (1, N)
        col_sq = jnp.sum(acc * acc, axis=0, keepdims=True)   # (1, N)
        ch_sum = col_sum[:, 0:c]
        ch_sq = col_sq[:, 0:c]
        for g in range(1, groups):
            ch_sum = ch_sum + col_sum[:, g * c:(g + 1) * c]
            ch_sq = ch_sq + col_sq[:, g * c:(g + 1) * c]
        cnt = jnp.float32(m_rows * groups)
        mean = ch_sum / cnt
        var = ch_sq / cnt - mean * mean                      # one-pass variance
        inv = jax.lax.rsqrt(var + 1e-5)
        scale = g_ref[:, 0:c] * inv                          # (1, C)
        shift = bt_ref[:, 0:c] - mean * scale                # (1, C)
        scale = jnp.concatenate([scale] * groups, axis=1)    # (1, N)
        shift = jnp.concatenate([shift] * groups, axis=1)
        acc = acc * scale + shift
    if act == "leaky":
        acc = jnp.where(acc >= 0, acc, 0.05 * acc)
    elif act == "tanh":
        acc = jnp.tanh(acc)
    o_ref[...] = acc.astype(o_ref.dtype)


def fused_layer(patches, wmat, bias, gamma, beta, *, bn, act, add_bias,
                groups=1, out_dtype=jnp.float32):
    m, kd = patches.shape
    n = wmat.shape[1]
    kernel = functools.partial(_layer_kernel, bn=bn, act=act,
                               add_bias=add_bias, groups=groups)
    # Tile M (and mark it "parallel" -> both TensorCores on v7x) when rows are
    # independent (no BatchNorm coupling) and M is big enough to pipeline.
    # TODO(synk): Welford / sum+sumsq accumulators would let BN layers tile too.
    tm = 128
    if (not bn) and m % tm == 0 and m > tm:
        grid = (m // tm,)
        p_spec = pl.BlockSpec((tm, kd), lambda i: (i, 0))
        o_spec = pl.BlockSpec((tm, n), lambda i: (i, 0))
        semantics = ("parallel",)
    else:
        grid = (1,)
        p_spec = pl.BlockSpec((m, kd), lambda i: (0, 0))
        o_spec = pl.BlockSpec((m, n), lambda i: (0, 0))
        semantics = ("arbitrary",)
    return pl.pallas_call(
        kernel,
        out_shape=jax.ShapeDtypeStruct((m, n), out_dtype),
        grid=grid,
        in_specs=[
            p_spec,
            pl.BlockSpec((kd, n), lambda i: (0, 0)),
            pl.BlockSpec((1, n), lambda i: (0, 0)),
            pl.BlockSpec((1, n), lambda i: (0, 0)),
            pl.BlockSpec((1, n), lambda i: (0, 0)),
        ],
        out_specs=o_spec,
        compiler_params=pltpu.CompilerParams(dimension_semantics=semantics),
    )(patches, wmat, bias, gamma, beta)


# ----------------------------------------------------------------------------
# Wrapper glue (tiny XLA ops): patch extraction, weight packing, pixel shuffle
# ----------------------------------------------------------------------------
def extract_patches_3x3(x_nhwc):
    """(B,H,W,C) -> (B*H*W, 9*C) zero-padded 3x3-neighborhood patches."""
    b, h, w, c = x_nhwc.shape
    xp = jnp.pad(x_nhwc, ((0, 0), (1, 1), (1, 1), (0, 0)))
    slabs = [xp[:, 1 + dh:1 + dh + h, 1 + dw:1 + dw + w, :] for dh, dw in OFFSETS]
    cols = jnp.concatenate(slabs, axis=-1)
    return cols.reshape(b * h * w, 9 * c)


def pack_deconv_weight(w_ct):
    """ConvTranspose2d weight (Cin,Cout,4,4), s=2,p=1 -> (9*Cin, 4*Cout) bf16
    matrix mapping 3x3-neighborhood patches to the 4 output phases."""
    cin, cout, k, _ = w_ct.shape
    assert k == 4
    wbig = jnp.zeros((9 * cin, 4 * cout), jnp.float32)
    for t, (dh, dw) in enumerate(OFFSETS):
        for a in (0, 1):
            for b in (0, 1):
                if dh in PHASE_TAPS[a] and dw in PHASE_TAPS[b]:
                    kh, kw = PHASE_TAPS[a][dh], PHASE_TAPS[b][dw]
                    ph = 2 * a + b
                    wbig = wbig.at[t * cin:(t + 1) * cin,
                                   ph * cout:(ph + 1) * cout].set(w_ct[:, :, kh, kw])
    return wbig.astype(jnp.bfloat16)


def pack_fc_weight(w_ct):
    """ConvTranspose2d weight (Cin,Cout,K,K), s=1,p=0 on a 1x1 input is a dense
    layer: -> (Cin, K*K*Cout) bf16, columns ordered (kh, kw, co)."""
    cin, cout, k, _ = w_ct.shape
    return jnp.transpose(w_ct, (0, 2, 3, 1)).reshape(cin, k * k * cout).astype(jnp.bfloat16)


# ----------------------------------------------------------------------------
# Generator (small config consistent with the module's structure)
# ----------------------------------------------------------------------------
Z_DIM = 32
IMAGE_SIZE = 32
CONV_DIM = 16

LAYER_CFGS = [
    # (c_in, c_out, k, stride, pad, bn, activation-after-layer)
    (Z_DIM, CONV_DIM * 8, IMAGE_SIZE // 16, 1, 0, False, None),   # fc
    (CONV_DIM * 8, CONV_DIM * 4, 4, 2, 1, True, "leaky"),         # deconv1
    (CONV_DIM * 4, CONV_DIM * 2, 4, 2, 1, True, "leaky"),         # deconv2
    (CONV_DIM * 2, CONV_DIM, 4, 2, 1, True, "leaky"),             # deconv3
    (CONV_DIM, 3, 4, 2, 1, False, "tanh"),                        # deconv4
]


def init_params(key, cfgs):
    params = []
    for cin, cout, k, s, p, bn, act in cfgs:
        key, kw, kb, kg, kbt = jax.random.split(key, 5)
        std = 1.0 / jnp.sqrt(jnp.float32(cin * k * k))
        w = std * jax.random.normal(kw, (cin, cout, k, k), jnp.float32)
        b = 0.01 * jax.random.normal(kb, (cout,), jnp.float32)
        gamma = 1.0 + 0.05 * jax.random.normal(kg, (cout,), jnp.float32)
        beta = 0.05 * jax.random.normal(kbt, (cout,), jnp.float32)
        params.append(dict(w=w, b=b, gamma=gamma, beta=beta,
                           K=k, stride=s, pad=p, bn=bn, act=act))
    return params


def prepare_params(params):
    """One-time packing of weights into the matmul layouts used by the kernels."""
    packed = []
    for idx, p in enumerate(params):
        cout = p["w"].shape[1]
        if idx == 0:
            wmat = pack_fc_weight(p["w"])
            reps = p["K"] * p["K"]          # output columns = (kh, kw, co)
        else:
            wmat = pack_deconv_weight(p["w"])
            reps = 4                        # output columns = (phase, co)
        bias = jnp.tile(p["b"], reps)[None, :].astype(jnp.float32)
        gamma = jnp.tile(p["gamma"], reps)[None, :].astype(jnp.float32)
        beta = jnp.tile(p["beta"], reps)[None, :].astype(jnp.float32)
        packed.append(dict(wmat=wmat, bias=bias, gamma=gamma, beta=beta,
                           cout=cout, k=p["K"], bn=p["bn"], act=p["act"]))
    return packed


def generator_forward(z, tags, packed):
    bsz = z.shape[0]
    x = jnp.concatenate([z, tags], axis=1).astype(jnp.bfloat16)   # (B, z_dim)

    # fc: ConvTranspose2d(z_dim, 8*conv_dim, K, 1, 0) on a 1x1 input == dense layer.
    p0 = packed[0]
    m_fc = x.shape[0]
    pad_rows = (-m_fc) % 8                  # keep the matmul 8-sublane aligned
    x_fc = jnp.pad(x, ((0, pad_rows), (0, 0))) if pad_rows else x
    y = fused_layer(x_fc, p0["wmat"], p0["bias"], p0["gamma"], p0["beta"],
                    bn=False, act=p0["act"], add_bias=True, groups=1,
                    out_dtype=jnp.bfloat16)[:m_fc]
    x = y.reshape(bsz, p0["k"], p0["k"], p0["cout"])              # NHWC

    for li in range(1, len(packed)):
        p = packed[li]
        b_, h, w, _ = x.shape
        patches = extract_patches_3x3(x)                          # (B*H*W, 9*Cin) bf16
        last = li == len(packed) - 1
        y = fused_layer(patches, p["wmat"], p["bias"], p["gamma"], p["beta"],
                        bn=p["bn"], act=p["act"], add_bias=not p["bn"], groups=4,
                        out_dtype=jnp.float32 if last else jnp.bfloat16)
        # pixel shuffle: (B*H*W, 4*Cout) phases -> NHWC (B, 2H, 2W, Cout)
        c = p["cout"]
        y = y.reshape(b_, h, w, 2, 2, c)
        y = jnp.transpose(y, (0, 1, 3, 2, 4, 5)).reshape(b_, 2 * h, 2 * w, c)
        x = y

    return jnp.transpose(x, (0, 3, 1, 2))                         # NCHW like PyTorch


# ----------------------------------------------------------------------------
# Independent plain-JAX reference (lax.conv_general_dilated), f32 end to end
# ----------------------------------------------------------------------------
def conv_transpose_ref(x_nchw, w_ct, bias, stride, pad):
    cin, cout, k, _ = w_ct.shape
    w_conv = jnp.transpose(w_ct[:, :, ::-1, ::-1], (1, 0, 2, 3))  # (Cout, Cin, K, K)
    y = jax.lax.conv_general_dilated(
        x_nchw, w_conv, window_strides=(1, 1),
        padding=[(k - 1 - pad, k - 1 - pad)] * 2,
        lhs_dilation=(stride, stride),
        dimension_numbers=("NCHW", "OIHW", "NCHW"))
    return y + bias[None, :, None, None]


def batchnorm_ref(y, gamma, beta, eps=1e-5):
    mean = jnp.mean(y, axis=(0, 2, 3), keepdims=True)
    var = jnp.mean(jnp.square(y - mean), axis=(0, 2, 3), keepdims=True)
    yn = (y - mean) * jax.lax.rsqrt(var + eps)
    return yn * gamma[None, :, None, None] + beta[None, :, None, None]


def generator_forward_ref(z, tags, params):
    x = jnp.concatenate([z, tags], axis=1)[:, :, None, None]      # (B, z_dim, 1, 1)
    for p in params:
        x = conv_transpose_ref(x, p["w"], p["b"], p["stride"], p["pad"])
        if p["bn"]:
            x = batchnorm_ref(x, p["gamma"], p["beta"])
        if p["act"] == "leaky":
            x = jnp.where(x >= 0, x, 0.05 * x)
        elif p["act"] == "tanh":
            x = jnp.tanh(x)
    return x


if __name__ == "__main__":
    key = jax.random.PRNGKey(0)
    kz, kt, kp = jax.random.split(key, 3)

    B = 2
    z = jax.random.normal(kz, (B, 24), jnp.float32)      # latent part
    tags = jax.random.normal(kt, (B, 8), jnp.float32)    # tag part; cat -> z_dim=32
    params = init_params(kp, LAYER_CFGS)
    packed = prepare_params(params)                      # packed once, outside jit

    fwd = jax.jit(lambda z_, t_: generator_forward(z_, t_, packed))
    out = jax.block_until_ready(fwd(z, tags))
    assert out.shape == (B, 3, IMAGE_SIZE, IMAGE_SIZE), out.shape
    assert bool(jnp.all(jnp.isfinite(out)))

    # cross-check the Pallas path against an independent f32 XLA reference
    ref = jax.block_until_ready(
        jax.jit(lambda z_, t_: generator_forward_ref(z_, t_, params))(z, tags))
    max_err = float(jnp.max(jnp.abs(out - ref)))
    assert max_err < 1e-1, max_err   # bf16 matmul operands, f32 accumulation

    print("KERNEL_OK")
</pallas_src>

<mosaic_0001>
module attributes {stable_mosaic.version = 11 : i64} {
  func.func @_layer_kernel(%arg0: i32, %arg1: memref<8x32xbf16, #tpu.memory_space<vmem>>, %arg2: memref<32x512xbf16, #tpu.memory_space<vmem>>, %arg3: memref<1x512xf32, #tpu.memory_space<vmem>>, %arg4: memref<1x512xf32, #tpu.memory_space<vmem>>, %arg5: memref<1x512xf32, #tpu.memory_space<vmem>>, %arg6: memref<8x512xbf16, #tpu.memory_space<vmem>>) attributes {dimension_semantics = [#tpu.dimension_semantics<arbitrary>], iteration_bounds = array<i64: 1>, scalar_prefetch = 0 : i64, scratch_operands = 0 : i64, tpu.core_type = #tpu.core_type<tc>, window_params = [{pipeline_mode = #tpu.pipeline_mode<synchronous>, transform_indices = @transform_0, window_bounds = array<i64: 8, 32>}, {pipeline_mode = #tpu.pipeline_mode<synchronous>, transform_indices = @transform_1, window_bounds = array<i64: 32, 512>}, {pipeline_mode = #tpu.pipeline_mode<synchronous>, transform_indices = @transform_2, window_bounds = array<i64: 1, 512>}, {pipeline_mode = #tpu.pipeline_mode<synchronous>, transform_indices = @transform_3, window_bounds = array<i64: 1, 512>}, {pipeline_mode = #tpu.pipeline_mode<synchronous>, transform_indices = @transform_4, window_bounds = array<i64: 1, 512>}, {pipeline_mode = #tpu.pipeline_mode<synchronous>, transform_indices = @transform_5, window_bounds = array<i64: 8, 512>}]} {
    %c0 = arith.constant 0 : index
    %c0_0 = arith.constant 0 : index
    %0 = vector.load %arg1[%c0, %c0_0] : memref<8x32xbf16, #tpu.memory_space<vmem>>, vector<8x32xbf16>
    %c0_1 = arith.constant 0 : index
    %c0_2 = arith.constant 0 : index
    %1 = vector.load %arg2[%c0_1, %c0_2] : memref<32x512xbf16, #tpu.memory_space<vmem>>, vector<32x512xbf16>
    %cst = arith.constant dense<0.000000e+00> : vector<8x512xf32>
    %2 = tpu.matmul %0, %1, %cst {dimension_numbers = #tpu.dot_dimension_numbers<[1], [0], [0], [1], [0, 0, 1, 1], [], []>} : vector<8x32xbf16>, vector<32x512xbf16>, vector<8x512xf32> -> vector<8x512xf32>
    %c0_3 = arith.constant 0 : index
    %c0_4 = arith.constant 0 : index
    %3 = vector.load %arg3[%c0_3, %c0_4] : memref<1x512xf32, #tpu.memory_space<vmem>>, vector<1x512xf32>
    %4 = vector.broadcast %3 : vector<1x512xf32> to vector<8x512xf32>
    %5 = arith.addf %2, %4 : vector<8x512xf32>
    %6 = arith.truncf %5 : vector<8x512xf32> to vector<8x512xbf16>
    %c0_5 = arith.constant 0 : index
    %c0_6 = arith.constant 0 : index
    %7 = vector.load %arg6[%c0_5, %c0_6] : memref<8x512xbf16, #tpu.memory_space<vmem>>, vector<8x512xbf16>
    tpu.vector_store %arg6[%c0_5, %c0_6], %6 {strides = array<i32>} : memref<8x512xbf16, #tpu.memory_space<vmem>>, vector<8x512xbf16>,
    return
  }
  func.func @transform_0(%arg0: i32) -> (i32, i32) {
    %c0_i32 = arith.constant 0 : i32
    %c0_i32_0 = arith.constant 0 : i32
    %c0_i32_1 = arith.constant 0 : i32
    return %c0_i32, %c0_i32_0 : i32, i32
  }
  func.func @transform_1(%arg0: i32) -> (i32, i32) {
    %c0_i32 = arith.constant 0 : i32
    %c0_i32_0 = arith.constant 0 : i32
    %c0_i32_1 = arith.constant 0 : i32
    return %c0_i32, %c0_i32_0 : i32, i32
  }
  func.func @transform_2(%arg0: i32) -> (i32, i32) {
    %c0_i32 = arith.constant 0 : i32
    %c0_i32_0 = arith.constant 0 : i32
    %c0_i32_1 = arith.constant 0 : i32
    return %c0_i32, %c0_i32_0 : i32, i32
  }
  func.func @transform_3(%arg0: i32) -> (i32, i32) {
    %c0_i32 = arith.constant 0 : i32
    %c0_i32_0 = arith.constant 0 : i32
    %c0_i32_1 = arith.constant 0 : i32
    return %c0_i32, %c0_i32_0 : i32, i32
  }
  func.func @transform_4(%arg0: i32) -> (i32, i32) {
    %c0_i32 = arith.constant 0 : i32
    %c0_i32_0 = arith.constant 0 : i32
    %c0_i32_1 = arith.constant 0 : i32
    return %c0_i32, %c0_i32_0 : i32, i32
  }
  func.func @transform_5(%arg0: i32) -> (i32, i32) {
    %c0_i32 = arith.constant 0 : i32
    %c0_i32_0 = arith.constant 0 : i32
    %c0_i32_1 = arith.constant 0 : i32
    return %c0_i32, %c0_i32_0 : i32, i32
  }
}

module attributes {stable_mosaic.version = 11 : i64} {
  func.func @_layer_kernel(%arg0: i32, %arg1: memref<8x1152xbf16, #tpu.memory_space<vmem>>, %arg2: memref<1152x256xbf16, #tpu.memory_space<vmem>>, %arg3: memref<1x256xf32, #tpu.memory_space<vmem>>, %arg4: memref<1x256xf32, #tpu.memory_space<vmem>>, %arg5: memref<1x256xf32, #tpu.memory_space<vmem>>, %arg6: memref<8x256xbf16, #tpu.memory_space<vmem>>) attributes {dimension_semantics = [#tpu.dimension_semantics<arbitrary>], iteration_bounds = array<i64: 1>, scalar_prefetch = 0 : i64, scratch_operands = 0 : i64, tpu.core_type = #tpu.core_type<tc>, window_params = [{pipeline_mode = #tpu.pipeline_mode<synchronous>, transform_indices = @transform_0, window_bounds = array<i64: 8, 1152>}, {pipeline_mode = #tpu.pipeline_mode<synchronous>, transform_indices = @transform_1, window_bounds = array<i64: 1152, 256>}, {pipeline_mode = #tpu.pipeline_mode<synchronous>, transform_indices = @transform_2, window_bounds = array<i64: 1, 256>}, {pipeline_mode = #tpu.pipeline_mode<synchronous>, transform_indices = @transform_3, window_bounds = array<i64: 1, 256>}, {pipeline_mode = #tpu.pipeline_mode<synchronous>, transform_indices = @transform_4, window_bounds = array<i64: 1, 256>}, {pipeline_mode = #tpu.pipeline_mode<synchronous>, transform_indices = @transform_5, window_bounds = array<i64: 8, 256>}]} {
    %c0 = arith.constant 0 : index
    %c0_0 = arith.constant 0 : index
    %0 = vector.load %arg1[%c0, %c0_0] : memref<8x1152xbf16, #tpu.memory_space<vmem>>, vector<8x1152xbf16>
    %c0_1 = arith.constant 0 : index
    %c0_2 = arith.constant 0 : index
    %1 = vector.load %arg2[%c0_1, %c0_2] : memref<1152x256xbf16, #tpu.memory_space<vmem>>, vector<1152x256xbf16>
    %cst = arith.constant dense<0.000000e+00> : vector<8x256xf32>
    %2 = tpu.matmul %0, %1, %cst {dimension_numbers = #tpu.dot_dimension_numbers<[1], [0], [0], [1], [0, 0, 1, 1], [], []>} : vector<8x1152xbf16>, vector<1152x256xbf16>, vector<8x256xf32> -> vector<8x256xf32>
    %cst_3 = arith.constant dense<0.000000e+00> : vector<256xf32>
    %3 = vector.multi_reduction <add>, %2, %cst_3 [0] : vector<8x256xf32> to vector<256xf32>
    %4 = vector.shape_cast %3 : vector<256xf32> to vector<1x256xf32>
    %5 = arith.mulf %2, %2 : vector<8x256xf32>
    %cst_4 = arith.constant dense<0.000000e+00> : vector<256xf32>
    %6 = vector.multi_reduction <add>, %5, %cst_4 [0] : vector<8x256xf32> to vector<256xf32>
    %7 = vector.shape_cast %6 : vector<256xf32> to vector<1x256xf32>
    %8 = vector.extract_strided_slice %4 {offsets = [0, 0], sizes = [1, 64], strides = [1, 1]} : vector<1x256xf32> to vector<1x64xf32>
    %9 = vector.extract_strided_slice %7 {offsets = [0, 0], sizes = [1, 64], strides = [1, 1]} : vector<1x256xf32> to vector<1x64xf32>
    %10 = vector.extract_strided_slice %4 {offsets = [0, 64], sizes = [1, 64], strides = [1, 1]} : vector<1x256xf32> to vector<1x64xf32>
    %11 = arith.addf %8, %10 : vector<1x64xf32>
    %12 = vector.extract_strided_slice %7 {offsets = [0, 64], sizes = [1, 64], strides = [1, 1]} : vector<1x256xf32> to vector<1x64xf32>
    %13 = arith.addf %9, %12 : vector<1x64xf32>
    %14 = vector.extract_strided_slice %4 {offsets = [0, 128], sizes = [1, 64], strides = [1, 1]} : vector<1x256xf32> to vector<1x64xf32>
    %15 = arith.addf %11, %14 : vector<1x64xf32>
    %16 = vector.extract_strided_slice %7 {offsets = [0, 128], sizes = [1, 64], strides = [1, 1]} : vector<1x256xf32> to vector<1x64xf32>
    %17 = arith.addf %13, %16 : vector<1x64xf32>
    %18 = vector.extract_strided_slice %4 {offsets = [0, 192], sizes = [1, 64], strides = [1, 1]} : vector<1x256xf32> to vector<1x64xf32>
    %19 = arith.addf %15, %18 : vector<1x64xf32>
    %20 = vector.extract_strided_slice %7 {offsets = [0, 192], sizes = [1, 64], strides = [1, 1]} : vector<1x256xf32> to vector<1x64xf32>
    %21 = arith.addf %17, %20 : vector<1x64xf32>
    %cst_5 = arith.constant 3.200000e+01 : f32
    %22 = vector.broadcast %cst_5 : f32 to vector<1x64xf32>
    %23 = arith.divf %19, %22 : vector<1x64xf32>
    %cst_6 = arith.constant 3.200000e+01 : f32
    %24 = vector.broadcast %cst_6 : f32 to vector<1x64xf32>
    %25 = arith.divf %21, %24 : vector<1x64xf32>
    %26 = arith.mulf %23, %23 : vector<1x64xf32>
    %27 = arith.subf %25, %26 : vector<1x64xf32>
    %cst_7 = arith.constant 9.99999974E-6 : f32
    %28 = vector.broadcast %cst_7 : f32 to vector<1x64xf32>
    %29 = arith.addf %27, %28 : vector<1x64xf32>
    %30 = math.rsqrt %29 : vector<1x64xf32>
    %c0_8 = arith.constant 0 : index
    %c0_9 = arith.constant 0 : index
    %31 = vector.load %arg4[%c0_8, %c0_9] : memref<1x256xf32, #tpu.memory_space<vmem>>, vector<1x64xf32>
    %32 = arith.mulf %31, %30 : vector<1x64xf32>
    %c0_10 = arith.constant 0 : index
    %c0_11 = arith.constant 0 : index
    %33 = vector.load %arg5[%c0_10, %c0_11] : memref<1x256xf32, #tpu.memory_space<vmem>>, vector<1x64xf32>
    %34 = arith.mulf %23, %32 : vector<1x64xf32>
    %35 = arith.subf %33, %34 : vector<1x64xf32>
    %36 = tpu.concatenate %32, %32, %32, %32 in 1 : vector<1x64xf32>, vector<1x64xf32>, vector<1x64xf32>, vector<1x64xf32> -> vector<1x256xf32>
    %37 = tpu.concatenate %35, %35, %35, %35 in 1 : vector<1x64xf32>, vector<1x64xf32>, vector<1x64xf32>, vector<1x64xf32> -> vector<1x256xf32>
    %38 = vector.broadcast %36 : vector<1x256xf32> to vector<8x256xf32>
    %39 = arith.mulf %2, %38 : vector<8x256xf32>
    %40 = vector.broadcast %37 : vector<1x256xf32> to vector<8x256xf32>
    %41 = arith.addf %39, %40 : vector<8x256xf32>
    %cst_12 = arith.constant 0.000000e+00 : f32
    %42 = vector.broadcast %cst_12 : f32 to vector<8x256xf32>
    %43 = arith.cmpf oge, %41, %42 : vector<8x256xf32>
    %cst_13 = arith.constant 5.000000e-02 : f32
    %44 = vector.broadcast %cst_13 : f32 to vector<8x256xf32>
    %45 = arith.mulf %44, %41 : vector<8x256xf32>
    %46 = arith.select %43, %41, %45 : vector<8x256xi1>, vector<8x256xf32>
    %47 = arith.truncf %46 : vector<8x256xf32> to vector<8x256xbf16>
    %c0_14 = arith.constant 0 : index
    %c0_15 = arith.constant 0 : index
    %48 = vector.load %arg6[%c0_14, %c0_15] : memref<8x256xbf16, #tpu.memory_space<vmem>>, vector<8x256xbf16>
    tpu.vector_store %arg6[%c0_14, %c0_15], %47 {strides = array<i32>} : memref<8x256xbf16, #tpu.memory_space<vmem>>, vector<8x256xbf16>,
    return
  }
  func.func @transform_0(%arg0: i32) -> (i32, i32) {
    %c0_i32 = arith.constant 0 : i32
    %c0_i32_0 = arith.constant 0 : i32
    %c0_i32_1 = arith.constant 0 : i32
    return %c0_i32, %c0_i32_0 : i32, i32
  }
  func.func @transform_1(%arg0: i32) -> (i32, i32) {
    %c0_i32 = arith.constant 0 : i32
    %c0_i32_0 = arith.constant 0 : i32
    %c0_i32_1 = arith.constant 0 : i32
    return %c0_i32, %c0_i32_0 : i32, i32
  }
  func.func @transform_2(%arg0: i32) -> (i32, i32) {
    %c0_i32 = arith.constant 0 : i32
    %c0_i32_0 = arith.constant 0 : i32
    %c0_i32_1 = arith.constant 0 : i32
    return %c0_i32, %c0_i32_0 : i32, i32
  }
  func.func @transform_3(%arg0: i32) -> (i32, i32) {
    %c0_i32 = arith.constant 0 : i32
    %c0_i32_0 = arith.constant 0 : i32
    %c0_i32_1 = arith.constant 0 : i32
    return %c0_i32, %c0_i32_0 : i32, i32
  }
  func.func @transform_4(%arg0: i32) -> (i32, i32) {
    %c0_i32 = arith.constant 0 : i32
    %c0_i32_0 = arith.constant 0 : i32
    %c0_i32_1 = arith.constant 0 : i32
    return %c0_i32, %c0_i32_0 : i32, i32
  }
  func.func @transform_5(%arg0: i32) -> (i32, i32) {
    %c0_i32 = arith.constant 0 : i32
    %c0_i32_0 = arith.constant 0 : i32
    %c0_i32_1 = arith.constant 0 : i32
    return %c0_i32, %c0_i32_0 : i32, i32
  }
}

module attributes {stable_mosaic.version = 11 : i64} {
  func.func @_layer_kernel(%arg0: i32, %arg1: memref<32x576xbf16, #tpu.memory_space<vmem>>, %arg2: memref<576x128xbf16, #tpu.memory_space<vmem>>, %arg3: memref<1x128xf32, #tpu.memory_space<vmem>>, %arg4: memref<1x128xf32, #tpu.memory_space<vmem>>, %arg5: memref<1x128xf32, #tpu.memory_space<vmem>>, %arg6: memref<32x128xbf16, #tpu.memory_space<vmem>>) attributes {dimension_semantics = [#tpu.dimension_semantics<arbitrary>], iteration_bounds = array<i64: 1>, scalar_prefetch = 0 : i64, scratch_operands = 0 : i64, tpu.core_type = #tpu.core_type<tc>, window_params = [{pipeline_mode = #tpu.pipeline_mode<synchronous>, transform_indices = @transform_0, window_bounds = array<i64: 32, 576>}, {pipeline_mode = #tpu.pipeline_mode<synchronous>, transform_indices = @transform_1, window_bounds = array<i64: 576, 128>}, {pipeline_mode = #tpu.pipeline_mode<synchronous>, transform_indices = @transform_2, window_bounds = array<i64: 1, 128>}, {pipeline_mode = #tpu.pipeline_mode<synchronous>, transform_indices = @transform_3, window_bounds = array<i64: 1, 128>}, {pipeline_mode = #tpu.pipeline_mode<synchronous>, transform_indices = @transform_4, window_bounds = array<i64: 1, 128>}, {pipeline_mode = #tpu.pipeline_mode<synchronous>, transform_indices = @transform_5, window_bounds = array<i64: 32, 128>}]} {
    %c0 = arith.constant 0 : index
    %c0_0 = arith.constant 0 : index
    %0 = vector.load %arg1[%c0, %c0_0] : memref<32x576xbf16, #tpu.memory_space<vmem>>, vector<32x576xbf16>
    %c0_1 = arith.constant 0 : index
    %c0_2 = arith.constant 0 : index
    %1 = vector.load %arg2[%c0_1, %c0_2] : memref<576x128xbf16, #tpu.memory_space<vmem>>, vector<576x128xbf16>
    %cst = arith.constant dense<0.000000e+00> : vector<32x128xf32>
    %2 = tpu.matmul %0, %1, %cst {dimension_numbers = #tpu.dot_dimension_numbers<[1], [0], [0], [1], [0, 0, 1, 1], [], []>} : vector<32x576xbf16>, vector<576x128xbf16>, vector<32x128xf32> -> vector<32x128xf32>
    %cst_3 = arith.constant dense<0.000000e+00> : vector<128xf32>
    %3 = vector.multi_reduction <add>, %2, %cst_3 [0] : vector<32x128xf32> to vector<128xf32>
    %4 = vector.shape_cast %3 : vector<128xf32> to vector<1x128xf32>
    %5 = arith.mulf %2, %2 : vector<32x128xf32>
    %cst_4 = arith.constant dense<0.000000e+00> : vector<128xf32>
    %6 = vector.multi_reduction <add>, %5, %cst_4 [0] : vector<32x128xf32> to vector<128xf32>
    %7 = vector.shape_cast %6 : vector<128xf32> to vector<1x128xf32>
    %8 = vector.extract_strided_slice %4 {offsets = [0, 0], sizes = [1, 32], strides = [1, 1]} : vector<1x128xf32> to vector<1x32xf32>
    %9 = vector.extract_strided_slice %7 {offsets = [0, 0], sizes = [1, 32], strides = [1, 1]} : vector<1x128xf32> to vector<1x32xf32>
    %10 = vector.extract_strided_slice %4 {offsets = [0, 32], sizes = [1, 32], strides = [1, 1]} : vector<1x128xf32> to vector<1x32xf32>
    %11 = arith.addf %8, %10 : vector<1x32xf32>
    %12 = vector.extract_strided_slice %7 {offsets = [0, 32], sizes = [1, 32], strides = [1, 1]} : vector<1x128xf32> to vector<1x32xf32>
    %13 = arith.addf %9, %12 : vector<1x32xf32>
    %14 = vector.extract_strided_slice %4 {offsets = [0, 64], sizes = [1, 32], strides = [1, 1]} : vector<1x128xf32> to vector<1x32xf32>
    %15 = arith.addf %11, %14 : vector<1x32xf32>
    %16 = vector.extract_strided_slice %7 {offsets = [0, 64], sizes = [1, 32], strides = [1, 1]} : vector<1x128xf32> to vector<1x32xf32>
    %17 = arith.addf %13, %16 : vector<1x32xf32>
    %18 = vector.extract_strided_slice %4 {offsets = [0, 96], sizes = [1, 32], strides = [1, 1]} : vector<1x128xf32> to vector<1x32xf32>
    %19 = arith.addf %15, %18 : vector<1x32xf32>
    %20 = vector.extract_strided_slice %7 {offsets = [0, 96], sizes = [1, 32], strides = [1, 1]} : vector<1x128xf32> to vector<1x32xf32>
    %21 = arith.addf %17, %20 : vector<1x32xf32>
    %cst_5 = arith.constant 1.280000e+02 : f32
    %22 = vector.broadcast %cst_5 : f32 to vector<1x32xf32>
    %23 = arith.divf %19, %22 : vector<1x32xf32>
    %cst_6 = arith.constant 1.280000e+02 : f32
    %24 = vector.broadcast %cst_6 : f32 to vector<1x32xf32>
    %25 = arith.divf %21, %24 : vector<1x32xf32>
    %26 = arith.mulf %23, %23 : vector<1x32xf32>
    %27 = arith.subf %25, %26 : vector<1x32xf32>
    %cst_7 = arith.constant 9.99999974E-6 : f32
    %28 = vector.broadcast %cst_7 : f32 to vector<1x32xf32>
    %29 = arith.addf %27, %28 : vector<1x32xf32>
    %30 = math.rsqrt %29 : vector<1x32xf32>
    %c0_8 = arith.constant 0 : index
    %c0_9 = arith.constant 0 : index
    %31 = vector.load %arg4[%c0_8, %c0_9] : memref<1x128xf32, #tpu.memory_space<vmem>>, vector<1x32xf32>
    %32 = arith.mulf %31, %30 : vector<1x32xf32>
    %c0_10 = arith.constant 0 : index
    %c0_11 = arith.constant 0 : index
    %33 = vector.load %arg5[%c0_10, %c0_11] : memref<1x128xf32, #tpu.memory_space<vmem>>, vector<1x32xf32>
    %34 = arith.mulf %23, %32 : vector<1x32xf32>
    %35 = arith.subf %33, %34 : vector<1x32xf32>
    %36 = tpu.concatenate %32, %32, %32, %32 in 1 : vector<1x32xf32>, vector<1x32xf32>, vector<1x32xf32>, vector<1x32xf32> -> vector<1x128xf32>
    %37 = tpu.concatenate %35, %35, %35, %35 in 1 : vector<1x32xf32>, vector<1x32xf32>, vector<1x32xf32>, vector<1x32xf32> -> vector<1x128xf32>
    %38 = vector.broadcast %36 : vector<1x128xf32> to vector<32x128xf32>
    %39 = arith.mulf %2, %38 : vector<32x128xf32>
    %40 = vector.broadcast %37 : vector<1x128xf32> to vector<32x128xf32>
    %41 = arith.addf %39, %40 : vector<32x128xf32>
    %cst_12 = arith.constant 0.000000e+00 : f32
    %42 = vector.broadcast %cst_12 : f32 to vector<32x128xf32>
    %43 = arith.cmpf oge, %41, %42 : vector<32x128xf32>
    %cst_13 = arith.constant 5.000000e-02 : f32
    %44 = vector.broadcast %cst_13 : f32 to vector<32x128xf32>
    %45 = arith.mulf %44, %41 : vector<32x128xf32>
    %46 = arith.select %43, %41, %45 : vector<32x128xi1>, vector<32x128xf32>
    %47 = arith.truncf %46 : vector<32x128xf32> to vector<32x128xbf16>
    %c0_14 = arith.constant 0 : index
    %c0_15 = arith.constant 0 : index
    %48 = vector.load %arg6[%c0_14, %c0_15] : memref<32x128xbf16, #tpu.memory_space<vmem>>, vector<32x128xbf16>
    tpu.vector_store %arg6[%c0_14, %c0_15], %47 {strides = array<i32>} : memref<32x128xbf16, #tpu.memory_space<vmem>>, vector<32x128xbf16>,
    return
  }
  func.func @transform_0(%arg0: i32) -> (i32, i32) {
    %c0_i32 = arith.constant 0 : i32
    %c0_i32_0 = arith.constant 0 : i32
    %c0_i32_1 = arith.constant 0 : i32
    return %c0_i32, %c0_i32_0 : i32, i32
  }
  func.func @transform_1(%arg0: i32) -> (i32, i32) {
    %c0_i32 = arith.constant 0 : i32
    %c0_i32_0 = arith.constant 0 : i32
    %c0_i32_1 = arith.constant 0 : i32
    return %c0_i32, %c0_i32_0 : i32, i32
  }
  func.func @transform_2(%arg0: i32) -> (i32, i32) {
    %c0_i32 = arith.constant 0 : i32
    %c0_i32_0 = arith.constant 0 : i32
    %c0_i32_1 = arith.constant 0 : i32
    return %c0_i32, %c0_i32_0 : i32, i32
  }
  func.func @transform_3(%arg0: i32) -> (i32, i32) {
    %c0_i32 = arith.constant 0 : i32
    %c0_i32_0 = arith.constant 0 : i32
    %c0_i32_1 = arith.constant 0 : i32
    return %c0_i32, %c0_i32_0 : i32, i32
  }
  func.func @transform_4(%arg0: i32) -> (i32, i32) {
    %c0_i32 = arith.constant 0 : i32
    %c0_i32_0 = arith.constant 0 : i32
    %c0_i32_1 = arith.constant 0 : i32
    return %c0_i32, %c0_i32_0 : i32, i32
  }
  func.func @transform_5(%arg0: i32) -> (i32, i32) {
    %c0_i32 = arith.constant 0 : i32
    %c0_i32_0 = arith.constant 0 : i32
    %c0_i32_1 = arith.constant 0 : i32
    return %c0_i32, %c0_i32_0 : i32, i32
  }
}

module attributes {stable_mosaic.version = 11 : i64} {
  func.func @_layer_kernel(%arg0: i32, %arg1: memref<128x288xbf16, #tpu.memory_space<vmem>>, %arg2: memref<288x64xbf16, #tpu.memory_space<vmem>>, %arg3: memref<1x64xf32, #tpu.memory_space<vmem>>, %arg4: memref<1x64xf32, #tpu.memory_space<vmem>>, %arg5: memref<1x64xf32, #tpu.memory_space<vmem>>, %arg6: memref<128x64xbf16, #tpu.memory_space<vmem>>) attributes {dimension_semantics = [#tpu.dimension_semantics<arbitrary>], iteration_bounds = array<i64: 1>, scalar_prefetch = 0 : i64, scratch_operands = 0 : i64, tpu.core_type = #tpu.core_type<tc>, window_params = [{pipeline_mode = #tpu.pipeline_mode<synchronous>, transform_indices = @transform_0, window_bounds = array<i64: 128, 288>}, {pipeline_mode = #tpu.pipeline_mode<synchronous>, transform_indices = @transform_1, window_bounds = array<i64: 288, 64>}, {pipeline_mode = #tpu.pipeline_mode<synchronous>, transform_indices = @transform_2, window_bounds = array<i64: 1, 64>}, {pipeline_mode = #tpu.pipeline_mode<synchronous>, transform_indices = @transform_3, window_bounds = array<i64: 1, 64>}, {pipeline_mode = #tpu.pipeline_mode<synchronous>, transform_indices = @transform_4, window_bounds = array<i64: 1, 64>}, {pipeline_mode = #tpu.pipeline_mode<synchronous>, transform_indices = @transform_5, window_bounds = array<i64: 128, 64>}]} {
    %c0 = arith.constant 0 : index
    %c0_0 = arith.constant 0 : index
    %0 = vector.load %arg1[%c0, %c0_0] : memref<128x288xbf16, #tpu.memory_space<vmem>>, vector<128x288xbf16>
    %c0_1 = arith.constant 0 : index
    %c0_2 = arith.constant 0 : index
    %1 = vector.load %arg2[%c0_1, %c0_2] : memref<288x64xbf16, #tpu.memory_space<vmem>>, vector<288x64xbf16>
    %cst = arith.constant dense<0.000000e+00> : vector<128x64xf32>
    %2 = tpu.matmul %0, %1, %cst {dimension_numbers = #tpu.dot_dimension_numbers<[1], [0], [0], [1], [0, 0, 1, 1], [], []>} : vector<128x288xbf16>, vector<288x64xbf16>, vector<128x64xf32> -> vector<128x64xf32>
    %cst_3 = arith.constant dense<0.000000e+00> : vector<64xf32>
    %3 = vector.multi_reduction <add>, %2, %cst_3 [0] : vector<128x64xf32> to vector<64xf32>
    %4 = vector.shape_cast %3 : vector<64xf32> to vector<1x64xf32>
    %5 = arith.mulf %2, %2 : vector<128x64xf32>
    %cst_4 = arith.constant dense<0.000000e+00> : vector<64xf32>
    %6 = vector.multi_reduction <add>, %5, %cst_4 [0] : vector<128x64xf32> to vector<64xf32>
    %7 = vector.shape_cast %6 : vector<64xf32> to vector<1x64xf32>
    %8 = vector.extract_strided_slice %4 {offsets = [0, 0], sizes = [1, 16], strides = [1, 1]} : vector<1x64xf32> to vector<1x16xf32>
    %9 = vector.extract_strided_slice %7 {offsets = [0, 0], sizes = [1, 16], strides = [1, 1]} : vector<1x64xf32> to vector<1x16xf32>
    %10 = vector.extract_strided_slice %4 {offsets = [0, 16], sizes = [1, 16], strides = [1, 1]} : vector<1x64xf32> to vector<1x16xf32>
    %11 = arith.addf %8, %10 : vector<1x16xf32>
    %12 = vector.extract_strided_slice %7 {offsets = [0, 16], sizes = [1, 16], strides = [1, 1]} : vector<1x64xf32> to vector<1x16xf32>
    %13 = arith.addf %9, %12 : vector<1x16xf32>
    %14 = vector.extract_strided_slice %4 {offsets = [0, 32], sizes = [1, 16], strides = [1, 1]} : vector<1x64xf32> to vector<1x16xf32>
    %15 = arith.addf %11, %14 : vector<1x16xf32>
    %16 = vector.extract_strided_slice %7 {offsets = [0, 32], sizes = [1, 16], strides = [1, 1]} : vector<1x64xf32> to vector<1x16xf32>
    %17 = arith.addf %13, %16 : vector<1x16xf32>
    %18 = vector.extract_strided_slice %4 {offsets = [0, 48], sizes = [1, 16], strides = [1, 1]} : vector<1x64xf32> to vector<1x16xf32>
    %19 = arith.addf %15, %18 : vector<1x16xf32>
    %20 = vector.extract_strided_slice %7 {offsets = [0, 48], sizes = [1, 16], strides = [1, 1]} : vector<1x64xf32> to vector<1x16xf32>
    %21 = arith.addf %17, %20 : vector<1x16xf32>
    %cst_5 = arith.constant 5.120000e+02 : f32
    %22 = vector.broadcast %cst_5 : f32 to vector<1x16xf32>
    %23 = arith.divf %19, %22 : vector<1x16xf32>
    %cst_6 = arith.constant 5.120000e+02 : f32
    %24 = vector.broadcast %cst_6 : f32 to vector<1x16xf32>
    %25 = arith.divf %21, %24 : vector<1x16xf32>
    %26 = arith.mulf %23, %23 : vector<1x16xf32>
    %27 = arith.subf %25, %26 : vector<1x16xf32>
    %cst_7 = arith.constant 9.99999974E-6 : f32
    %28 = vector.broadcast %cst_7 : f32 to vector<1x16xf32>
    %29 = arith.addf %27, %28 : vector<1x16xf32>
    %30 = math.rsqrt %29 : vector<1x16xf32>
    %c0_8 = arith.constant 0 : index
    %c0_9 = arith.constant 0 : index
    %31 = vector.load %arg4[%c0_8, %c0_9] : memref<1x64xf32, #tpu.memory_space<vmem>>, vector<1x16xf32>
    %32 = arith.mulf %31, %30 : vector<1x16xf32>
    %c0_10 = arith.constant 0 : index
    %c0_11 = arith.constant 0 : index
    %33 = vector.load %arg5[%c0_10, %c0_11] : memref<1x64xf32, #tpu.memory_space<vmem>>, vector<1x16xf32>
    %34 = arith.mulf %23, %32 : vector<1x16xf32>
    %35 = arith.subf %33, %34 : vector<1x16xf32>
    %36 = tpu.concatenate %32, %32, %32, %32 in 1 : vector<1x16xf32>, vector<1x16xf32>, vector<1x16xf32>, vector<1x16xf32> -> vector<1x64xf32>
    %37 = tpu.concatenate %35, %35, %35, %35 in 1 : vector<1x16xf32>, vector<1x16xf32>, vector<1x16xf32>, vector<1x16xf32> -> vector<1x64xf32>
    %38 = vector.broadcast %36 : vector<1x64xf32> to vector<128x64xf32>
    %39 = arith.mulf %2, %38 : vector<128x64xf32>
    %40 = vector.broadcast %37 : vector<1x64xf32> to vector<128x64xf32>
    %41 = arith.addf %39, %40 : vector<128x64xf32>
    %cst_12 = arith.constant 0.000000e+00 : f32
    %42 = vector.broadcast %cst_12 : f32 to vector<128x64xf32>
    %43 = arith.cmpf oge, %41, %42 : vector<128x64xf32>
    %cst_13 = arith.constant 5.000000e-02 : f32
    %44 = vector.broadcast %cst_13 : f32 to vector<128x64xf32>
    %45 = arith.mulf %44, %41 : vector<128x64xf32>
    %46 = arith.select %43, %41, %45 : vector<128x64xi1>, vector<128x64xf32>
    %47 = arith.truncf %46 : vector<128x64xf32> to vector<128x64xbf16>
    %c0_14 = arith.constant 0 : index
    %c0_15 = arith.constant 0 : index
    %48 = vector.load %arg6[%c0_14, %c0_15] : memref<128x64xbf16, #tpu.memory_space<vmem>>, vector<128x64xbf16>
    tpu.vector_store %arg6[%c0_14, %c0_15], %47 {strides = array<i32>} : memref<128x64xbf16, #tpu.memory_space<vmem>>, vector<128x64xbf16>,
    return
  }
  func.func @transform_0(%arg0: i32) -> (i32, i32) {
    %c0_i32 = arith.constant 0 : i32
    %c0_i32_0 = arith.constant 0 : i32
    %c0_i32_1 = arith.constant 0 : i32
    return %c0_i32, %c0_i32_0 : i32, i32
  }
  func.func @transform_1(%arg0: i32) -> (i32, i32) {
    %c0_i32 = arith.constant 0 : i32
    %c0_i32_0 = arith.constant 0 : i32
    %c0_i32_1 = arith.constant 0 : i32
    return %c0_i32, %c0_i32_0 : i32, i32
  }
  func.func @transform_2(%arg0: i32) -> (i32, i32) {
    %c0_i32 = arith.constant 0 : i32
    %c0_i32_0 = arith.constant 0 : i32
    %c0_i32_1 = arith.constant 0 : i32
    return %c0_i32, %c0_i32_0 : i32, i32
  }
  func.func @transform_3(%arg0: i32) -> (i32, i32) {
    %c0_i32 = arith.constant 0 : i32
    %c0_i32_0 = arith.constant 0 : i32
    %c0_i32_1 = arith.constant 0 : i32
    return %c0_i32, %c0_i32_0 : i32, i32
  }
  func.func @transform_4(%arg0: i32) -> (i32, i32) {
    %c0_i32 = arith.constant 0 : i32
    %c0_i32_0 = arith.constant 0 : i32
    %c0_i32_1 = arith.constant 0 : i32
    return %c0_i32, %c0_i32_0 : i32, i32
  }
  func.func @transform_5(%arg0: i32) -> (i32, i32) {
    %c0_i32 = arith.constant 0 : i32
    %c0_i32_0 = arith.constant 0 : i32
    %c0_i32_1 = arith.constant 0 : i32
    return %c0_i32, %c0_i32_0 : i32, i32
  }
}

module attributes {stable_mosaic.version = 11 : i64} {
  func.func @_layer_kernel(%arg0: i32, %arg1: memref<128x144xbf16, #tpu.memory_space<vmem>>, %arg2: memref<144x12xbf16, #tpu.memory_space<vmem>>, %arg3: memref<1x12xf32, #tpu.memory_space<vmem>>, %arg4: memref<1x12xf32, #tpu.memory_space<vmem>>, %arg5: memref<1x12xf32, #tpu.memory_space<vmem>>, %arg6: memref<128x12xf32, #tpu.memory_space<vmem>>) attributes {dimension_semantics = [#tpu.dimension_semantics<parallel>], iteration_bounds = array<i64: 4>, scalar_prefetch = 0 : i64, scratch_operands = 0 : i64, tpu.core_type = #tpu.core_type<tc>, window_params = [{transform_indices = @transform_0, window_bounds = array<i64: 128, 144>}, {pipeline_mode = #tpu.pipeline_mode<synchronous>, transform_indices = @transform_1, window_bounds = array<i64: 144, 12>}, {pipeline_mode = #tpu.pipeline_mode<synchronous>, transform_indices = @transform_2, window_bounds = array<i64: 1, 12>}, {pipeline_mode = #tpu.pipeline_mode<synchronous>, transform_indices = @transform_3, window_bounds = array<i64: 1, 12>}, {pipeline_mode = #tpu.pipeline_mode<synchronous>, transform_indices = @transform_4, window_bounds = array<i64: 1, 12>}, {transform_indices = @transform_5, window_bounds = array<i64: 128, 12>}]} {
    %c0 = arith.constant 0 : index
    %c0_0 = arith.constant 0 : index
    %0 = vector.load %arg1[%c0, %c0_0] : memref<128x144xbf16, #tpu.memory_space<vmem>>, vector<128x144xbf16>
    %c0_1 = arith.constant 0 : index
    %c0_2 = arith.constant 0 : index
    %1 = vector.load %arg2[%c0_1, %c0_2] : memref<144x12xbf16, #tpu.memory_space<vmem>>, vector<144x12xbf16>
    %cst = arith.constant dense<0.000000e+00> : vector<128x12xf32>
    %2 = tpu.matmul %0, %1, %cst {dimension_numbers = #tpu.dot_dimension_numbers<[1], [0], [0], [1], [0, 0, 1, 1], [], []>} : vector<128x144xbf16>, vector<144x12xbf16>, vector<128x12xf32> -> vector<128x12xf32>
    %c0_3 = arith.constant 0 : index
    %c0_4 = arith.constant 0 : index
    %3 = vector.load %arg3[%c0_3, %c0_4] : memref<1x12xf32, #tpu.memory_space<vmem>>, vector<1x12xf32>
    %4 = vector.broadcast %3 : vector<1x12xf32> to vector<128x12xf32>
    %5 = arith.addf %2, %4 : vector<128x12xf32>
    %6 = math.tanh %5 : vector<128x12xf32>
    %c0_5 = arith.constant 0 : index
    %c0_6 = arith.constant 0 : index
    %7 = vector.load %arg6[%c0_5, %c0_6] : memref<128x12xf32, #tpu.memory_space<vmem>>, vector<128x12xf32>
    tpu.vector_store %arg6[%c0_5, %c0_6], %6 {strides = array<i32>} : memref<128x12xf32, #tpu.memory_space<vmem>>, vector<128x12xf32>,
    return
  }
  func.func @transform_0(%arg0: i32) -> (i32, i32) {
    %c0_i32 = arith.constant 0 : i32
    %c0_i32_0 = arith.constant 0 : i32
    return %arg0, %c0_i32 : i32, i32
  }
  func.func @transform_1(%arg0: i32) -> (i32, i32) {
    %c0_i32 = arith.constant 0 : i32
    %c0_i32_0 = arith.constant 0 : i32
    %c0_i32_1 = arith.constant 0 : i32
    return %c0_i32, %c0_i32_0 : i32, i32
  }
  func.func @transform_2(%arg0: i32) -> (i32, i32) {
    %c0_i32 = arith.constant 0 : i32
    %c0_i32_0 = arith.constant 0 : i32
    %c0_i32_1 = arith.constant 0 : i32
    return %c0_i32, %c0_i32_0 : i32, i32
  }
  func.func @transform_3(%arg0: i32) -> (i32, i32) {
    %c0_i32 = arith.constant 0 : i32
    %c0_i32_0 = arith.constant 0 : i32
    %c0_i32_1 = arith.constant 0 : i32
    return %c0_i32, %c0_i32_0 : i32, i32
  }
  func.func @transform_4(%arg0: i32) -> (i32, i32) {
    %c0_i32 = arith.constant 0 : i32
    %c0_i32_0 = arith.constant 0 : i32
    %c0_i32_1 = arith.constant 0 : i32
    return %c0_i32, %c0_i32_0 : i32, i32
  }
  func.func @transform_5(%arg0: i32) -> (i32, i32) {
    %c0_i32 = arith.constant 0 : i32
    %c0_i32_0 = arith.constant 0 : i32
    return %arg0, %c0_i32 : i32, i32
  }
}

</mosaic_0001>

<bundles_post_ra>
// kernel: _lambda_.5
= control target key start
LH: loop header
LB: loop body
LE: loop exit
PB: predicated region body
PF: predicated region fallthrough
CT: control target
= control target key end

     0   :  { %10 = vsyncpa [#allocation3], 0  ;;  %s413_s0 = inlined_call_operand.vmem [shape: bf16[8,32], index: 0, kind: input, shape index: {}]   ;;  %s414_s1 = inlined_call_operand.hbm [shape: bf16[32,512], index: 1, kind: input, shape index: {}]   ;;  %s415_s2 = inlined_call_operand.hbm [shape: f32[1,512], index: 2, kind: input, shape index: {}]   ;;  %s416_s3 = inlined_call_operand.hbm [shape: f32[1,512], index: 3, kind: input, shape index: {}]   ;;  %s417_s4 = inlined_call_operand.hbm [shape: f32[1,512], index: 4, kind: input, shape index: {}]   ;;  %s418_s5 = inlined_call_operand.vmem [shape: bf16[8,512], index: 5, kind: output, shape index: {}]  }
   0x1   :  { %11 = vsyncpa [#allocation5], 0  ;;  %s33_s20 = sshll.u32 %s415_s2, 4  ;;  %s34_s20 = int_to_ptr.hbm [resolvable:$true] %s33_s20 }
   0x2   :  { %12 = vsyncpa [#allocation8], 0  ;;  %s356_s21 = smov [#allocation4]   ;;  %s19_s25 = sshll.u32 %s414_s1, 4  ;;  %s20_s25 = int_to_ptr.hbm [resolvable:$true] %s19_s25 }
   0x3   :  { %s35_s22 = sshll.u32 %s356_s21, 4  ;;  %s357_s26 = smov [#allocation2]   ;;  %s36_s22 = int_to_ptr.vmem [resolvable:$true] %s35_s22 }
   0x4   :  { %38 = dma.hbm_to_vmem [thread:$0]  %s34_s20, 64, %s36_s22, [#allocation5]  }
   0x5   :  { %s21_s27 = sshll.u32 %s357_s26, 4  ;;  %s358_s28 = smov 256   ;;  %s22_s27 = int_to_ptr.vmem [resolvable:$true] %s21_s27 }
   0x6   :  { %s359_s29 = smov 16   ;;  %s44_s2 = sshll.u32 %s416_s3, 4  ;;  %s45_s2 = int_to_ptr.hbm [resolvable:$true] %s44_s2 }
   0x7   :  { %27 = dma.hbm_to_vmem [thread:$0]  %s20_s25, 1024, %s22_s27, [#allocation3], %s358_s28, %s358_s28, %s359_s29  }
   0x8   :  { %s360_s7 = smov [#allocation6]   ;;  %s55_s1 = sshll.u32 %s417_s4, 4  ;;  %s56_s1 = int_to_ptr.hbm [resolvable:$true] %s55_s1 }
   0x9   :  { %s46_s8 = sshll.u32 %s360_s7, 4  ;;  %s361_s11 = smov [#allocation7]   ;;  %s47_s8 = int_to_ptr.vmem [resolvable:$true] %s46_s8 }
   0xa   :  { %49 = dma.hbm_to_vmem [thread:$0]  %s45_s2, 64, %s47_s8, [#allocation5]  }
   0xb   :  { %s57_s12 = sshll.u32 %s361_s11, 4  ;;  %s58_s12 = int_to_ptr.vmem [resolvable:$true] %s57_s12 }
   0xc   :  { %60 = dma.hbm_to_vmem [thread:$0]  %s56_s1, 64, %s58_s12, [#allocation8]  }
   0xd   :  { %350 = dma.done.wait [#allocation3], 1024  }
   0xe   :  { %351 = vsyncadd [#allocation3], 4294966272 }
   0xf   :  { %352 = dma.done.wait [#allocation5], 128  }
  0x10   :  { %353 = vsyncadd [#allocation5], 4294967168 }
  0x11   :  { %354 = dma.done.wait [#allocation8], 64  }
  0x12   :  { %355 = vsyncadd [#allocation8], 4294967232  ;;  %v222_v0 = vld [vmem:[#allocation2 + $0x20] sm:$0xf]  ;;  %v246_v1 = vld [vmem:[#allocation2 + $0x2c] sm:$0xf0] }
  0x13   :  { %v244_v2 = vld [vmem:[#allocation2 + $0x24] sm:$0xf]  ;;  %v223_v3 = vor.u32 %v246_v1, %v222_v0  ;;  %v224_v4 = vld [vmem:[#allocation2 + $0x30] sm:$0xf0]  ;;  %v230_v5 = vld [vmem:[#allocation2 + $0x28] sm:$0xf] }
  0x14   :  { %v247_v6 = vld [vmem:[#allocation2 + $0x34] sm:$0xf0]  ;;  %v227_v7 = vor.u32 %v244_v2, %v224_v4  ;;  %v245_v9 = vld [vmem:[#allocation2 + $0x2c] sm:$0xf]  ;;  %v232_v10 = vld [vmem:[#allocation2 + $0x38] sm:$0xf0] }
  0x15   :  { %v231_v8 = vor.u32 %v247_v6, %v230_v5  ;;  %v206_v11 = vld [vmem:[#allocation2] sm:$0xf]  ;;  %147 = vmatpush.bf16.msra.mxu0 %v223_v3  ;;  %v235_v12 = vor.u32 %v245_v9, %v232_v10  ;;  %v242_v13 = vld [vmem:[#allocation2 + $0xc] sm:$0xf0]  ;;  %v240_v14 = vld [vmem:[#allocation2 + $0x4] sm:$0xf] }
  0x16   :  { %v208_v15 = vld [vmem:[#allocation2 + $0x10] sm:$0xf0]  ;;  %160 = vmatpush.bf16.msra.mxu1 %v227_v7  ;;  %v207_v16 = vor.u32 %v242_v13, %v206_v11  ;;  %v214_v18 = vld [vmem:[#allocation2 + $0x8] sm:$0xf]  ;;  %v243_v19 = vld [vmem:[#allocation2 + $0x14] sm:$0xf0] }
  0x17   :  { %173 = vmatpush.bf16.msra.mxu2 %v231_v8  ;;  %v211_v17 = vor.u32 %v240_v14, %v208_v15  ;;  %v241_v20 = vld [vmem:[#allocation2 + $0xc] sm:$0xf]  ;;  %186 = vmatpush.bf16.msra.mxu3 %v235_v12  ;;  %v215_v21 = vor.u32 %v243_v19, %v214_v18  ;;  %v216_v22 = vld [vmem:[#allocation2 + $0x18] sm:$0xf0]  ;;  %v78_v24 = vld [vmem:[%s413_s0] sm:$0xf] }
  0x18   :  { %v219_v23 = vor.u32 %v241_v20, %v216_v22  ;;  %vm137_vm0 = vcmask 261120   ;;  %v87_v25 = vld [vmem:[#allocation4] sm:$0xf] }
  0x19   :  { %148 = vmatpush.bf16.msra.mxu0 %v207_v16  ;;  %v89_v26 = vperm.slane %v87_v25, 0  ;;  %v90_v27 = vperm.slane %v87_v25, 1  ;;  %v91_v33 = vperm.slane %v87_v25, 2  ;;  %v92_v34 = vperm.slane %v87_v25, 3 }
  0x1a   :  { %161 = vmatpush.bf16.msra.mxu1 %v211_v17 }
  0x1b   :  { %174 = vmatpush.bf16.msra.mxu2 %v215_v21  ;;  %187 = vmatpush.bf16.msra.mxu3 %v219_v23 }
  0x1c   :  { %236 = vmatmul.msk.bf16.vlgmr.msra.gmra.mxu0 %vm137_vm0, %v78_v24 }
  0x1d   :  { %237 = vmatmul.msk.bf16.vlgmr.msra.gmra.mxu1 %vm137_vm0, %v78_v24 }
  0x1e   :  { %238 = vmatmul.msk.bf16.vlgmr.msra.gmra.mxu2 %vm137_vm0, %v78_v24  ;;  %239 = vmatmul.msk.bf16.vlgmr.msra.gmra.mxu3 %vm137_vm0, %v78_v24 }
  0x99   :  { %v150_v28 = vpop.f32.mrf.mxu0 }
  0x9a   :  { %v151_v29 = vadd.f32 %v150_v28, %v89_v26  ;;  %v163_v30 = vpop.f32.mrf.mxu1 }
  0x9b   :  { %v164_v31 = vadd.f32 %v163_v30, %v90_v27 }
  0x9d   :  { %v193_v32 = vpack.c.bf16 %v164_v31, %v151_v29 }
  0x9f   :  { %195 = vst [vmem:[%s418_s5] sm:$0xff] %v193_v32 }
  0xa1   :  { %v176_v35 = vpop.f32.mrf.mxu2  ;;  %v189_v37 = vpop.f32.mrf.mxu3 }
  0xa2   :  { %v177_v36 = vadd.f32 %v176_v35, %v91_v33  ;;  %v152_v38 = vpop.f32.mrf.mxu0  ;;  %v190_v39 = vadd.f32 %v189_v37, %v92_v34  ;;  %v165_v40 = vpop.f32.mrf.mxu1 }
  0xa4   :  { %v194_v41 = vpack.c.bf16 %v190_v39, %v177_v36 }
  0xa6   :  { %196 = vst [vmem:[%s418_s5 + $0x8] sm:$0xff] %v194_v41 }
  0xa9   :  { %v178_v42 = vpop.f32.mrf.mxu2  ;;  %v191_v43 = vpop.f32.mrf.mxu3 }
  0xaa   :  { %201 = vsyncpa [#allocation3], 1 }
  0xab   :  { %202 = vsyncpa [#allocation5], 1 }
  0xac   :  { %203 = vsyncpa [#allocation8], 1 }

// kernel: _lambda_.7
= control target key start
LH: loop header
LB: loop body
LE: loop exit
PB: predicated region body
PF: predicated region fallthrough
CT: control target
= control target key end

     0   :  { %10 = vsyncpa [#allocation3], 0  ;;  %s1193_s0 = inlined_call_operand.vmem [shape: bf16[32,576], index: 0, kind: input, shape index: {}]   ;;  %s1194_s1 = inlined_call_operand.hbm [shape: bf16[576,128], index: 1, kind: input, shape index: {}]   ;;  %s1195_s2 = inlined_call_operand.hbm [shape: f32[1,128], index: 2, kind: input, shape index: {}]   ;;  %s1196_s3 = inlined_call_operand.hbm [shape: f32[1,128], index: 3, kind: input, shape index: {}]   ;;  %s1197_s4 = inlined_call_operand.hbm [shape: f32[1,128], index: 4, kind: input, shape index: {}]   ;;  %s1198_s5 = inlined_call_operand.vmem [shape: bf16[32,128], index: 5, kind: output, shape index: {}]  }
   0x1   :  { %11 = vsyncpa [#allocation5], 0  ;;  %s33_s20 = sshll.u32 %s1195_s2, 4  ;;  %s34_s20 = int_to_ptr.hbm [resolvable:$true] %s33_s20 }
   0x2   :  { %12 = vsyncpa [#allocation8], 0  ;;  %s1034_s21 = smov [#allocation4]   ;;  %s19_s25 = sshll.u32 %s1194_s1, 4  ;;  %s20_s25 = int_to_ptr.hbm [resolvable:$true] %s19_s25 }
   0x3   :  { %s35_s22 = sshll.u32 %s1034_s21, 4  ;;  %s1035_s26 = smov [#allocation2]   ;;  %s36_s22 = int_to_ptr.vmem [resolvable:$true] %s35_s22 }
   0x4   :  { %38 = dma.hbm_to_vmem [thread:$0]  %s34_s20, 16, %s36_s22, [#allocation5]  }
   0x5   :  { %s21_s27 = sshll.u32 %s1035_s26, 4  ;;  %s1036_s28 = smov 64   ;;  %s22_s27 = int_to_ptr.vmem [resolvable:$true] %s21_s27 }
   0x6   :  { %s1037_s29 = smov 4   ;;  %s44_s6 = sshll.u32 %s1196_s3, 4  ;;  %s45_s6 = int_to_ptr.hbm [resolvable:$true] %s44_s6 }
   0x7   :  { %27 = dma.hbm_to_vmem [thread:$0]  %s20_s25, 4608, %s22_s27, [#allocation3], %s1036_s28, %s1036_s28, %s1037_s29  }
   0x8   :  { %s1038_s7 = smov [#allocation6]   ;;  %s55_s10 = sshll.u32 %s1197_s4, 4  ;;  %s56_s10 = int_to_ptr.hbm [resolvable:$true] %s55_s10 }
   0x9   :  { %s46_s8 = sshll.u32 %s1038_s7, 4  ;;  %s1039_s11 = smov [#allocation7]   ;;  %s47_s8 = int_to_ptr.vmem [resolvable:$true] %s46_s8 }
   0xa   :  { %49 = dma.hbm_to_vmem [thread:$0]  %s45_s6, 16, %s47_s8, [#allocation5]  }
   0xb   :  { %s57_s12 = sshll.u32 %s1039_s11, 4  ;;  %s58_s12 = int_to_ptr.vmem [resolvable:$true] %s57_s12 }
   0xc   :  { %60 = dma.hbm_to_vmem [thread:$0]  %s56_s10, 16, %s58_s12, [#allocation8]  }
   0xd   :  { %1028 = dma.done.wait [#allocation3], 4608  }
   0xe   :  { %1029 = vsyncadd [#allocation3], 4294962688 }
   0xf   :  { %1030 = dma.done.wait [#allocation5], 32  }
  0x10   :  { %1031 = vsyncadd [#allocation5], 4294967264 }
  0x11   :  { %1032 = dma.done.wait [#allocation8], 16  }
  0x12   :  { %1033 = vsyncadd [#allocation8], 4294967280  ;;  %v875_v0 = vld [vmem:[#allocation2 + $0x38] sm:$0xff]  ;;  %v874_v4 = vld [vmem:[#allocation2 + $0x30] sm:$0xff]  ;;  %vm428_vm0 = vcmask 523264   ;;  %s1041_s23 = smov 96  }
  0x13   :  { %v883_v1 = vld [vmem:[#allocation2 + $0x78] sm:$0xff]  ;;  %435 = vmatpush.bf16.msra.mxu0 %v875_v0  ;;  %v882_v5 = vld [vmem:[#allocation2 + $0x70] sm:$0xff]  ;;  %v873_v8 = vld [vmem:[#allocation2 + $0x28] sm:$0xff]  ;;  %vm616_vm5 = vcmask 261120   ;;  %vm619_vm6 = vcmask 785408  }
  0x14   :  { %v891_v2 = vld [vmem:[#allocation2 + $0xb8] sm:$0xff]  ;;  %454 = vmatpush.bf16.msra.mxu1 %v883_v1  ;;  %v890_v6 = vld [vmem:[#allocation2 + $0xb0] sm:$0xff]  ;;  %v881_v9 = vld [vmem:[#allocation2 + $0x68] sm:$0xff] }
  0x15   :  { %v899_v3 = vld [vmem:[#allocation2 + $0xf8] sm:$0xff]  ;;  %473 = vmatpush.bf16.msra.mxu2 %v891_v2  ;;  %v898_v7 = vld [vmem:[#allocation2 + $0xf0] sm:$0xff]  ;;  %v889_v10 = vld [vmem:[#allocation2 + $0xa8] sm:$0xff] }
  0x16   :  { %492 = vmatpush.bf16.msra.mxu3 %v899_v3  ;;  %v897_v11 = vld [vmem:[#allocation2 + $0xe8] sm:$0xff]  ;;  %v872_v12 = vld [vmem:[#allocation2 + $0x20] sm:$0xff]  ;;  %v871_v16 = vld [vmem:[#allocation2 + $0x18] sm:$0xff] }
  0x17   :  { %436 = vmatpush.bf16.msra.mxu0 %v874_v4  ;;  %v880_v13 = vld [vmem:[#allocation2 + $0x60] sm:$0xff]  ;;  %v879_v17 = vld [vmem:[#allocation2 + $0x58] sm:$0xff]  ;;  %v870_v20 = vld [vmem:[#allocation2 + $0x10] sm:$0xff] }
  0x18   :  { %455 = vmatpush.bf16.msra.mxu1 %v882_v5  ;;  %v888_v14 = vld [vmem:[#allocation2 + $0xa0] sm:$0xff]  ;;  %v887_v18 = vld [vmem:[#allocation2 + $0x98] sm:$0xff]  ;;  %v878_v21 = vld [vmem:[#allocation2 + $0x50] sm:$0xff] }
  0x19   :  { %474 = vmatpush.bf16.msra.mxu2 %v890_v6  ;;  %v896_v15 = vld [vmem:[#allocation2 + $0xe0] sm:$0xff]  ;;  %v895_v19 = vld [vmem:[#allocation2 + $0xd8] sm:$0xff]  ;;  %v886_v22 = vld [vmem:[#allocation2 + $0x90] sm:$0xff] }
  0x1a   :  { %493 = vmatpush.bf16.msra.mxu3 %v898_v7  ;;  %v894_v23 = vld [vmem:[#allocation2 + $0xd0] sm:$0xff]  ;;  %v869_v24 = vld [vmem:[#allocation2 + $0x8] sm:$0xff]  ;;  %v868_v28 = vld [vmem:[#allocation2] sm:$0xff] }
  0x1b   :  { %437 = vmatpush.bf16.msra.mxu0 %v873_v8  ;;  %v877_v25 = vld [vmem:[#allocation2 + $0x48] sm:$0xff]  ;;  %v876_v29 = vld [vmem:[#allocation2 + $0x40] sm:$0xff]  ;;  %v860_v33 = vld [vmem:[%s1193_s0 + $0x10] sm:$0xf0] }
  0x1c   :  { %456 = vmatpush.bf16.msra.mxu1 %v881_v9  ;;  %v885_v26 = vld [vmem:[#allocation2 + $0x88] sm:$0xff]  ;;  %v884_v30 = vld [vmem:[#allocation2 + $0x80] sm:$0xff]  ;;  %v676_v35 = vld [vmem:[%s1193_s0 + $0x14] sm:$0xf0] }
  0x1d   :  { %475 = vmatpush.bf16.msra.mxu2 %v889_v10  ;;  %v893_v27 = vld [vmem:[#allocation2 + $0xc8] sm:$0xff]  ;;  %v892_v31 = vld [vmem:[#allocation2 + $0xc0] sm:$0xff]  ;;  %v861_v37 = vld [vmem:[%s1193_s0 + $0x18] sm:$0xf0] }
  0x1e   :  { %494 = vmatpush.bf16.msra.mxu3 %v897_v11  ;;  %v674_v32 = vld [vmem:[%s1193_s0] sm:$0xf]  ;;  %v858_v34 = vld [vmem:[%s1193_s0 + $0x4] sm:$0xf]  ;;  %v682_v36 = vld [vmem:[%s1193_s0 + $0x8] sm:$0xf] }
  0x1f   :  { %438 = vmatpush.bf16.msra.mxu0 %v872_v12  ;;  %v859_v38 = vld [vmem:[%s1193_s0 + $0xc] sm:$0xf]  ;;  %v684_v39 = vld [vmem:[%s1193_s0 + $0x1c] sm:$0xf0]  ;;  %v903_v40 = vld [vmem:[#allocation2 + $0x118] sm:$0xff]  ;;  %v675_v41 = vor.u32 %v860_v33, %v674_v32  ;;  %v679_v42 = vor.u32 %v858_v34, %v676_v35  ;;  %v683_v43 = vor.u32 %v861_v37, %v682_v36 }
  0x20   :  { %457 = vmatpush.bf16.msra.mxu1 %v880_v13  ;;  %v687_v44 = vor.u32 %v859_v38, %v684_v39  ;;  %v902_v45 = vld [vmem:[#allocation2 + $0x110] sm:$0xff]  ;;  %v901_v46 = vld [vmem:[#allocation2 + $0x108] sm:$0xff]  ;;  %v900_v47 = vld [vmem:[#allocation2 + $0x100] sm:$0xff] }
  0x21   :  { %476 = vmatpush.bf16.msra.mxu2 %v888_v14  ;;  %v694_v48 = vld [vmem:[%s1193_s0 + $0x28] sm:$0xf]  ;;  %v865_v49 = vld [vmem:[%s1193_s0 + $0x38] sm:$0xf0]  ;;  %v863_v50 = vld [vmem:[%s1193_s0 + $0x2c] sm:$0xf] }
  0x22   :  { %495 = vmatpush.bf16.msra.mxu3 %v896_v15  ;;  %v696_v51 = vld [vmem:[%s1193_s0 + $0x3c] sm:$0xf0]  ;;  %v702_v52 = vld [vmem:[%s1193_s0 + $0x30] sm:$0xf]  ;;  %v866_v53 = vld [vmem:[%s1193_s0 + $0x40] sm:$0xf0]  ;;  %v695_v56 = vor.u32 %v865_v49, %v694_v48 }
  0x23   :  { %439 = vmatpush.bf16.msra.mxu0 %v871_v16  ;;  %v864_v54 = vld [vmem:[%s1193_s0 + $0x34] sm:$0xf]  ;;  %v704_v55 = vld [vmem:[%s1193_s0 + $0x44] sm:$0xf0]  ;;  %v699_v57 = vor.u32 %v863_v50, %v696_v51  ;;  %v703_v58 = vor.u32 %v866_v53, %v702_v52  ;;  %v690_v60 = vld [vmem:[%s1193_s0 + $0x10] sm:$0xf] }
  0x24   :  { %458 = vmatpush.bf16.msra.mxu1 %v879_v17  ;;  %v707_v59 = vor.u32 %v864_v54, %v704_v55  ;;  %v862_v61 = vld [vmem:[%s1193_s0 + $0x20] sm:$0xf0]  ;;  %v710_v62 = vld [vmem:[%s1193_s0 + $0x38] sm:$0xf]  ;;  %v867_v63 = vld [vmem:[%s1193_s0 + $0x48] sm:$0xf0] }
  0x25   :  { %477 = vmatpush.bf16.msra.mxu2 %v887_v18  ;;  %v691_v0 = vor.u32 %v862_v61, %v690_v60  ;;  %v711_v1 = vor.u32 %v867_v63, %v710_v62  ;;  %s1040_s0 = smov 32   ;;  %v1042_v60 = vmov 128.0  }
  0x26   :  { %496 = vmatpush.bf16.msra.mxu3 %v895_v19  ;;  %928 = vrcp.f32 %v1042_v60 }
  0x27   :  { %440 = vmatpush.bf16.msra.mxu0 %v870_v20 }
  0x28   :  { %459 = vmatpush.bf16.msra.mxu1 %v878_v21 }
  0x29   :  { %478 = vmatpush.bf16.msra.mxu2 %v886_v22 }
  0x2a   :  { %497 = vmatpush.bf16.msra.mxu3 %v894_v23 }
  0x2b   :  { %441 = vmatpush.bf16.msra.mxu0 %v869_v24 }
  0x2c   :  { %460 = vmatpush.bf16.msra.mxu1 %v877_v25  ;;  %v929_v61 = vpop.eup %928 }
  0x2d   :  { %479 = vmatpush.bf16.msra.mxu2 %v885_v26  ;;  %v579_v62 = vmul.f32 128.0, %v929_v61  ;;  %vm583_vm1 = vweird.f32 %v929_v61 }
  0x2e   :  { %498 = vmatpush.bf16.msra.mxu3 %v893_v27 }
  0x2f   :  { %442 = vmatpush.bf16.msra.mxu0 %v868_v28  ;;  %v580_v63 = vsub.f32 1.0, %v579_v62 }
  0x30   :  { %461 = vmatpush.bf16.msra.mxu1 %v876_v29 }
  0x31   :  { %480 = vmatpush.bf16.msra.mxu2 %v884_v30 }
  0x32   :  { %499 = vmatpush.bf16.msra.mxu3 %v892_v31  ;;  %443 = vmatmul.bf16.vlgmr.msra.gmra.mxu0 %v675_v41 }
  0x33   :  { %515 = vmatpush.bf16.msrb.mxu0 %v903_v40  ;;  %462 = vmatmul.bf16.vlgmr.msra.gmra.mxu1 %v679_v42 }
  0x34   :  { %915 = vmatpush.bf16.msrb.mxu1 %v903_v40  ;;  %481 = vmatmul.bf16.vlgmr.msra.gmra.mxu2 %v683_v43 }
  0x35   :  { %500 = vmatmul.bf16.vlgmr.msra.gmra.mxu3 %v687_v44 }
  0x37   :  { %516 = vmatpush.bf16.msrb.mxu0 %v902_v45 }
  0x38   :  { %916 = vmatpush.bf16.msrb.mxu1 %v902_v45 }
  0x3b   :  { %517 = vmatpush.bf16.msrb.mxu0 %v901_v46 }
  0x3c   :  { %917 = vmatpush.bf16.msrb.mxu1 %v901_v46 }
  0x3f   :  { %518 = vmatpush.bf16.msrb.mxu0 %v900_v47 }
  0x40   :  { %918 = vmatpush.bf16.msrb.mxu1 %v900_v47 }
  0x42   :  { %448 = vmatmul.bf16.gmra.mxu0 %v695_v56 }
  0x43   :  { %467 = vmatmul.bf16.gmra.mxu1 %v699_v57 }
  0x44   :  { %486 = vmatmul.bf16.gmra.mxu2 %v703_v58 }
  0x45   :  { %505 = vmatmul.bf16.gmra.mxu3 %v707_v59 }
  0x52   :  { %856 = vmatmul.msk.bf16.vlgmr.msrb.gmra.mxu0 %vm428_vm0, %v691_v0 }
  0x53   :  { %857 = vmatmul.msk.bf16.vlgmr.msrb.gmra.mxu1 %vm428_vm0, %v711_v1  ;;  %v581_v1 = vmul.f32 %v929_v61, %v580_v63 }
  0xaf   :  { %v444_v2 = vpop.f32.mrf.mxu0 }
  0xb0   :  { %v463_v3 = vpop.f32.mrf.mxu1 }
  0xb1   :  { %v464_v16 = vadd.f32 %v463_v3, %v444_v2 }
  0xb7   :  { %v482_v4 = vpop.f32.mrf.mxu2  ;;  %v446_v6 = vpop.f32.mrf.mxu0 }
  0xb8   :  { %v501_v5 = vpop.f32.mrf.mxu3  ;;  %v465_v7 = vpop.f32.mrf.mxu1  ;;  %v483_v19 = vadd.f32 %v482_v4, %v464_v16 }
  0xb9   :  { %v466_v20 = vadd.f32 %v465_v7, %v446_v6  ;;  %v582_v6 = vadd.f32 %v929_v61, %v581_v1 }
  0xba   :  { %v502_v26 = vadd.f32 %v501_v5, %v483_v19 }
  0xbf   :  { %v484_v8 = vpop.f32.mrf.mxu2  ;;  %v449_v9 = vpop.f32.mrf.mxu0 }
  0xc0   :  { %v468_v10 = vpop.f32.mrf.mxu1  ;;  %v503_v11 = vpop.f32.mrf.mxu3  ;;  %v485_v23 = vadd.f32 %v484_v8, %v466_v20  ;;  %v584_v8 = vsel %vm583_vm1, %v929_v61, %v582_v6 }
  0xc1   :  { %v469_v21 = vadd.f32 %v468_v10, %v449_v9 }
  0xc2   :  { %v504_v29 = vadd.f32 %v503_v11, %v485_v23 }
  0xc7   :  { %v487_v12 = vpop.f32.mrf.mxu2  ;;  %v451_v13 = vpop.f32.mrf.mxu0 }
  0xc8   :  { %v470_v14 = vpop.f32.mrf.mxu1  ;;  %v506_v15 = vpop.f32.mrf.mxu3  ;;  %v488_v24 = vadd.f32 %v487_v12, %v469_v21 }
  0xc9   :  { %v471_v25 = vadd.f32 %v470_v14, %v451_v13 }
  0xca   :  { %v507_v30 = vadd.f32 %v506_v15, %v488_v24 }
  0xcf   :  { %v520_v17 = vpop.f32.mrf.mxu0  ;;  %v489_v22 = vpop.f32.mrf.mxu2 }
  0xd0   :  { %v525_v18 = vpop.f32.mrf.mxu1  ;;  %v490_v27 = vadd.f32 %v489_v22, %v471_v25  ;;  %v508_v28 = vpop.f32.mrf.mxu3  ;;  %v1149_v31 = vadd.f32 %v520_v17, %v502_v26  ;;  %v600_v26 = vld [vmem:[#allocation6] sm:$0x1] }
  0xd1   :  { %v1151_v35 = vadd.f32 %v525_v18, %v507_v30 }
  0xd2   :  { %v509_v34 = vadd.f32 %v508_v28, %v490_v27  ;;  %v539_v37 = vmul.f32 %v1149_v31, %v1149_v31 }
  0xd3   :  { %v541_v41 = vmul.f32 %v1151_v35, %v1151_v35 }
  0xd7   :  { %v522_v32 = vpop.f32.mrf.mxu0 }
  0xd8   :  { %v527_v33 = vpop.f32.mrf.mxu1  ;;  %v1153_v36 = vadd.f32 %v522_v32, %v504_v29  ;;  %v602_v32 = vld [vmem:[#allocation7] sm:$0x1] }
  0xd9   :  { %v1161_v40 = vadd.f32 %v527_v33, %v509_v34 }
  0xda   :  { %v530_v38 = vadd.f32 %v1153_v36, %v1149_v31  ;;  %v540_v39 = vmul.f32 %v1153_v36, %v1153_v36 }
  0xdb   :  { %v542_v45 = vmul.f32 %v1161_v40, %v1161_v40 }
  0xdc   :  { %v543_v42 = vadd.f32 %v540_v39, %v539_v37  ;;  %v531_v43 = vadd.f32 %v530_v38, %v1151_v35 }
  0xde   :  { %v532_v44 = vadd.f32 %v531_v43, %v1161_v40  ;;  %v544_v46 = vadd.f32 %v543_v42, %v541_v41 }
  0xe0   :  { %v533_v47 = vrot.slane %v532_v44, 4  ;;  %v545_v48 = vadd.f32 %v544_v46, %v542_v45 }
  0xe2   :  { %v534_v49 = vadd.f32 %v533_v47, %v532_v44  ;;  %v546_v50 = vrot.slane %v545_v48, 4 }
  0xe4   :  { %v535_v51 = vrot.slane %v534_v49, 2  ;;  %v547_v52 = vadd.f32 %v546_v50, %v545_v48 }
  0xe6   :  { %v536_v53 = vadd.f32 %v535_v51, %v534_v49  ;;  %v548_v54 = vrot.slane %v547_v52, 2 }
  0xe8   :  { %v537_v55 = vrot.slane %v536_v53, 1  ;;  %v549_v57 = vadd.f32 %v548_v54, %v547_v52 }
  0xea   :  { %v538_v56 = vadd.f32 %v537_v55, %v536_v53  ;;  %v550_v58 = vrot.slane %v549_v57, 1 }
  0xec   :  { %570 = vrot.lane.b32.xlu2 %v538_v56, %s1040_s0  ;;  %562 = vrot.lane.b32.xlu1 %v538_v56, %s1036_s28  ;;  %v551_v59 = vadd.f32 %v550_v58, %v549_v57 }
  0xed   :  { %553 = vrot.lane.b32.xlu0 %v538_v56, %s1041_s23 }
  0xf4   :  { %574 = vrot.lane.b32.xlu2 %v551_v59, %s1040_s0  ;;  %566 = vrot.lane.b32.xlu1 %v551_v59, %s1036_s28 }
  0xf5   :  { %558 = vrot.lane.b32.xlu0 %v551_v59, %s1041_s23 }
 0x146   :  { %v571_v4 = vpop.permute.xlu2 %570 }
 0x14e   :  { %v575_v14 = vpop.permute.xlu2 %574 }
 0x15e   :  { %v563_v0 = vpop.permute.xlu1 %562 }
 0x15f   :  { %v554_v2 = vpop.permute.xlu0 %553 }
 0x160   :  { %v556_v3 = vadd.f32 %v554_v2, %v538_v56 }
 0x162   :  { %v565_v5 = vadd.f32 %v563_v0, %v556_v3 }
 0x164   :  { %v573_v7 = vadd.f32 %v571_v4, %v565_v5 }
 0x166   :  { %v567_v11 = vpop.permute.xlu1 %566  ;;  %v585_v12 = vmul.f32 %v584_v8, %v573_v7 }
 0x167   :  { %v559_v9 = vpop.permute.xlu0 %558 }
 0x168   :  { %v561_v10 = vadd.f32 %v559_v9, %v551_v59  ;;  %v587_v16 = vmul.f32 %v585_v12, %v585_v12 }
 0x16a   :  { %v569_v13 = vadd.f32 %v567_v11, %v561_v10 }
 0x16c   :  { %v577_v15 = vadd.f32 %v575_v14, %v569_v13 }
 0x16e   :  { %v586_v17 = vmul.f32 %v584_v8, %v577_v15 }
 0x170   :  { %v588_v18 = vsub.f32 %v586_v17, %v587_v16 }
 0x172   :  { %v589_v19 = vadd.f32 1e-05, %v588_v18 }
 0x174   :  { %930 = vrsqrt.f32 %v589_v19  ;;  %vm596_vm3 = vweird.f32 %v589_v19 }
 0x17a   :  { %v931_v20 = vpop.eup %930 }
 0x17b   :  { %v591_v21 = vmul.f32 %v931_v20, %v589_v19  ;;  %vm597_vm2 = vweird.f32 %v931_v20 }
 0x17c   :  { %vm598_vm4 = vmor %vm596_vm3, %vm597_vm2 }
 0x17d   :  { %v592_v22 = vmul.f32 %v931_v20, %v591_v21 }
 0x17f   :  { %v593_v23 = vmul.f32 0.5, %v592_v22 }
 0x181   :  { %v594_v24 = vsub.f32 1.5, %v593_v23 }
 0x183   :  { %v595_v25 = vmul.f32 %v931_v20, %v594_v24 }
 0x185   :  { %v599_v27 = vsel %vm598_vm4, %v931_v20, %v595_v25 }
 0x186   :  { %v601_v28 = vmul.f32 %v600_v26, %v599_v27 }
 0x188   :  { %v606_v29 = vperm.slane %v601_v28, 0  ;;  %v603_v30 = vmul.f32 %v601_v28, %v585_v12 }
 0x18a   :  { %613 = vrot.lane.b32.xlu2 %v606_v29, %s1041_s23  ;;  %610 = vrot.lane.b32.xlu1 %v606_v29, %s1036_s28  ;;  %v604_v33 = vsub.f32 %v602_v32, %v603_v30 }
 0x18b   :  { %607 = vrot.lane.b32.xlu0 %v606_v29, %s1040_s0 }
 0x18c   :  { %v622_v34 = vperm.slane %v604_v33, 0 }
 0x192   :  { %629 = vrot.lane.b32.xlu2 %v622_v34, %s1041_s23  ;;  %626 = vrot.lane.b32.xlu1 %v622_v34, %s1036_s28 }
 0x193   :  { %623 = vrot.lane.b32.xlu0 %v622_v34, %s1040_s0 }
 0x1e4   :  { %v614_v38 = vpop.permute.xlu2 %613 }
 0x1ec   :  { %v630_v48 = vpop.permute.xlu2 %629 }
 0x1fc   :  { %v611_v37 = vpop.permute.xlu1 %610 }
 0x1fd   :  { %v608_v39 = vpop.permute.xlu0 %607 }
 0x1fe   :  { %v617_v41 = vsel %vm616_vm5, %v601_v28, %v608_v39 }
 0x1ff   :  { %v618_v42 = vsel %vm428_vm0, %v617_v41, %v611_v37 }
 0x200   :  { %v620_v43 = vsel %vm619_vm6, %v618_v42, %v614_v38 }
 0x201   :  { %v635_v44 = vperm.slane %v620_v43, 0 }
 0x203   :  { %v636_v50 = vmul.f32 %v635_v44, %v1149_v31  ;;  %v637_v52 = vmul.f32 %v635_v44, %v1153_v36  ;;  %v638_v53 = vmul.f32 %v635_v44, %v1151_v35  ;;  %v639_v54 = vmul.f32 %v635_v44, %v1161_v40 }
 0x204   :  { %v627_v45 = vpop.permute.xlu1 %626 }
 0x205   :  { %v624_v46 = vpop.permute.xlu0 %623 }
 0x206   :  { %v632_v47 = vsel %vm616_vm5, %v604_v33, %v624_v46 }
 0x207   :  { %v633_v49 = vsel %vm428_vm0, %v632_v47, %v627_v45 }
 0x208   :  { %v634_v51 = vsel %vm619_vm6, %v633_v49, %v630_v48 }
 0x209   :  { %v640_v55 = vperm.slane %v634_v51, 0 }
 0x20b   :  { %v641_v56 = vadd.f32 %v640_v55, %v636_v50  ;;  %v642_v57 = vadd.f32 %v640_v55, %v637_v52  ;;  %v643_v58 = vadd.f32 %v640_v55, %v638_v53  ;;  %v644_v59 = vadd.f32 %v640_v55, %v639_v54 }
 0x20d   :  { %vm645_vm7 = vcmp.ge.f32.partialorder %v641_v56, 0.0  ;;  %vm646_vm8 = vcmp.ge.f32.partialorder %v642_v57, 0.0  ;;  %vm647_vm9 = vcmp.ge.f32.partialorder %v643_v58, 0.0  ;;  %vm648_vm10 = vcmp.ge.f32.partialorder %v644_v59, 0.0 }
 0x20e   :  { %v649_v60 = vmul.f32 0.05, %v641_v56  ;;  %v650_v61 = vmul.f32 0.05, %v642_v57  ;;  %v651_v62 = vmul.f32 0.05, %v643_v58 }
 0x20f   :  { %v652_v31 = vmul.f32 0.05, %v644_v59 }
 0x210   :  { %v653_v63 = vsel %vm645_vm7, %v641_v56, %v649_v60  ;;  %v654_v0 = vsel %vm646_vm8, %v642_v57, %v650_v61  ;;  %v655_v36 = vsel %vm647_vm9, %v643_v58, %v651_v62 }
 0x211   :  { %v656_v1 = vsel %vm648_vm10, %v644_v59, %v652_v31  ;;  %v907_v35 = vpack.c.bf16 %v654_v0, %v653_v63 }
 0x212   :  { %v912_v2 = vpack.c.bf16 %v656_v1, %v655_v36 }
 0x213   :  { %908 = vst [vmem:[%s1198_s5] sm:$0xff] %v907_v35  }
 0x214   :  { %914 = vst [vmem:[%s1198_s5 + $0x8] sm:$0xff] %v912_v2  }
 0x215   :  { %669 = vsyncpa [#allocation3], 1 }
 0x216   :  { %670 = vsyncpa [#allocation5], 1 }
 0x217   :  { %671 = vsyncpa [#allocation8], 1 }

// kernel: _lambda_.6
= control target key start
LH: loop header
LB: loop body
LE: loop exit
PB: predicated region body
PF: predicated region fallthrough
CT: control target
= control target key end

     0   :  { %10 = vsyncpa [#allocation3], 0  ;;  %s2279_s0 = inlined_call_operand.vmem [shape: bf16[8,1152], index: 0, kind: input, shape index: {}]   ;;  %s2280_s1 = inlined_call_operand.hbm [shape: bf16[1152,256], index: 1, kind: input, shape index: {}]   ;;  %s2281_s2 = inlined_call_operand.hbm [shape: f32[1,256], index: 2, kind: input, shape index: {}]   ;;  %s2282_s3 = inlined_call_operand.hbm [shape: f32[1,256], index: 3, kind: input, shape index: {}]   ;;  %s2283_s4 = inlined_call_operand.hbm [shape: f32[1,256], index: 4, kind: input, shape index: {}]   ;;  %s2284_s5 = inlined_call_operand.vmem [shape: bf16[8,256], index: 5, kind: output, shape index: {}]  }
   0x1   :  { %11 = vsyncpa [#allocation5], 0  ;;  %s33_s20 = sshll.u32 %s2281_s2, 4  ;;  %s34_s20 = int_to_ptr.hbm [resolvable:$true] %s33_s20 }
   0x2   :  { %12 = vsyncpa [#allocation8], 0  ;;  %s2155_s21 = smov [#allocation4]   ;;  %s19_s25 = sshll.u32 %s2280_s1, 4  ;;  %s20_s25 = int_to_ptr.hbm [resolvable:$true] %s19_s25 }
   0x3   :  { %s35_s22 = sshll.u32 %s2155_s21, 4  ;;  %s2156_s26 = smov [#allocation2]   ;;  %s36_s22 = int_to_ptr.vmem [resolvable:$true] %s35_s22 }
   0x4   :  { %38 = dma.hbm_to_vmem [thread:$0]  %s34_s20, 32, %s36_s22, [#allocation5]  }
   0x5   :  { %s21_s27 = sshll.u32 %s2156_s26, 4  ;;  %s2157_s28 = smov 128   ;;  %s22_s27 = int_to_ptr.vmem [resolvable:$true] %s21_s27 }
   0x6   :  { %s2158_s29 = smov 8   ;;  %s44_s2 = sshll.u32 %s2282_s3, 4  ;;  %s45_s2 = int_to_ptr.hbm [resolvable:$true] %s44_s2 }
   0x7   :  { %27 = dma.hbm_to_vmem [thread:$0]  %s20_s25, 18432, %s22_s27, [#allocation3], %s2157_s28, %s2157_s28, %s2158_s29  }
   0x8   :  { %s2159_s7 = smov [#allocation6]   ;;  %s55_s1 = sshll.u32 %s2283_s4, 4  ;;  %s56_s1 = int_to_ptr.hbm [resolvable:$true] %s55_s1 }
   0x9   :  { %s46_s8 = sshll.u32 %s2159_s7, 4  ;;  %s2160_s11 = smov [#allocation7]   ;;  %s47_s8 = int_to_ptr.vmem [resolvable:$true] %s46_s8 }
   0xa   :  { %49 = dma.hbm_to_vmem [thread:$0]  %s45_s2, 32, %s47_s8, [#allocation5]  }
   0xb   :  { %s57_s12 = sshll.u32 %s2160_s11, 4  ;;  %s58_s12 = int_to_ptr.vmem [resolvable:$true] %s57_s12 }
   0xc   :  { %60 = dma.hbm_to_vmem [thread:$0]  %s56_s1, 32, %s58_s12, [#allocation8]  }
   0xd   :  { %2149 = dma.done.wait [#allocation3], 18432  }
   0xe   :  { %2150 = vsyncadd [#allocation3], 4294948864 }
   0xf   :  { %2151 = dma.done.wait [#allocation5], 64  }
  0x10   :  { %2152 = vsyncadd [#allocation5], 4294967232 }
  0x11   :  { %2153 = dma.done.wait [#allocation8], 32  }
  0x12   :  { %2154 = vsyncadd [#allocation8], 4294967264  ;;  %v1379_v0 = vld [vmem:[#allocation2 + $0x70] sm:$0xf]  ;;  %v1912_v1 = vld [vmem:[#allocation2 + $0x74] sm:$0xf0] }
  0x13   :  { %v1443_v2 = vld [vmem:[#allocation2 + $0xf0] sm:$0xf]  ;;  %v1380_v3 = vor.u32 %v1912_v1, %v1379_v0  ;;  %v1928_v4 = vld [vmem:[#allocation2 + $0xf4] sm:$0xf0]  ;;  %v1371_v11 = vld [vmem:[#allocation2 + $0x60] sm:$0xf] }
  0x14   :  { %v1507_v5 = vld [vmem:[#allocation2 + $0x170] sm:$0xf]  ;;  %v1944_v6 = vld [vmem:[#allocation2 + $0x174] sm:$0xf0]  ;;  %v1444_v7 = vor.u32 %v1928_v4, %v1443_v2  ;;  %v1910_v13 = vld [vmem:[#allocation2 + $0x64] sm:$0xf0] }
  0x15   :  { %v1508_v8 = vor.u32 %v1944_v6, %v1507_v5  ;;  %v1571_v9 = vld [vmem:[#allocation2 + $0x1f0] sm:$0xf]  ;;  %v1960_v10 = vld [vmem:[#allocation2 + $0x1f4] sm:$0xf0]  ;;  %978 = vmatpush.bf16.msra.mxu0 %v1380_v3  ;;  %v1435_v14 = vld [vmem:[#allocation2 + $0xe0] sm:$0xf]  ;;  %v1372_v16 = vor.u32 %v1910_v13, %v1371_v11 }
  0x16   :  { %v1572_v12 = vor.u32 %v1960_v10, %v1571_v9  ;;  %v1926_v15 = vld [vmem:[#allocation2 + $0xe4] sm:$0xf0]  ;;  %991 = vmatpush.bf16.msra.mxu1 %v1444_v7  ;;  %v1499_v18 = vld [vmem:[#allocation2 + $0x160] sm:$0xf]  ;;  %v1363_v23 = vld [vmem:[#allocation2 + $0x50] sm:$0xf] }
  0x17   :  { %1004 = vmatpush.bf16.msra.mxu2 %v1508_v8  ;;  %v1436_v17 = vor.u32 %v1926_v15, %v1435_v14  ;;  %v1942_v19 = vld [vmem:[#allocation2 + $0x164] sm:$0xf0]  ;;  %v1563_v20 = vld [vmem:[#allocation2 + $0x1e0] sm:$0xf]  ;;  %v1908_v24 = vld [vmem:[#allocation2 + $0x54] sm:$0xf0] }
  0x18   :  { %1017 = vmatpush.bf16.msra.mxu3 %v1572_v12  ;;  %v1500_v21 = vor.u32 %v1942_v19, %v1499_v18  ;;  %v1958_v22 = vld [vmem:[#allocation2 + $0x1e4] sm:$0xf0]  ;;  %v1427_v26 = vld [vmem:[#allocation2 + $0xd0] sm:$0xf]  ;;  %v1924_v27 = vld [vmem:[#allocation2 + $0xd4] sm:$0xf0]  ;;  %v1364_v29 = vor.u32 %v1908_v24, %v1363_v23 }
  0x19   :  { %v1564_v25 = vor.u32 %v1958_v22, %v1563_v20  ;;  %v1491_v28 = vld [vmem:[#allocation2 + $0x150] sm:$0xf]  ;;  %979 = vmatpush.bf16.msra.mxu0 %v1372_v16  ;;  %v1940_v30 = vld [vmem:[#allocation2 + $0x154] sm:$0xf0]  ;;  %v1428_v33 = vor.u32 %v1924_v27, %v1427_v26  ;;  %v1355_v35 = vld [vmem:[#allocation2 + $0x40] sm:$0xf] }
  0x1a   :  { %v1555_v31 = vld [vmem:[#allocation2 + $0x1d0] sm:$0xf]  ;;  %v1956_v32 = vld [vmem:[#allocation2 + $0x1d4] sm:$0xf0]  ;;  %992 = vmatpush.bf16.msra.mxu1 %v1436_v17  ;;  %v1492_v34 = vor.u32 %v1940_v30, %v1491_v28  ;;  %v1906_v36 = vld [vmem:[#allocation2 + $0x44] sm:$0xf0] }
  0x1b   :  { %1005 = vmatpush.bf16.msra.mxu2 %v1500_v21  ;;  %v1419_v37 = vld [vmem:[#allocation2 + $0xc0] sm:$0xf]  ;;  %v1556_v38 = vor.u32 %v1956_v32, %v1555_v31  ;;  %v1922_v39 = vld [vmem:[#allocation2 + $0xc4] sm:$0xf0]  ;;  %v1356_v44 = vor.u32 %v1906_v36, %v1355_v35  ;;  %v1347_v47 = vld [vmem:[#allocation2 + $0x30] sm:$0xf] }
  0x1c   :  { %1018 = vmatpush.bf16.msra.mxu3 %v1564_v25  ;;  %v1483_v40 = vld [vmem:[#allocation2 + $0x140] sm:$0xf]  ;;  %v1938_v41 = vld [vmem:[#allocation2 + $0x144] sm:$0xf0]  ;;  %v1420_v45 = vor.u32 %v1922_v39, %v1419_v37  ;;  %v1904_v48 = vld [vmem:[#allocation2 + $0x34] sm:$0xf0] }
  0x1d   :  { %v1547_v42 = vld [vmem:[#allocation2 + $0x1c0] sm:$0xf]  ;;  %v1954_v43 = vld [vmem:[#allocation2 + $0x1c4] sm:$0xf0]  ;;  %980 = vmatpush.bf16.msra.mxu0 %v1364_v29  ;;  %v1484_v46 = vor.u32 %v1938_v41, %v1483_v40  ;;  %v1411_v49 = vld [vmem:[#allocation2 + $0xb0] sm:$0xf]  ;;  %v1348_v56 = vor.u32 %v1904_v48, %v1347_v47 }
  0x1e   :  { %993 = vmatpush.bf16.msra.mxu1 %v1428_v33  ;;  %v1548_v50 = vor.u32 %v1954_v43, %v1547_v42  ;;  %v1920_v51 = vld [vmem:[#allocation2 + $0xb4] sm:$0xf0]  ;;  %v1475_v52 = vld [vmem:[#allocation2 + $0x130] sm:$0xf]  ;;  %v1339_v59 = vld [vmem:[#allocation2 + $0x20] sm:$0xf] }
  0x1f   :  { %1006 = vmatpush.bf16.msra.mxu2 %v1492_v34  ;;  %v1936_v53 = vld [vmem:[#allocation2 + $0x134] sm:$0xf0]  ;;  %v1539_v54 = vld [vmem:[#allocation2 + $0x1b0] sm:$0xf]  ;;  %v1412_v57 = vor.u32 %v1920_v51, %v1411_v49  ;;  %v1902_v60 = vld [vmem:[#allocation2 + $0x24] sm:$0xf0] }
  0x20   :  { %1019 = vmatpush.bf16.msra.mxu3 %v1556_v38  ;;  %v1952_v55 = vld [vmem:[#allocation2 + $0x1b4] sm:$0xf0]  ;;  %v1476_v58 = vor.u32 %v1936_v53, %v1475_v52  ;;  %v1403_v61 = vld [vmem:[#allocation2 + $0xa0] sm:$0xf]  ;;  %v1918_v63 = vld [vmem:[#allocation2 + $0xa4] sm:$0xf0]  ;;  %v1340_v4 = vor.u32 %v1902_v60, %v1339_v59 }
  0x21   :  { %981 = vmatpush.bf16.msra.mxu0 %v1356_v44  ;;  %v1540_v62 = vor.u32 %v1952_v55, %v1539_v54  ;;  %v1467_v0 = vld [vmem:[#allocation2 + $0x120] sm:$0xf]  ;;  %v1934_v1 = vld [vmem:[#allocation2 + $0x124] sm:$0xf0]  ;;  %v1404_v5 = vor.u32 %v1918_v63, %v1403_v61  ;;  %v1331_v7 = vld [vmem:[#allocation2 + $0x10] sm:$0xf] }
  0x22   :  { %994 = vmatpush.bf16.msra.mxu1 %v1420_v45  ;;  %v1531_v2 = vld [vmem:[#allocation2 + $0x1a0] sm:$0xf]  ;;  %v1950_v3 = vld [vmem:[#allocation2 + $0x1a4] sm:$0xf0]  ;;  %v1468_v6 = vor.u32 %v1934_v1, %v1467_v0  ;;  %v1900_v8 = vld [vmem:[#allocation2 + $0x14] sm:$0xf0] }
  0x23   :  { %1007 = vmatpush.bf16.msra.mxu2 %v1484_v46  ;;  %v1395_v9 = vld [vmem:[#allocation2 + $0x90] sm:$0xf]  ;;  %v1532_v10 = vor.u32 %v1950_v3, %v1531_v2  ;;  %v1916_v11 = vld [vmem:[#allocation2 + $0x94] sm:$0xf0]  ;;  %v1332_v16 = vor.u32 %v1900_v8, %v1331_v7  ;;  %v1323_v17 = vld [vmem:[#allocation2] sm:$0xf] }
  0x24   :  { %1020 = vmatpush.bf16.msra.mxu3 %v1548_v50  ;;  %v1459_v12 = vld [vmem:[#allocation2 + $0x110] sm:$0xf]  ;;  %v1932_v13 = vld [vmem:[#allocation2 + $0x114] sm:$0xf0]  ;;  %v1898_v18 = vld [vmem:[#allocation2 + $0x4] sm:$0xf0]  ;;  %v1396_v19 = vor.u32 %v1916_v11, %v1395_v9 }
  0x25   :  { %982 = vmatpush.bf16.msra.mxu0 %v1348_v56  ;;  %v1523_v14 = vld [vmem:[#allocation2 + $0x190] sm:$0xf]  ;;  %v1948_v15 = vld [vmem:[#allocation2 + $0x194] sm:$0xf0]  ;;  %v1460_v20 = vor.u32 %v1932_v13, %v1459_v12  ;;  %v1387_v21 = vld [vmem:[#allocation2 + $0x80] sm:$0xf]  ;;  %v1324_v31 = vor.u32 %v1898_v18, %v1323_v17 }
  0x26   :  { %995 = vmatpush.bf16.msra.mxu1 %v1412_v57  ;;  %v1914_v22 = vld [vmem:[#allocation2 + $0x84] sm:$0xf0]  ;;  %v1451_v23 = vld [vmem:[#allocation2 + $0x100] sm:$0xf]  ;;  %v1524_v24 = vor.u32 %v1948_v15, %v1523_v14  ;;  %v1635_v26 = vld [vmem:[#allocation2 + $0x270] sm:$0xf] }
  0x27   :  { %1008 = vmatpush.bf16.msra.mxu2 %v1476_v58  ;;  %v1930_v25 = vld [vmem:[#allocation2 + $0x104] sm:$0xf0]  ;;  %v1976_v27 = vld [vmem:[#allocation2 + $0x274] sm:$0xf0]  ;;  %v1699_v28 = vld [vmem:[#allocation2 + $0x2f0] sm:$0xf]  ;;  %v1388_v35 = vor.u32 %v1914_v22, %v1387_v21 }
  0x28   :  { %1021 = vmatpush.bf16.msra.mxu3 %v1540_v62  ;;  %v1992_v29 = vld [vmem:[#allocation2 + $0x2f4] sm:$0xf0]  ;;  %v1763_v30 = vld [vmem:[#allocation2 + $0x370] sm:$0xf]  ;;  %v1515_v33 = vld [vmem:[#allocation2 + $0x180] sm:$0xf]  ;;  %v1452_v36 = vor.u32 %v1930_v25, %v1451_v23  ;;  %v1636_v39 = vor.u32 %v1976_v27, %v1635_v26 }
  0x29   :  { %983 = vmatpush.bf16.msra.mxu0 %v1340_v4  ;;  %v2008_v32 = vld [vmem:[#allocation2 + $0x374] sm:$0xf0]  ;;  %v1946_v34 = vld [vmem:[#allocation2 + $0x184] sm:$0xf0]  ;;  %v1827_v37 = vld [vmem:[#allocation2 + $0x3f0] sm:$0xf]  ;;  %v1700_v40 = vor.u32 %v1992_v29, %v1699_v28 }
  0x2a   :  { %996 = vmatpush.bf16.msra.mxu1 %v1404_v5  ;;  %v2024_v38 = vld [vmem:[#allocation2 + $0x3f4] sm:$0xf0]  ;;  %v1627_v41 = vld [vmem:[#allocation2 + $0x260] sm:$0xf]  ;;  %v1764_v42 = vor.u32 %v2008_v32, %v1763_v30  ;;  %v1516_v43 = vor.u32 %v1946_v34, %v1515_v33  ;;  %v1974_v44 = vld [vmem:[#allocation2 + $0x264] sm:$0xf0] }
  0x2b   :  { %1009 = vmatpush.bf16.msra.mxu2 %v1468_v6  ;;  %v1691_v45 = vld [vmem:[#allocation2 + $0x2e0] sm:$0xf]  ;;  %v1990_v46 = vld [vmem:[#allocation2 + $0x2e4] sm:$0xf0]  ;;  %v1828_v47 = vor.u32 %v2024_v38, %v1827_v37  ;;  %v1628_v52 = vor.u32 %v1974_v44, %v1627_v41  ;;  %v1619_v54 = vld [vmem:[#allocation2 + $0x250] sm:$0xf] }
  0x2c   :  { %1022 = vmatpush.bf16.msra.mxu3 %v1532_v10  ;;  %v1755_v48 = vld [vmem:[#allocation2 + $0x360] sm:$0xf]  ;;  %v2006_v49 = vld [vmem:[#allocation2 + $0x364] sm:$0xf0]  ;;  %v1692_v53 = vor.u32 %v1990_v46, %v1691_v45  ;;  %v1972_v55 = vld [vmem:[#allocation2 + $0x254] sm:$0xf0] }
  0x2d   :  { %984 = vmatpush.bf16.msra.mxu0 %v1332_v16  ;;  %v1819_v50 = vld [vmem:[#allocation2 + $0x3e0] sm:$0xf]  ;;  %v2022_v51 = vld [vmem:[#allocation2 + $0x3e4] sm:$0xf0]  ;;  %v1756_v57 = vor.u32 %v2006_v49, %v1755_v48  ;;  %v1683_v58 = vld [vmem:[#allocation2 + $0x2d0] sm:$0xf]  ;;  %v1620_v4 = vor.u32 %v1972_v55, %v1619_v54 }
  0x2e   :  { %997 = vmatpush.bf16.msra.mxu1 %v1396_v19  ;;  %v78_v56 = vld [vmem:[%s2279_s0 + $0x8] sm:$0xff]  ;;  %v1988_v59 = vld [vmem:[#allocation2 + $0x2d4] sm:$0xf0]  ;;  %v77_v61 = vld [vmem:[%s2279_s0] sm:$0xff]  ;;  %v1820_v63 = vor.u32 %v2022_v51, %v1819_v50  ;;  %vm1292_vm4 = vcmask 523264  }
  0x2f   :  { %1010 = vmatpush.bf16.msra.mxu2 %v1460_v20  ;;  %v233_v60 = vunpack.c.l.b16 %v78_v56  ;;  %v234_v62 = vunpack.c.h.b16 %v78_v56  ;;  %v1747_v0 = vld [vmem:[#allocation2 + $0x350] sm:$0xf]  ;;  %v2004_v1 = vld [vmem:[#allocation2 + $0x354] sm:$0xf0]  ;;  %v231_v2 = vunpack.c.l.b16 %v77_v61  ;;  %v232_v3 = vunpack.c.h.b16 %v77_v61  ;;  %v1611_v10 = vld [vmem:[#allocation2 + $0x240] sm:$0xf] }
  0x30   :  { %1023 = vmatpush.bf16.msra.mxu3 %v1524_v24  ;;  %v1811_v5 = vld [vmem:[#allocation2 + $0x3d0] sm:$0xf]  ;;  %v2020_v6 = vld [vmem:[#allocation2 + $0x3d4] sm:$0xf0]  ;;  %v1684_v9 = vor.u32 %v1988_v59, %v1683_v58  ;;  %v1748_v13 = vor.u32 %v2004_v1, %v1747_v0  ;;  %v1970_v14 = vld [vmem:[#allocation2 + $0x244] sm:$0xf0] }
  0x31   :  { %985 = vmatpush.bf16.msra.mxu0 %v1324_v31  ;;  %v2211_v7 = vpack.c.b16 %v233_v60, %v233_v60  ;;  %v2213_v8 = vpack.c.b16 %v234_v62, %v234_v62  ;;  %v2215_v11 = vpack.c.b16 %v231_v2, %v231_v2  ;;  %v2217_v12 = vpack.c.b16 %v232_v3, %v232_v3  ;;  %v1675_v15 = vld [vmem:[#allocation2 + $0x2c0] sm:$0xf]  ;;  %v1986_v16 = vld [vmem:[#allocation2 + $0x2c4] sm:$0xf0]  ;;  %v1603_v24 = vld [vmem:[#allocation2 + $0x230] sm:$0xf] }
  0x32   :  { %998 = vmatpush.bf16.msra.mxu1 %v1388_v35  ;;  %v1812_v17 = vor.u32 %v2020_v6, %v1811_v5  ;;  %v1739_v18 = vld [vmem:[#allocation2 + $0x340] sm:$0xf]  ;;  %v2002_v19 = vld [vmem:[#allocation2 + $0x344] sm:$0xf0]  ;;  %v1612_v22 = vor.u32 %v1970_v14, %v1611_v10  ;;  %v1676_v23 = vor.u32 %v1986_v16, %v1675_v15  ;;  %v1968_v26 = vld [vmem:[#allocation2 + $0x234] sm:$0xf0] }
  0x33   :  { %1011 = vmatpush.bf16.msra.mxu2 %v1452_v36  ;;  %v1803_v20 = vld [vmem:[#allocation2 + $0x3c0] sm:$0xf]  ;;  %v2018_v21 = vld [vmem:[#allocation2 + $0x3c4] sm:$0xf0]  ;;  %v1740_v25 = vor.u32 %v2002_v19, %v1739_v18  ;;  %v1667_v27 = vld [vmem:[#allocation2 + $0x2b0] sm:$0xf]  ;;  %v1604_v34 = vor.u32 %v1968_v26, %v1603_v24 }
  0x34   :  { %1024 = vmatpush.bf16.msra.mxu3 %v1516_v43  ;;  %986 = vmatmul.bf16.vlgmr.msra.gmra.mxu0 %v2215_v11  ;;  %v1984_v28 = vld [vmem:[#allocation2 + $0x2b4] sm:$0xf0]  ;;  %v1804_v29 = vor.u32 %v2018_v21, %v1803_v20  ;;  %v1731_v30 = vld [vmem:[#allocation2 + $0x330] sm:$0xf]  ;;  %v1595_v36 = vld [vmem:[#allocation2 + $0x220] sm:$0xf] }
  0x35   :  { %1030 = vmatpush.bf16.msrb.mxu0 %v1636_v39  ;;  %999 = vmatmul.bf16.vlgmr.msra.gmra.mxu1 %v2217_v12  ;;  %v2000_v31 = vld [vmem:[#allocation2 + $0x334] sm:$0xf0]  ;;  %v1795_v32 = vld [vmem:[#allocation2 + $0x3b0] sm:$0xf]  ;;  %v1668_v35 = vor.u32 %v1984_v28, %v1667_v27  ;;  %v1966_v38 = vld [vmem:[#allocation2 + $0x224] sm:$0xf0] }
  0x36   :  { %1043 = vmatpush.bf16.msrb.mxu1 %v1700_v40  ;;  %1012 = vmatmul.bf16.vlgmr.msra.gmra.mxu2 %v2211_v7  ;;  %v2016_v33 = vld [vmem:[#allocation2 + $0x3b4] sm:$0xf0]  ;;  %v1732_v37 = vor.u32 %v2000_v31, %v1731_v30  ;;  %v1659_v39 = vld [vmem:[#allocation2 + $0x2a0] sm:$0xf]  ;;  %v1982_v40 = vld [vmem:[#allocation2 + $0x2a4] sm:$0xf0]  ;;  %v1596_v46 = vor.u32 %v1966_v38, %v1595_v36 }
  0x37   :  { %1056 = vmatpush.bf16.msrb.mxu2 %v1764_v42  ;;  %1025 = vmatmul.bf16.vlgmr.msra.gmra.mxu3 %v2213_v8  ;;  %v1796_v41 = vor.u32 %v2016_v33, %v1795_v32  ;;  %v1723_v42 = vld [vmem:[#allocation2 + $0x320] sm:$0xf]  ;;  %v1998_v43 = vld [vmem:[#allocation2 + $0x324] sm:$0xf0]  ;;  %v1587_v48 = vld [vmem:[#allocation2 + $0x210] sm:$0xf] }
  0x38   :  { %1069 = vmatpush.bf16.msrb.mxu3 %v1828_v47  ;;  %v1787_v44 = vld [vmem:[#allocation2 + $0x3a0] sm:$0xf]  ;;  %v2014_v45 = vld [vmem:[#allocation2 + $0x3a4] sm:$0xf0]  ;;  %v1660_v47 = vor.u32 %v1982_v40, %v1659_v39  ;;  %v1724_v49 = vor.u32 %v1998_v43, %v1723_v42  ;;  %v1964_v50 = vld [vmem:[#allocation2 + $0x214] sm:$0xf0] }
  0x39   :  { %1031 = vmatpush.bf16.msrb.mxu0 %v1628_v52  ;;  %v1651_v51 = vld [vmem:[#allocation2 + $0x290] sm:$0xf]  ;;  %v1980_v52 = vld [vmem:[#allocation2 + $0x294] sm:$0xf0]  ;;  %v1579_v58 = vld [vmem:[#allocation2 + $0x200] sm:$0xf]  ;;  %v1588_v60 = vor.u32 %v1964_v50, %v1587_v48 }
  0x3a   :  { %1044 = vmatpush.bf16.msrb.mxu1 %v1692_v53  ;;  %v1788_v53 = vor.u32 %v2014_v45, %v1787_v44  ;;  %v1715_v54 = vld [vmem:[#allocation2 + $0x310] sm:$0xf]  ;;  %v1996_v55 = vld [vmem:[#allocation2 + $0x314] sm:$0xf0]  ;;  %v1962_v59 = vld [vmem:[#allocation2 + $0x204] sm:$0xf0]  ;;  %v1652_v61 = vor.u32 %v1980_v52, %v1651_v51 }
  0x3b   :  { %1057 = vmatpush.bf16.msrb.mxu2 %v1756_v57  ;;  %v1779_v56 = vld [vmem:[#allocation2 + $0x390] sm:$0xf]  ;;  %v2012_v57 = vld [vmem:[#allocation2 + $0x394] sm:$0xf0]  ;;  %v1643_v62 = vld [vmem:[#allocation2 + $0x280] sm:$0xf]  ;;  %v1716_v1 = vor.u32 %v1996_v55, %v1715_v54 }
  0x3c   :  { %1070 = vmatpush.bf16.msrb.mxu3 %v1820_v63  ;;  %v1978_v63 = vld [vmem:[#allocation2 + $0x284] sm:$0xf0]  ;;  %v79_v0 = vld [vmem:[%s2279_s0 + $0x10] sm:$0xff]  ;;  %v1707_v2 = vld [vmem:[#allocation2 + $0x300] sm:$0xf]  ;;  %v1780_v5 = vor.u32 %v2012_v57, %v1779_v56 }
  0x3d   :  { %1032 = vmatpush.bf16.msrb.mxu0 %v1620_v4  ;;  %v1994_v3 = vld [vmem:[#allocation2 + $0x304] sm:$0xf0]  ;;  %v80_v4 = vld [vmem:[%s2279_s0 + $0x18] sm:$0xff]  ;;  %v1891_v6 = vld [vmem:[#allocation2 + $0x470] sm:$0xf]  ;;  %v235_v16 = vunpack.c.l.b16 %v79_v0  ;;  %v1644_v18 = vor.u32 %v1978_v63, %v1643_v62  ;;  %v236_v26 = vunpack.c.h.b16 %v79_v0 }
  0x3e   :  { %1045 = vmatpush.bf16.msrb.mxu1 %v1684_v9  ;;  %v2040_v9 = vld [vmem:[#allocation2 + $0x474] sm:$0xf0]  ;;  %v1911_v10 = vld [vmem:[#allocation2 + $0x74] sm:$0xf]  ;;  %v1445_v15 = vld [vmem:[#allocation2 + $0xf8] sm:$0xf0]  ;;  %v237_v21 = vunpack.c.l.b16 %v80_v4 }
  0x3f   :  { %1058 = vmatpush.bf16.msrb.mxu2 %v1748_v13  ;;  %v1381_v13 = vld [vmem:[#allocation2 + $0x78] sm:$0xf0]  ;;  %v1927_v14 = vld [vmem:[#allocation2 + $0xf4] sm:$0xf]  ;;  %v1771_v19 = vld [vmem:[#allocation2 + $0x380] sm:$0xf]  ;;  %v2229_v36 = vpack.c.b16 %v235_v16, %v235_v16  ;;  %v2233_v43 = vpack.c.b16 %v236_v26, %v236_v26 }
  0x40   :  { %1071 = vmatpush.bf16.msrb.mxu3 %v1812_v17  ;;  %v1580_v17 = vor.u32 %v1962_v59, %v1579_v58  ;;  %v2010_v20 = vld [vmem:[#allocation2 + $0x384] sm:$0xf0]  ;;  %v1943_v24 = vld [vmem:[#allocation2 + $0x174] sm:$0xf]  ;;  %v1384_v27 = vor.u32 %v1911_v10, %v1381_v13  ;;  %v1448_v28 = vor.u32 %v1927_v14, %v1445_v15  ;;  %v1909_v31 = vld [vmem:[#allocation2 + $0x64] sm:$0xf]  ;;  %v2231_v39 = vpack.c.b16 %v237_v21, %v237_v21 }
  0x41   :  { %1033 = vmatpush.bf16.msrb.mxu0 %v1612_v22  ;;  %v1708_v22 = vor.u32 %v1994_v3, %v1707_v2  ;;  %v2038_v30 = vld [vmem:[#allocation2 + $0x464] sm:$0xf0]  ;;  %v1772_v32 = vor.u32 %v2010_v20, %v1771_v19  ;;  %v1373_v33 = vld [vmem:[#allocation2 + $0x68] sm:$0xf0]  ;;  %v1907_v48 = vld [vmem:[#allocation2 + $0x54] sm:$0xf] }
  0x42   :  { %1046 = vmatpush.bf16.msrb.mxu1 %v1676_v23  ;;  %v1892_v23 = vor.u32 %v2040_v9, %v1891_v6  ;;  %v1501_v42 = vld [vmem:[#allocation2 + $0x168] sm:$0xf0]  ;;  %v1376_v44 = vor.u32 %v1909_v31, %v1373_v33  ;;  %v1365_v50 = vld [vmem:[#allocation2 + $0x58] sm:$0xf0]  ;;  %v1923_v51 = vld [vmem:[#allocation2 + $0xd4] sm:$0xf] }
  0x43   :  { %1059 = vmatpush.bf16.msrb.mxu2 %v1740_v25  ;;  %v1509_v25 = vld [vmem:[#allocation2 + $0x178] sm:$0xf0]  ;;  %v1939_v55 = vld [vmem:[#allocation2 + $0x154] sm:$0xf]  ;;  %v1368_v57 = vor.u32 %v1907_v48, %v1365_v50  ;;  %v1867_v59 = vld [vmem:[#allocation2 + $0x440] sm:$0xf] }
  0x44   :  { %1072 = vmatpush.bf16.msrb.mxu3 %v1804_v29  ;;  %v1883_v29 = vld [vmem:[#allocation2 + $0x460] sm:$0xf]  ;;  %v1512_v38 = vor.u32 %v1943_v24, %v1509_v25  ;;  %v1429_v52 = vld [vmem:[#allocation2 + $0xd8] sm:$0xf0]  ;;  %v1357_v62 = vld [vmem:[#allocation2 + $0x48] sm:$0xf0] }
  0x45   :  { %1034 = vmatpush.bf16.msrb.mxu0 %v1604_v34  ;;  %v1925_v34 = vld [vmem:[#allocation2 + $0xe4] sm:$0xf]  ;;  %v1884_v40 = vor.u32 %v2038_v30, %v1883_v29  ;;  %v1493_v56 = vld [vmem:[#allocation2 + $0x158] sm:$0xf0]  ;;  %v1432_v58 = vor.u32 %v1923_v51, %v1429_v52  ;;  %v1421_v0 = vld [vmem:[#allocation2 + $0xc8] sm:$0xf0] }
  0x46   :  { %1047 = vmatpush.bf16.msrb.mxu1 %v1668_v35  ;;  %v1437_v35 = vld [vmem:[#allocation2 + $0xe8] sm:$0xf0]  ;;  %v1921_v63 = vld [vmem:[#allocation2 + $0xc4] sm:$0xf]  ;;  %v1859_v9 = vld [vmem:[#allocation2 + $0x430] sm:$0xf] }
  0x47   :  { %1060 = vmatpush.bf16.msrb.mxu2 %v1732_v37  ;;  %v238_v37 = vunpack.c.h.b16 %v80_v4  ;;  %v1440_v45 = vor.u32 %v1925_v34, %v1437_v35  ;;  %v1937_v3 = vld [vmem:[#allocation2 + $0x144] sm:$0xf]  ;;  %v1485_v4 = vld [vmem:[#allocation2 + $0x148] sm:$0xf0]  ;;  %v1424_v6 = vor.u32 %v1921_v63, %v1421_v0  ;;  %v2032_v10 = vld [vmem:[#allocation2 + $0x434] sm:$0xf0] }
  0x48   :  { %1073 = vmatpush.bf16.msrb.mxu3 %v1796_v41  ;;  %v1941_v41 = vld [vmem:[#allocation2 + $0x164] sm:$0xf]  ;;  %v1903_v13 = vld [vmem:[#allocation2 + $0x34] sm:$0xf]  ;;  %v1349_v14 = vld [vmem:[#allocation2 + $0x38] sm:$0xf0] }
  0x49   :  { %1035 = vmatpush.bf16.msrb.mxu0 %v1596_v46  ;;  %v1875_v46 = vld [vmem:[#allocation2 + $0x450] sm:$0xf]  ;;  %v1919_v15 = vld [vmem:[#allocation2 + $0xb4] sm:$0xf]  ;;  %v1413_v16 = vld [vmem:[#allocation2 + $0xb8] sm:$0xf0]  ;;  %v1352_v21 = vor.u32 %v1903_v13, %v1349_v14 }
  0x4a   :  { %1048 = vmatpush.bf16.msrb.mxu1 %v1660_v47  ;;  %v2036_v47 = vld [vmem:[#allocation2 + $0x454] sm:$0xf0]  ;;  %v1935_v19 = vld [vmem:[#allocation2 + $0x134] sm:$0xf]  ;;  %v1477_v20 = vld [vmem:[#allocation2 + $0x138] sm:$0xf0] }
  0x4b   :  { %1061 = vmatpush.bf16.msrb.mxu2 %v1724_v49  ;;  %v2236_v49 = vpack.c.b16 %v238_v37, %v238_v37  ;;  %v1876_v54 = vor.u32 %v2036_v47, %v1875_v46  ;;  %v2030_v24 = vld [vmem:[#allocation2 + $0x424] sm:$0xf0]  ;;  %v1901_v25 = vld [vmem:[#allocation2 + $0x24] sm:$0xf]  ;;  %v1341_v26 = vld [vmem:[#allocation2 + $0x28] sm:$0xf0]  ;;  %v1480_v29 = vor.u32 %v1935_v19, %v1477_v20 }
  0x4c   :  { %1074 = vmatpush.bf16.msrb.mxu3 %v1788_v53  ;;  %v1504_v53 = vor.u32 %v1941_v41, %v1501_v42  ;;  %v1933_v31 = vld [vmem:[#allocation2 + $0x124] sm:$0xf]  ;;  %v1344_v33 = vor.u32 %v1901_v25, %v1341_v26  ;;  %v1843_v35 = vld [vmem:[#allocation2 + $0x410] sm:$0xf]  ;;  %v2028_v37 = vld [vmem:[#allocation2 + $0x414] sm:$0xf0] }
  0x4d   :  { %1036 = vmatpush.bf16.msrb.mxu0 %v1588_v60  ;;  %v2034_v60 = vld [vmem:[#allocation2 + $0x444] sm:$0xf0]  ;;  %v1915_v41 = vld [vmem:[#allocation2 + $0x94] sm:$0xf]  ;;  %v1397_v42 = vld [vmem:[#allocation2 + $0x98] sm:$0xf0]  ;;  %v1844_v46 = vor.u32 %v2028_v37, %v1843_v35 }
  0x4e   :  { %1049 = vmatpush.bf16.msrb.mxu1 %v1652_v61  ;;  %v1905_v61 = vld [vmem:[#allocation2 + $0x44] sm:$0xf]  ;;  %v1868_v2 = vor.u32 %v2034_v60, %v1867_v59  ;;  %v1461_v47 = vld [vmem:[#allocation2 + $0x118] sm:$0xf0]  ;;  %v1835_v48 = vld [vmem:[#allocation2 + $0x400] sm:$0xf]  ;;  %v1400_v52 = vor.u32 %v1915_v41, %v1397_v42 }
  0x4f   :  { %1062 = vmatpush.bf16.msrb.mxu2 %v1716_v1  ;;  %v1496_v1 = vor.u32 %v1939_v55, %v1493_v56  ;;  %v81_v50 = vld [vmem:[%s2279_s0 + $0x20] sm:$0xf]  ;;  %v1325_v55 = vld [vmem:[#allocation2 + $0x8] sm:$0xf0]  ;;  %v1913_v56 = vld [vmem:[#allocation2 + $0x84] sm:$0xf] }
  0x50   :  { %1075 = vmatpush.bf16.msrb.mxu3 %v1780_v5  ;;  %v1360_v5 = vor.u32 %v1905_v61, %v1357_v62  ;;  %v1573_v60 = vld [vmem:[#allocation2 + $0x1f8] sm:$0xf0]  ;;  %v1975_v61 = vld [vmem:[#allocation2 + $0x274] sm:$0xf]  ;;  %v239_v63 = vunpack.c.l.b16 %v81_v50  ;;  %v1973_v19 = vld [vmem:[#allocation2 + $0x264] sm:$0xf] }
  0x51   :  { %1037 = vmatpush.bf16.msrb.mxu0 %v1580_v17  ;;  %v1488_v17 = vor.u32 %v1937_v3, %v1485_v4  ;;  %v1637_v62 = vld [vmem:[#allocation2 + $0x278] sm:$0xf0]  ;;  %v2007_v13 = vld [vmem:[#allocation2 + $0x374] sm:$0xf]  ;;  %v1629_v20 = vld [vmem:[#allocation2 + $0x268] sm:$0xf0] }
  0x52   :  { %1050 = vmatpush.bf16.msrb.mxu1 %v1644_v18  ;;  %v1860_v18 = vor.u32 %v2032_v10, %v1859_v9  ;;  %v1640_v10 = vor.u32 %v1975_v61, %v1637_v62  ;;  %v1765_v14 = vld [vmem:[#allocation2 + $0x378] sm:$0xf0]  ;;  %v1632_v26 = vor.u32 %v1973_v19, %v1629_v20  ;;  %v2003_v41 = vld [vmem:[#allocation2 + $0x354] sm:$0xf]  ;;  %v1985_v50 = vld [vmem:[#allocation2 + $0x2c4] sm:$0xf] }
  0x53   :  { %1063 = vmatpush.bf16.msrb.mxu2 %v1708_v22  ;;  %v1416_v22 = vor.u32 %v1919_v15, %v1413_v16  ;;  %v1957_v15 = vld [vmem:[#allocation2 + $0x1e4] sm:$0xf]  ;;  %v1685_v35 = vld [vmem:[#allocation2 + $0x2d8] sm:$0xf0]  ;;  %v1947_v19 = vld [vmem:[#allocation2 + $0x194] sm:$0xf] }
  0x54   :  { %1076 = vmatpush.bf16.msrb.mxu3 %v1772_v32  ;;  %1038 = vmatmul.bf16.vlgmr.msrb.gmra.mxu0 %v2229_v36  ;;  %v1469_v32 = vld [vmem:[#allocation2 + $0x128] sm:$0xf0]  ;;  %v1749_v42 = vld [vmem:[#allocation2 + $0x358] sm:$0xf0]  ;;  %s2161_s0 = smov 64  }
  0x55   :  { %1082 = vmatpush.bf16.msra.mxu0 %v1892_v23  ;;  %1051 = vmatmul.bf16.vlgmr.msrb.gmra.mxu1 %v2233_v43  ;;  %v1851_v23 = vld [vmem:[#allocation2 + $0x420] sm:$0xf]  ;;  %v1669_v61 = vld [vmem:[#allocation2 + $0x2b8] sm:$0xf0] }
  0x56   :  { %1095 = vmatpush.bf16.msra.mxu1 %v1384_v27  ;;  %1064 = vmatmul.bf16.vlgmr.msrb.gmra.mxu2 %v2231_v39  ;;  %v1917_v27 = vld [vmem:[#allocation2 + $0xa4] sm:$0xf]  ;;  %v1852_v30 = vor.u32 %v2030_v24, %v1851_v23  ;;  %v1693_v23 = vld [vmem:[#allocation2 + $0x2e8] sm:$0xf0]  ;;  %v1768_v24 = vor.u32 %v2007_v13, %v1765_v14 }
  0x57   :  { %1108 = vmatpush.bf16.msra.mxu2 %v1448_v28  ;;  %1077 = vmatmul.bf16.vlgmr.msrb.gmra.mxu3 %v2236_v49  ;;  %v1405_v28 = vld [vmem:[#allocation2 + $0xa8] sm:$0xf0] }
  0x58   :  { %1121 = vmatpush.bf16.msra.mxu3 %v1512_v38  ;;  %v1408_v34 = vor.u32 %v1917_v27, %v1405_v28  ;;  %v1899_v38 = vld [vmem:[#allocation2 + $0x14] sm:$0xf]  ;;  %v2005_v27 = vld [vmem:[#allocation2 + $0x364] sm:$0xf]  ;;  %v1757_v28 = vld [vmem:[#allocation2 + $0x368] sm:$0xf0] }
  0x59   :  { %1083 = vmatpush.bf16.msra.mxu0 %v1884_v40  ;;  %v1333_v40 = vld [vmem:[#allocation2 + $0x18] sm:$0xf0]  ;;  %v1760_v37 = vor.u32 %v2005_v27, %v1757_v28  ;;  %v1995_v27 = vld [vmem:[#allocation2 + $0x314] sm:$0xf] }
  0x5a   :  { %1096 = vmatpush.bf16.msra.mxu1 %v1376_v44  ;;  %v1472_v44 = vor.u32 %v1933_v31, %v1469_v32  ;;  %v1336_v51 = vor.u32 %v1899_v38, %v1333_v40  ;;  %v1557_v31 = vld [vmem:[#allocation2 + $0x1d8] sm:$0xf0]  ;;  %v1971_v32 = vld [vmem:[#allocation2 + $0x254] sm:$0xf] }
  0x5b   :  { %1109 = vmatpush.bf16.msra.mxu2 %v1440_v45  ;;  %v1931_v45 = vld [vmem:[#allocation2 + $0x114] sm:$0xf] }
  0x5c   :  { %1122 = vmatpush.bf16.msra.mxu3 %v1504_v53  ;;  %v2026_v53 = vld [vmem:[#allocation2 + $0x404] sm:$0xf0]  ;;  %v1464_v59 = vor.u32 %v1931_v45, %v1461_v47  ;;  %v1969_v47 = vld [vmem:[#allocation2 + $0x244] sm:$0xf] }
  0x5d   :  { %1084 = vmatpush.bf16.msra.mxu0 %v1876_v54  ;;  %v1897_v54 = vld [vmem:[#allocation2 + $0x4] sm:$0xf]  ;;  %v1836_v0 = vor.u32 %v2026_v53, %v1835_v48  ;;  %v1613_v48 = vld [vmem:[#allocation2 + $0x248] sm:$0xf0] }
  0x5e   :  { %1097 = vmatpush.bf16.msra.mxu1 %v1368_v57  ;;  %v1389_v57 = vld [vmem:[#allocation2 + $0x88] sm:$0xf0]  ;;  %v1328_v3 = vor.u32 %v1897_v54, %v1325_v55  ;;  %v2001_v53 = vld [vmem:[#allocation2 + $0x344] sm:$0xf]  ;;  %v1951_v55 = vld [vmem:[#allocation2 + $0x1b4] sm:$0xf] }
  0x5f   :  { %1110 = vmatpush.bf16.msra.mxu2 %v1432_v58  ;;  %v1959_v58 = vld [vmem:[#allocation2 + $0x1f4] sm:$0xf]  ;;  %v1392_v4 = vor.u32 %v1913_v56, %v1389_v57  ;;  %v1741_v54 = vld [vmem:[#allocation2 + $0x348] sm:$0xf0]  ;;  %v1541_v57 = vld [vmem:[#allocation2 + $0x1b8] sm:$0xf0] }
  0x60   :  { %1123 = vmatpush.bf16.msra.mxu3 %v1496_v1  ;;  %v1991_v1 = vld [vmem:[#allocation2 + $0x2f4] sm:$0xf]  ;;  %v1576_v9 = vor.u32 %v1959_v58, %v1573_v60  ;;  %v1544_v62 = vor.u32 %v1951_v55, %v1541_v57  ;;  %v2037_v55 = vld [vmem:[#allocation2 + $0x464] sm:$0xf] }
  0x61   :  { %1085 = vmatpush.bf16.msra.mxu0 %v1868_v2  ;;  %v1701_v2 = vld [vmem:[#allocation2 + $0x2f8] sm:$0xf0]  ;;  %v1967_v58 = vld [vmem:[#allocation2 + $0x234] sm:$0xf] }
  0x62   :  { %1098 = vmatpush.bf16.msra.mxu1 %v1360_v5  ;;  %v1929_v5 = vld [vmem:[#allocation2 + $0x104] sm:$0xf]  ;;  %v1704_v16 = vor.u32 %v1991_v1, %v1701_v2  ;;  %v1983_v60 = vld [vmem:[#allocation2 + $0x2b4] sm:$0xf]  ;;  %v1733_v1 = vld [vmem:[#allocation2 + $0x338] sm:$0xf0] }
  0x63   :  { %1111 = vmatpush.bf16.msra.mxu2 %v1424_v6  ;;  %v1453_v6 = vld [vmem:[#allocation2 + $0x108] sm:$0xf0]  ;;  %v1949_v2 = vld [vmem:[#allocation2 + $0x1a4] sm:$0xf] }
  0x64   :  { %1124 = vmatpush.bf16.msra.mxu3 %v1488_v17  ;;  %v2244_v17 = vpack.c.b16 %v239_v63, %v239_v63 }
  0x65   :  { %1086 = vmatpush.bf16.msra.mxu0 %v1860_v18  ;;  %v1565_v18 = vld [vmem:[#allocation2 + $0x1e8] sm:$0xf0] }
  0x66   :  { %1099 = vmatpush.bf16.msra.mxu1 %v1352_v21  ;;  %v1456_v21 = vor.u32 %v1929_v5, %v1453_v6  ;;  %v1568_v25 = vor.u32 %v1957_v15, %v1565_v18  ;;  %v1965_v5 = vld [vmem:[#allocation2 + $0x224] sm:$0xf]  ;;  %v1597_v6 = vld [vmem:[#allocation2 + $0x228] sm:$0xf0] }
  0x67   :  { %1112 = vmatpush.bf16.msra.mxu2 %v1416_v22  ;;  %v1989_v22 = vld [vmem:[#allocation2 + $0x2e4] sm:$0xf]  ;;  %v1600_v15 = vor.u32 %v1965_v5, %v1597_v6  ;;  %v1725_v18 = vld [vmem:[#allocation2 + $0x328] sm:$0xf0]  ;;  %v2015_v5 = vld [vmem:[#allocation2 + $0x3b4] sm:$0xf] }
  0x68   :  { %1125 = vmatpush.bf16.msra.mxu3 %v1480_v29  ;;  %v1955_v29 = vld [vmem:[#allocation2 + $0x1d4] sm:$0xf]  ;;  %v1797_v6 = vld [vmem:[#allocation2 + $0x3b8] sm:$0xf0] }
  0x69   :  { %1087 = vmatpush.bf16.msra.mxu0 %v1852_v30  ;;  %v1696_v30 = vor.u32 %v1989_v22, %v1693_v23  ;;  %v1560_v38 = vor.u32 %v1955_v29, %v1557_v31  ;;  %v1963_v22 = vld [vmem:[#allocation2 + $0x214] sm:$0xf]  ;;  %v1589_v23 = vld [vmem:[#allocation2 + $0x218] sm:$0xf0]  ;;  %v1945_v31 = vld [vmem:[#allocation2 + $0x184] sm:$0xf] }
  0x6a   :  { %1100 = vmatpush.bf16.msra.mxu1 %v1344_v33  ;;  %v1621_v33 = vld [vmem:[#allocation2 + $0x258] sm:$0xf0]  ;;  %v1592_v29 = vor.u32 %v1963_v22, %v1589_v23 }
  0x6b   :  { %1113 = vmatpush.bf16.msra.mxu2 %v1408_v34  ;;  %v1987_v34 = vld [vmem:[#allocation2 + $0x2d4] sm:$0xf]  ;;  %v1624_v40 = vor.u32 %v1971_v32, %v1621_v33  ;;  %v1517_v32 = vld [vmem:[#allocation2 + $0x188] sm:$0xf0]  ;;  %v1845_v22 = vld [vmem:[#allocation2 + $0x418] sm:$0xf0] }
  0x6c   :  { %1126 = vmatpush.bf16.msra.mxu3 %v1472_v44  ;;  %v1953_v44 = vld [vmem:[#allocation2 + $0x1c4] sm:$0xf]  ;;  %v1688_v45 = vor.u32 %v1987_v34, %v1685_v35  ;;  %v1581_v35 = vld [vmem:[#allocation2 + $0x208] sm:$0xf0] }
  0x6d   :  { %1088 = vmatpush.bf16.msra.mxu0 %v1844_v46  ;;  %v1549_v46 = vld [vmem:[#allocation2 + $0x1c8] sm:$0xf0]  ;;  %v1961_v34 = vld [vmem:[#allocation2 + $0x204] sm:$0xf] }
  0x6e   :  { %1101 = vmatpush.bf16.msra.mxu1 %v1336_v51  ;;  %v1752_v51 = vor.u32 %v2003_v41, %v1749_v42  ;;  %v1829_v41 = vld [vmem:[#allocation2 + $0x3f8] sm:$0xf0] }
  0x6f   :  { %1114 = vmatpush.bf16.msra.mxu2 %v1400_v52  ;;  %v1616_v52 = vor.u32 %v1969_v47, %v1613_v48  ;;  %v1584_v47 = vor.u32 %v1961_v34, %v1581_v35  ;;  %v1993_v48 = vld [vmem:[#allocation2 + $0x304] sm:$0xf] }
  0x70   :  { %1127 = vmatpush.bf16.msra.mxu3 %v1464_v59  ;;  %v1605_v59 = vld [vmem:[#allocation2 + $0x238] sm:$0xf0] }
  0x71   :  { %1089 = vmatpush.bf16.msra.mxu0 %v1836_v0  ;;  %v1608_v63 = vor.u32 %v1967_v58, %v1605_v59  ;;  %v1999_v0 = vld [vmem:[#allocation2 + $0x334] sm:$0xf] }
  0x72   :  { %1102 = vmatpush.bf16.msra.mxu1 %v1328_v3  ;;  %v1672_v3 = vor.u32 %v1983_v60, %v1669_v61  ;;  %v1736_v13 = vor.u32 %v1999_v0, %v1733_v1  ;;  %v2019_v59 = vld [vmem:[#allocation2 + $0x3d4] sm:$0xf]  ;;  %v1813_v60 = vld [vmem:[#allocation2 + $0x3d8] sm:$0xf0]  ;;  %v2017_v0 = vld [vmem:[#allocation2 + $0x3c4] sm:$0xf] }
  0x73   :  { %1115 = vmatpush.bf16.msra.mxu2 %v1392_v4  ;;  %v1533_v4 = vld [vmem:[#allocation2 + $0x1a8] sm:$0xf0]  ;;  %v2035_v61 = vld [vmem:[#allocation2 + $0x454] sm:$0xf] }
  0x74   :  { %1090 = vmatmul.bf16.vlgmr.msra.gmra.mxu0 %v2244_v17  ;;  %1128 = vmatpush.bf16.msra.mxu3 %v1456_v21  ;;  %v1536_v14 = vor.u32 %v1949_v2, %v1533_v4  ;;  %v1525_v21 = vld [vmem:[#allocation2 + $0x198] sm:$0xf0]  ;;  %v1805_v1 = vld [vmem:[#allocation2 + $0x3c8] sm:$0xf0]  ;;  %v2033_v2 = vld [vmem:[#allocation2 + $0x444] sm:$0xf] }
  0x75   :  { %1134 = vmatpush.bf16.msrb.mxu0 %v1576_v9  ;;  %1103 = vmatmul.bf16.vlgmr.msra.gmra.mxu1 %v2215_v11  ;;  %v1552_v11 = vor.u32 %v1953_v44, %v1549_v46  ;;  %v1981_v9 = vld [vmem:[#allocation2 + $0x2a4] sm:$0xf]  ;;  %v1528_v28 = vor.u32 %v1947_v19, %v1525_v21  ;;  %v2039_v44 = vld [vmem:[#allocation2 + $0x474] sm:$0xf]  ;;  %v1520_v46 = vor.u32 %v1945_v31, %v1517_v32 }
  0x76   :  { %1147 = vmatpush.bf16.msrb.mxu1 %v1640_v10  ;;  %1116 = vmatmul.bf16.vlgmr.msra.gmra.mxu2 %v2217_v12  ;;  %v1677_v12 = vld [vmem:[#allocation2 + $0x2c8] sm:$0xf0]  ;;  %v1808_v4 = vor.u32 %v2017_v0, %v1805_v1  ;;  %v2011_v19 = vld [vmem:[#allocation2 + $0x394] sm:$0xf] }
  0x77   :  { %1160 = vmatpush.bf16.msrb.mxu2 %v1704_v16  ;;  %1129 = vmatmul.bf16.vlgmr.msra.gmra.mxu3 %v2211_v7  ;;  %v1680_v56 = vor.u32 %v1985_v50, %v1677_v12  ;;  %v1744_v7 = vor.u32 %v2001_v53, %v1741_v54  ;;  %v1661_v10 = vld [vmem:[#allocation2 + $0x2a8] sm:$0xf0]  ;;  %v1997_v16 = vld [vmem:[#allocation2 + $0x324] sm:$0xf]  ;;  %v2027_v21 = vld [vmem:[#allocation2 + $0x414] sm:$0xf] }
  0x78   :  { %1173 = vmatpush.bf16.msrb.mxu3 %v1768_v24  ;;  %v1664_v20 = vor.u32 %v1981_v9, %v1661_v10  ;;  %v1979_v24 = vld [vmem:[#allocation2 + $0x294] sm:$0xf]  ;;  %v1709_v50 = vld [vmem:[#allocation2 + $0x308] sm:$0xf0] }
  0x79   :  { %1135 = vmatpush.bf16.msrb.mxu0 %v1568_v25  ;;  %v1653_v25 = vld [vmem:[#allocation2 + $0x298] sm:$0xf0]  ;;  %v1821_v53 = vld [vmem:[#allocation2 + $0x3e8] sm:$0xf0]  ;;  %v1712_v54 = vor.u32 %v1993_v48, %v1709_v50  ;;  %v2031_v9 = vld [vmem:[#allocation2 + $0x434] sm:$0xf] }
  0x7a   :  { %1148 = vmatpush.bf16.msrb.mxu1 %v1632_v26  ;;  %v1728_v26 = vor.u32 %v1997_v16, %v1725_v18  ;;  %v1656_v33 = vor.u32 %v1979_v24, %v1653_v25  ;;  %v1848_v24 = vor.u32 %v2027_v21, %v1845_v22  ;;  %v2009_v25 = vld [vmem:[#allocation2 + $0x384] sm:$0xf] }
  0x7b   :  { %1161 = vmatpush.bf16.msrb.mxu2 %v1696_v30  ;;  %v1717_v30 = vld [vmem:[#allocation2 + $0x318] sm:$0xf0] }
  0x7c   :  { %1174 = vmatpush.bf16.msrb.mxu3 %v1760_v37  ;;  %v1977_v37 = vld [vmem:[#allocation2 + $0x284] sm:$0xf]  ;;  %v1720_v42 = vor.u32 %v1995_v27, %v1717_v30 }
  0x7d   :  { %1136 = vmatpush.bf16.msrb.mxu0 %v1560_v38  ;;  %v1645_v38 = vld [vmem:[#allocation2 + $0x288] sm:$0xf0]  ;;  %v2025_v27 = vld [vmem:[#allocation2 + $0x404] sm:$0xf] }
  0x7e   :  { %1149 = vmatpush.bf16.msrb.mxu1 %v1624_v40  ;;  %v2023_v40 = vld [vmem:[#allocation2 + $0x3f4] sm:$0xf]  ;;  %v1648_v12 = vor.u32 %v1977_v37, %v1645_v38 }
  0x7f   :  { %1162 = vmatpush.bf16.msrb.mxu2 %v1688_v45  ;;  %v1893_v45 = vld [vmem:[#allocation2 + $0x478] sm:$0xf0] }
  0x80   :  { %1175 = vmatpush.bf16.msrb.mxu3 %v1752_v51  ;;  %v1832_v51 = vor.u32 %v2023_v40, %v1829_v41 }
  0x81   :  { %1137 = vmatpush.bf16.msrb.mxu0 %v1552_v11  ;;  %v1896_v11 = vor.u32 %v2039_v44, %v1893_v45 }
  0x82   :  { %1150 = vmatpush.bf16.msrb.mxu1 %v1616_v52  ;;  %v2021_v52 = vld [vmem:[#allocation2 + $0x3e4] sm:$0xf] }
  0x83   :  { %1163 = vmatpush.bf16.msrb.mxu2 %v1680_v56  ;;  %v1885_v56 = vld [vmem:[#allocation2 + $0x468] sm:$0xf0]  ;;  %v1824_v57 = vor.u32 %v2021_v52, %v1821_v53 }
  0x84   :  { %1176 = vmatpush.bf16.msrb.mxu3 %v1744_v7  ;;  %v1888_v58 = vor.u32 %v2037_v55, %v1885_v56  ;;  %v1877_v7 = vld [vmem:[#allocation2 + $0x458] sm:$0xf0] }
  0x85   :  { %1138 = vmatpush.bf16.msrb.mxu0 %v1544_v62  ;;  %v1816_v62 = vor.u32 %v2019_v59, %v1813_v60 }
  0x86   :  { %1151 = vmatpush.bf16.msrb.mxu1 %v1608_v63  ;;  %v1880_v63 = vor.u32 %v2035_v61, %v1877_v7 }
  0x87   :  { %1164 = vmatpush.bf16.msrb.mxu2 %v1672_v3  ;;  %v1869_v3 = vld [vmem:[#allocation2 + $0x448] sm:$0xf0] }
  0x88   :  { %1177 = vmatpush.bf16.msrb.mxu3 %v1736_v13  ;;  %v2013_v13 = vld [vmem:[#allocation2 + $0x3a4] sm:$0xf] }
  0x89   :  { %1139 = vmatpush.bf16.msrb.mxu0 %v1536_v14  ;;  %v1789_v14 = vld [vmem:[#allocation2 + $0x3a8] sm:$0xf0] }
  0x8a   :  { %1152 = vmatpush.bf16.msrb.mxu1 %v1600_v15  ;;  %v1853_v15 = vld [vmem:[#allocation2 + $0x428] sm:$0xf0]  ;;  %v1792_v16 = vor.u32 %v2013_v13, %v1789_v14 }
  0x8b   :  { %1165 = vmatpush.bf16.msrb.mxu2 %v1664_v20  ;;  %v1781_v20 = vld [vmem:[#allocation2 + $0x398] sm:$0xf0] }
  0x8c   :  { %1178 = vmatpush.bf16.msrb.mxu3 %v1728_v26  ;;  %v1784_v23 = vor.u32 %v2011_v19, %v1781_v20  ;;  %v1773_v26 = vld [vmem:[#allocation2 + $0x388] sm:$0xf0] }
  0x8d   :  { %1140 = vmatpush.bf16.msrb.mxu0 %v1528_v28  ;;  %v1837_v28 = vld [vmem:[#allocation2 + $0x408] sm:$0xf0] }
  0x8e   :  { %1153 = vmatpush.bf16.msrb.mxu1 %v1592_v29  ;;  %v1776_v29 = vor.u32 %v2009_v25, %v1773_v26  ;;  %v1840_v30 = vor.u32 %v2025_v27, %v1837_v28 }
  0x8f   :  { %1166 = vmatpush.bf16.msrb.mxu2 %v1656_v33 }
  0x90   :  { %1179 = vmatpush.bf16.msrb.mxu3 %v1720_v42 }
  0x91   :  { %1141 = vmatpush.bf16.msrb.mxu0 %v1520_v46 }
  0x92   :  { %1154 = vmatpush.bf16.msrb.mxu1 %v1584_v47 }
  0x93   :  { %1167 = vmatpush.bf16.msrb.mxu2 %v1648_v12 }
  0x94   :  { %1180 = vmatpush.bf16.msrb.mxu3 %v1712_v54  ;;  %1142 = vmatmul.bf16.vlgmr.msrb.gmra.mxu0 %v2213_v8  ;;  %v1872_v8 = vor.u32 %v2033_v2, %v1869_v3 }
  0x95   :  { %1186 = vmatpush.bf16.msra.mxu0 %v1832_v51  ;;  %1155 = vmatmul.bf16.vlgmr.msrb.gmra.mxu1 %v2229_v36  ;;  %v1800_v36 = vor.u32 %v2015_v5, %v1797_v6 }
  0x96   :  { %1199 = vmatpush.bf16.msra.mxu1 %v1896_v11  ;;  %1168 = vmatmul.bf16.vlgmr.msrb.gmra.mxu2 %v2233_v43  ;;  %v1861_v43 = vld [vmem:[#allocation2 + $0x438] sm:$0xf0] }
  0x97   :  { %1181 = vmatmul.bf16.vlgmr.msrb.gmra.mxu3 %v2231_v39  ;;  %v1864_v10 = vor.u32 %v2031_v9, %v1861_v43  ;;  %v2029_v39 = vld [vmem:[#allocation2 + $0x424] sm:$0xf] }
  0x98   :  { %v1856_v18 = vor.u32 %v2029_v39, %v1853_v15 }
  0x99   :  { %1187 = vmatpush.bf16.msra.mxu0 %v1824_v57 }
  0x9a   :  { %1200 = vmatpush.bf16.msra.mxu1 %v1888_v58 }
  0x9d   :  { %1188 = vmatpush.bf16.msra.mxu0 %v1816_v62 }
  0x9e   :  { %1201 = vmatpush.bf16.msra.mxu1 %v1880_v63 }
  0xa1   :  { %1189 = vmatpush.bf16.msra.mxu0 %v1808_v4 }
  0xa2   :  { %1202 = vmatpush.bf16.msra.mxu1 %v1872_v8 }
  0xa5   :  { %1190 = vmatpush.bf16.msra.mxu0 %v1800_v36 }
  0xa6   :  { %1203 = vmatpush.bf16.msra.mxu1 %v1864_v10 }
  0xa9   :  { %1191 = vmatpush.bf16.msra.mxu0 %v1792_v16 }
  0xaa   :  { %1204 = vmatpush.bf16.msra.mxu1 %v1856_v18 }
  0xad   :  { %1192 = vmatpush.bf16.msra.mxu0 %v1784_v23 }
  0xae   :  { %1205 = vmatpush.bf16.msra.mxu1 %v1848_v24 }
  0xb1   :  { %1193 = vmatpush.bf16.msra.mxu0 %v1776_v29  ;;  %v987_v31 = vpop.f32.mrf.mxu0 }
  0xb2   :  { %1206 = vmatpush.bf16.msra.mxu1 %v1840_v30  ;;  %v1000_v32 = vpop.f32.mrf.mxu1 }
  0xb3   :  { %v1001_v44 = vadd.f32 %v1000_v32, %v987_v31 }
  0xb4   :  { %1194 = vmatmul.bf16.vlgmr.msra.gmra.mxu0 %v2236_v49 }
  0xb5   :  { %1207 = vmatmul.bf16.vlgmr.msra.gmra.mxu1 %v2244_v17 }
  0xb9   :  { %v1013_v34 = vpop.f32.mrf.mxu2  ;;  %v989_v35 = vpop.f32.mrf.mxu0 }
  0xba   :  { %v1026_v33 = vpop.f32.mrf.mxu3  ;;  %v1002_v37 = vpop.f32.mrf.mxu1  ;;  %v1014_v46 = vadd.f32 %v1013_v34, %v1001_v44 }
  0xbc   :  { %v1027_v12 = vadd.f32 %v1026_v33, %v1014_v46 }
  0xc1   :  { %v1015_v40 = vpop.f32.mrf.mxu2 }
  0xc2   :  { %v1028_v38 = vpop.f32.mrf.mxu3 }
  0xd1   :  { %v1039_v41 = vpop.f32.mrf.mxu0 }
  0xd2   :  { %v1052_v42 = vpop.f32.mrf.mxu1  ;;  %v1040_v51 = vadd.f32 %v1039_v41, %v1027_v12 }
  0xd4   :  { %v1053_v11 = vadd.f32 %v1052_v42, %v1040_v51 }
  0xd9   :  { %v1065_v45 = vpop.f32.mrf.mxu2  ;;  %v1041_v47 = vpop.f32.mrf.mxu0 }
  0xda   :  { %v1078_v48 = vpop.f32.mrf.mxu3  ;;  %v1054_v50 = vpop.f32.mrf.mxu1  ;;  %v1066_v52 = vadd.f32 %v1065_v45, %v1053_v11 }
  0xdc   :  { %v1079_v53 = vadd.f32 %v1078_v48, %v1066_v52  ;;  %v2162_v48 = vmov 32.0  }
  0xdd   :  { %2049 = vrcp.f32 %v2162_v48 }
  0xe1   :  { %v1067_v49 = vpop.f32.mrf.mxu2 }
  0xe2   :  { %v1080_v17 = vpop.f32.mrf.mxu3 }
  0xe3   :  { %v2050_v50 = vpop.eup %2049 }
  0xe4   :  { %v1261_v12 = vmul.f32 32.0, %v2050_v50  ;;  %vm1265_vm0 = vweird.f32 %v2050_v50 }
  0xe6   :  { %v1262_v51 = vsub.f32 1.0, %v1261_v12 }
  0xe8   :  { %v1263_v17 = vmul.f32 %v2050_v50, %v1262_v51 }
  0xf1   :  { %v1091_v54 = vpop.f32.mrf.mxu0 }
  0xf2   :  { %v2256_v55 = vadd.f32 %v1091_v54, %v1079_v53  ;;  %v1104_v56 = vpop.f32.mrf.mxu1  ;;  %v1264_v53 = vadd.f32 %v2050_v50, %v1263_v17 }
  0xf4   :  { %v1224_v57 = vmul.f32 %v2256_v55, %v2256_v55  ;;  %v1212_v58 = vrot.slane %v2256_v55, 4 }
  0xf6   :  { %v1213_v59 = vadd.f32 %v1212_v58, %v2256_v55  ;;  %v1226_v60 = vrot.slane %v1224_v57, 4 }
  0xf8   :  { %v1214_v61 = vrot.slane %v1213_v59, 2  ;;  %v1227_v62 = vadd.f32 %v1226_v60, %v1224_v57 }
  0xf9   :  { %v1117_v7 = vpop.f32.mrf.mxu2  ;;  %v1093_v63 = vpop.f32.mrf.mxu0 }
  0xfa   :  { %v1215_v0 = vadd.f32 %v1214_v61, %v1213_v59  ;;  %v1228_v1 = vrot.slane %v1227_v62, 2  ;;  %v1130_v2 = vpop.f32.mrf.mxu3  ;;  %v1106_v3 = vpop.f32.mrf.mxu1  ;;  %v1118_v39 = vadd.f32 %v1117_v7, %v1104_v56  ;;  %v1266_v59 = vsel %vm1265_vm0, %v2050_v50, %v1264_v53 }
  0xfc   :  { %v1216_v4 = vrot.slane %v1215_v0, 1  ;;  %v1229_v5 = vadd.f32 %v1228_v1, %v1227_v62  ;;  %v1131_v19 = vadd.f32 %v1130_v2, %v1118_v39  ;;  %v1284_v39 = vld [vmem:[#allocation7] sm:$0x1] }
  0xfe   :  { %v1217_v8 = vadd.f32 %v1216_v4, %v1215_v0  ;;  %v1230_v9 = vrot.slane %v1229_v5, 1 }
 0x100   :  { %1239 = vrot.lane.b32.xlu0 %v1217_v8, %s2161_s0  ;;  %v1231_v36 = vadd.f32 %v1230_v9, %v1229_v5 }
 0x101   :  { %v1119_v6 = vpop.f32.mrf.mxu2 }
 0x102   :  { %v1132_v43 = vpop.f32.mrf.mxu3 }
 0x103   :  { %v1282_v43 = vld [vmem:[#allocation6] sm:$0x1] }
 0x108   :  { %1244 = vrot.lane.b32.xlu0 %v1231_v36, %s2161_s0 }
 0x111   :  { %v1143_v10 = vpop.f32.mrf.mxu0 }
 0x112   :  { %v1156_v13 = vpop.f32.mrf.mxu1  ;;  %v1144_v21 = vadd.f32 %v1143_v10, %v1131_v19 }
 0x114   :  { %v1157_v23 = vadd.f32 %v1156_v13, %v1144_v21 }
 0x119   :  { %v1169_v14 = vpop.f32.mrf.mxu2  ;;  %v1145_v15 = vpop.f32.mrf.mxu0 }
 0x11a   :  { %v1182_v16 = vpop.f32.mrf.mxu3  ;;  %v1158_v18 = vpop.f32.mrf.mxu1  ;;  %v1170_v24 = vadd.f32 %v1169_v14, %v1157_v23 }
 0x11c   :  { %v1183_v25 = vadd.f32 %v1182_v16, %v1170_v24 }
 0x121   :  { %v1171_v20 = vpop.f32.mrf.mxu2 }
 0x122   :  { %v1184_v22 = vpop.f32.mrf.mxu3 }
 0x131   :  { %v1195_v26 = vpop.f32.mrf.mxu0 }
 0x132   :  { %v1196_v27 = vadd.f32 %v1195_v26, %v1183_v25  ;;  %v1208_v28 = vpop.f32.mrf.mxu1 }
 0x134   :  { %v2264_v29 = vadd.f32 %v1208_v28, %v1196_v27 }
 0x136   :  { %v1225_v30 = vmul.f32 %v2264_v29, %v2264_v29  ;;  %v1218_v31 = vrot.slane %v2264_v29, 4 }
 0x138   :  { %v1219_v32 = vadd.f32 %v1218_v31, %v2264_v29  ;;  %v1232_v33 = vrot.slane %v1225_v30, 4 }
 0x139   :  { %v1197_v34 = vpop.f32.mrf.mxu0 }
 0x13a   :  { %v1210_v35 = vpop.f32.mrf.mxu1  ;;  %v1220_v37 = vrot.slane %v1219_v32, 2  ;;  %v1233_v38 = vadd.f32 %v1232_v33, %v1225_v30 }
 0x13c   :  { %v1221_v40 = vadd.f32 %v1220_v37, %v1219_v32  ;;  %v1234_v41 = vrot.slane %v1233_v38, 2 }
 0x13e   :  { %v1222_v42 = vrot.slane %v1221_v40, 1  ;;  %v1235_v45 = vadd.f32 %v1234_v41, %v1233_v38 }
 0x140   :  { %v1223_v44 = vadd.f32 %v1222_v42, %v1221_v40  ;;  %v1236_v46 = vrot.slane %v1235_v45, 1 }
 0x142   :  { %1251 = vrot.lane.b32.xlu1 %v1223_v44, %s2161_s0  ;;  %v1237_v47 = vadd.f32 %v1236_v46, %v1235_v45 }
 0x14a   :  { %1256 = vrot.lane.b32.xlu1 %v1237_v47, %s2161_s0 }
 0x172   :  { %v1240_v49 = vpop.permute.xlu0 %1239 }
 0x173   :  { %v1242_v11 = vadd.f32 %v1240_v49, %v1217_v8 }
 0x175   :  { %v1248_v56 = vadd.f32 %v1242_v11, %v1223_v44 }
 0x17a   :  { %v1245_v52 = vpop.permute.xlu0 %1244 }
 0x17b   :  { %v1247_v57 = vadd.f32 %v1245_v52, %v1231_v36 }
 0x17d   :  { %v1249_v61 = vadd.f32 %v1247_v57, %v1237_v47 }
 0x1b4   :  { %v1252_v54 = vpop.permute.xlu1 %1251 }
 0x1b5   :  { %v1254_v58 = vadd.f32 %v1252_v54, %v1248_v56 }
 0x1b7   :  { %v1267_v60 = vmul.f32 %v1266_v59, %v1254_v58 }
 0x1b9   :  { %v1269_v63 = vmul.f32 %v1267_v60, %v1267_v60 }
 0x1bc   :  { %v1257_v7 = vpop.permute.xlu1 %1256 }
 0x1bd   :  { %v1259_v62 = vadd.f32 %v1257_v7, %v1249_v61 }
 0x1bf   :  { %v1268_v0 = vmul.f32 %v1266_v59, %v1259_v62 }
 0x1c1   :  { %v1270_v1 = vsub.f32 %v1268_v0, %v1269_v63 }
 0x1c3   :  { %v1271_v2 = vadd.f32 1e-05, %v1270_v1 }
 0x1c5   :  { %2051 = vrsqrt.f32 %v1271_v2  ;;  %vm1278_vm2 = vweird.f32 %v1271_v2 }
 0x1cb   :  { %v2052_v3 = vpop.eup %2051 }
 0x1cc   :  { %v1273_v4 = vmul.f32 %v2052_v3, %v1271_v2  ;;  %vm1279_vm1 = vweird.f32 %v2052_v3 }
 0x1cd   :  { %vm1280_vm3 = vmor %vm1278_vm2, %vm1279_vm1 }
 0x1ce   :  { %v1274_v8 = vmul.f32 %v2052_v3, %v1273_v4 }
 0x1d0   :  { %v1275_v5 = vmul.f32 0.5, %v1274_v8 }
 0x1d2   :  { %v1276_v6 = vsub.f32 1.5, %v1275_v5 }
 0x1d4   :  { %v1277_v9 = vmul.f32 %v2052_v3, %v1276_v6 }
 0x1d6   :  { %v1281_v36 = vsel %vm1280_vm3, %v2052_v3, %v1277_v9 }
 0x1d7   :  { %v1283_v10 = vmul.f32 %v1282_v43, %v1281_v36 }
 0x1d9   :  { %v1288_v13 = vperm.slane %v1283_v10, 0  ;;  %v1285_v14 = vmul.f32 %v1283_v10, %v1267_v60 }
 0x1db   :  { %1289 = vrot.lane.b32.xlu2 %v1288_v13, %s2161_s0  ;;  %v1286_v15 = vsub.f32 %v1284_v39, %v1285_v14 }
 0x1dd   :  { %v1295_v16 = vperm.slane %v1286_v15, 0 }
 0x1e3   :  { %1296 = vrot.lane.b32.xlu2 %v1295_v16, %s2161_s0 }
 0x235   :  { %v1290_v18 = vpop.permute.xlu2 %1289 }
 0x236   :  { %v1293_v19 = vsel %vm1292_vm4, %v1283_v10, %v1290_v18 }
 0x237   :  { %v1300_v20 = vperm.slane %v1293_v19, 0 }
 0x239   :  { %v1301_v23 = vmul.f32 %v1300_v20, %v2256_v55  ;;  %v1302_v24 = vmul.f32 %v1300_v20, %v2264_v29 }
 0x23d   :  { %v1297_v21 = vpop.permute.xlu2 %1296 }
 0x23e   :  { %v1299_v22 = vsel %vm1292_vm4, %v1286_v15, %v1297_v21 }
 0x23f   :  { %v1303_v25 = vperm.slane %v1299_v22, 0 }
 0x241   :  { %v1304_v26 = vadd.f32 %v1303_v25, %v1301_v23  ;;  %v1305_v27 = vadd.f32 %v1303_v25, %v1302_v24 }
 0x243   :  { %vm1306_vm5 = vcmp.ge.f32.partialorder %v1304_v26, 0.0  ;;  %vm1307_vm6 = vcmp.ge.f32.partialorder %v1305_v27, 0.0  ;;  %v1308_v28 = vmul.f32 0.05, %v1304_v26  ;;  %v1309_v30 = vmul.f32 0.05, %v1305_v27 }
 0x245   :  { %v1310_v31 = vsel %vm1306_vm5, %v1304_v26, %v1308_v28  ;;  %v1311_v32 = vsel %vm1307_vm6, %v1305_v27, %v1309_v30 }
 0x246   :  { %v1312_v33 = vpack.c.bf16 %v1311_v32, %v1310_v31 }
 0x248   :  { %1313 = vst [vmem:[%s2284_s5] sm:$0xff] %v1312_v33 }
 0x249   :  { %1318 = vsyncpa [#allocation3], 1 }
 0x24a   :  { %1319 = vsyncpa [#allocation5], 1 }
 0x24b   :  { %1320 = vsyncpa [#allocation8], 1 }

// kernel: _lambda_.8
= control target key start
LH: loop header
LB: loop body
LE: loop exit
PB: predicated region body
PF: predicated region fallthrough
CT: control target
= control target key end

     0   :  { %10 = vsyncpa [#allocation3], 0  ;;  %s1632_s0 = inlined_call_operand.vmem [shape: bf16[128,288], index: 0, kind: input, shape index: {}]   ;;  %s1633_s1 = inlined_call_operand.hbm [shape: bf16[288,64], index: 1, kind: input, shape index: {}]   ;;  %s1634_s2 = inlined_call_operand.hbm [shape: f32[1,64], index: 2, kind: input, shape index: {}]   ;;  %s1635_s3 = inlined_call_operand.hbm [shape: f32[1,64], index: 3, kind: input, shape index: {}]   ;;  %s1636_s4 = inlined_call_operand.hbm [shape: f32[1,64], index: 4, kind: input, shape index: {}]   ;;  %s1637_s5 = inlined_call_operand.vmem [shape: bf16[128,64], index: 5, kind: output, shape index: {}]  }
   0x1   :  { %11 = vsyncpa [#allocation5], 0  ;;  %s33_s20 = sshll.u32 %s1634_s2, 4  ;;  %s34_s20 = int_to_ptr.hbm [resolvable:$true] %s33_s20 }
   0x2   :  { %12 = vsyncpa [#allocation8], 0  ;;  %s1195_s21 = smov [#allocation4]   ;;  %s19_s25 = sshll.u32 %s1633_s1, 4  ;;  %s20_s25 = int_to_ptr.hbm [resolvable:$true] %s19_s25 }
   0x3   :  { %s35_s22 = sshll.u32 %s1195_s21, 4  ;;  %s1196_s26 = smov [#allocation2]   ;;  %s36_s22 = int_to_ptr.vmem [resolvable:$true] %s35_s22 }
   0x4   :  { %38 = dma.hbm_to_vmem [thread:$0]  %s34_s20, 16, %s36_s22, [#allocation5]  }
   0x5   :  { %s21_s27 = sshll.u32 %s1196_s26, 4  ;;  %s1197_s28 = smov 64   ;;  %s22_s27 = int_to_ptr.vmem [resolvable:$true] %s21_s27 }
   0x6   :  { %s1198_s29 = smov 4   ;;  %s44_s2 = sshll.u32 %s1635_s3, 4  ;;  %s45_s2 = int_to_ptr.hbm [resolvable:$true] %s44_s2 }
   0x7   :  { %27 = dma.hbm_to_vmem [thread:$0]  %s20_s25, 2304, %s22_s27, [#allocation3], %s1197_s28, %s1197_s28, %s1198_s29  }
   0x8   :  { %s1199_s7 = smov [#allocation6]   ;;  %s55_s1 = sshll.u32 %s1636_s4, 4  ;;  %s56_s1 = int_to_ptr.hbm [resolvable:$true] %s55_s1 }
   0x9   :  { %s46_s8 = sshll.u32 %s1199_s7, 4  ;;  %s1200_s11 = smov [#allocation7]   ;;  %s47_s8 = int_to_ptr.vmem [resolvable:$true] %s46_s8 }
   0xa   :  { %49 = dma.hbm_to_vmem [thread:$0]  %s45_s2, 16, %s47_s8, [#allocation5]  }
   0xb   :  { %s57_s12 = sshll.u32 %s1200_s11, 4  ;;  %s58_s12 = int_to_ptr.vmem [resolvable:$true] %s57_s12 }
   0xc   :  { %60 = dma.hbm_to_vmem [thread:$0]  %s56_s1, 16, %s58_s12, [#allocation8]  }
   0xd   :  { %1189 = dma.done.wait [#allocation3], 2304  }
   0xe   :  { %1190 = vsyncadd [#allocation3], 4294964992 }
   0xf   :  { %1191 = dma.done.wait [#allocation5], 32  }
  0x10   :  { %1192 = vsyncadd [#allocation5], 4294967264 }
  0x11   :  { %1193 = dma.done.wait [#allocation8], 16  }
  0x12   :  { %1194 = vsyncadd [#allocation8], 4294967280  ;;  %v1049_v0 = vld [vmem:[#allocation2 + $0x38] sm:$0xff]  ;;  %v1059_v2 = vld [vmem:[#allocation2 + $0x88] sm:$0xff]  ;;  %vm374_vm0 = vcmask 261120   ;;  %vm546_vm1 = vcmask 523264  }
  0x13   :  { %v1057_v1 = vld [vmem:[#allocation2 + $0x78] sm:$0xff]  ;;  %399 = vmatpush.bf16.msra.mxu0 %v1049_v0  ;;  %1060 = vmatpush.bf16.msra.mxu3 %v1049_v0  ;;  %v1048_v3 = vld [vmem:[#allocation2 + $0x30] sm:$0xff]  ;;  %v1058_v5 = vld [vmem:[#allocation2 + $0x80] sm:$0xff]  ;;  %s1202_s20 = smov 96   ;;  %s1203_s21 = smov 112   ;;  %vm701_vm6 = vcmask 130048  }
  0x14   :  { %v1056_v4 = vld [vmem:[#allocation2 + $0x70] sm:$0xff]  ;;  %448 = vmatpush.bf16.msra.mxu1 %v1057_v1  ;;  %503 = vmatpush.bf16.msra.mxu2 %v1059_v2  ;;  %v852_v6 = vld [vmem:[%s1632_s0 + $0x8] sm:$0xf]  ;;  %v1046_v11 = vld [vmem:[#allocation2 + $0x20] sm:$0xff]  ;;  %s1205_s22 = smov 48   ;;  %s1206_s23 = smov 32  }
  0x15   :  { %v1020_v7 = vld [vmem:[%s1632_s0 + $0x10] sm:$0xf0]  ;;  %v1047_v9 = vld [vmem:[#allocation2 + $0x28] sm:$0xff]  ;;  %v1054_v12 = vld [vmem:[#allocation2 + $0x60] sm:$0xff]  ;;  %s1207_s24 = smov 16   ;;  %vm704_vm7 = vcmask 392192  }
  0x16   :  { %v853_v8 = vor.u32 %v1020_v7, %v852_v6  ;;  %v1055_v10 = vld [vmem:[#allocation2 + $0x68] sm:$0xff]  ;;  %v1045_v13 = vld [vmem:[#allocation2 + $0x18] sm:$0xff]  ;;  %v1044_v15 = vld [vmem:[#allocation2 + $0x10] sm:$0xff]  ;;  %vm818_vm8 = vcmask 519168  }
  0x17   :  { %400 = vmatpush.bf16.msra.mxu0 %v1048_v3  ;;  %1061 = vmatpush.bf16.msra.mxu3 %v1048_v3  ;;  %v1053_v14 = vld [vmem:[#allocation2 + $0x58] sm:$0xff]  ;;  %v1052_v16 = vld [vmem:[#allocation2 + $0x50] sm:$0xff]  ;;  %v864_v17 = vld [vmem:[%s1632_s0 + $0x20] sm:$0xf] }
  0x18   :  { %449 = vmatpush.bf16.msra.mxu1 %v1056_v4  ;;  %504 = vmatpush.bf16.msra.mxu2 %v1058_v5  ;;  %v1023_v18 = vld [vmem:[%s1632_s0 + $0x28] sm:$0xf0]  ;;  %v1042_v22 = vld [vmem:[#allocation2] sm:$0xff]  ;;  %v916_v26 = vld [vmem:[%s1632_s0 + $0x90] sm:$0xf] }
  0x19   :  { %v865_v19 = vor.u32 %v1023_v18, %v864_v17  ;;  %v1043_v20 = vld [vmem:[#allocation2 + $0x8] sm:$0xff]  ;;  %v1050_v23 = vld [vmem:[#allocation2 + $0x40] sm:$0xff]  ;;  %v1037_v27 = vld [vmem:[%s1632_s0 + $0x98] sm:$0xf0] }
  0x1a   :  { %v1051_v21 = vld [vmem:[#allocation2 + $0x48] sm:$0xff]  ;;  %v844_v24 = vld [vmem:[%s1632_s0] sm:$0xf]  ;;  %v1018_v28 = vld [vmem:[%s1632_s0 + $0x4] sm:$0xf]  ;;  %v917_v31 = vor.u32 %v1037_v27, %v916_v26 }
  0x1b   :  { %1010 = vmatmul.msk.bf16.vlgmr.msra.gmra.mxu2 %vm374_vm0, %v853_v8  ;;  %401 = vmatpush.bf16.msra.mxu0 %v1047_v9  ;;  %v1019_v25 = vld [vmem:[%s1632_s0 + $0x8] sm:$0xf0]  ;;  %v846_v29 = vld [vmem:[%s1632_s0 + $0xc] sm:$0xf0]  ;;  %v876_v33 = vld [vmem:[%s1632_s0 + $0x38] sm:$0xf] }
  0x1c   :  { %1062 = vmatpush.bf16.msra.mxu3 %v1047_v9  ;;  %450 = vmatpush.bf16.msra.mxu1 %v1055_v10  ;;  %v845_v30 = vor.u32 %v1019_v25, %v844_v24  ;;  %v849_v32 = vor.u32 %v1018_v28, %v846_v29  ;;  %v1026_v34 = vld [vmem:[%s1632_s0 + $0x40] sm:$0xf0]  ;;  %v856_v36 = vld [vmem:[%s1632_s0 + $0x18] sm:$0xf]  ;;  %v928_v38 = vld [vmem:[%s1632_s0 + $0xa8] sm:$0xf] }
  0x1d   :  { %v877_v35 = vor.u32 %v1026_v34, %v876_v33  ;;  %v1022_v37 = vld [vmem:[%s1632_s0 + $0x20] sm:$0xf0]  ;;  %v1040_v39 = vld [vmem:[%s1632_s0 + $0xb0] sm:$0xf0]  ;;  %v1021_v40 = vld [vmem:[%s1632_s0 + $0x1c] sm:$0xf] }
  0x1e   :  { %v858_v41 = vld [vmem:[%s1632_s0 + $0x24] sm:$0xf0]  ;;  %v857_v42 = vor.u32 %v1022_v37, %v856_v36  ;;  %v929_v43 = vor.u32 %v1040_v39, %v928_v38  ;;  %v888_v45 = vld [vmem:[%s1632_s0 + $0x50] sm:$0xf]  ;;  %v1029_v46 = vld [vmem:[%s1632_s0 + $0x58] sm:$0xf0] }
  0x1f   :  { %402 = vmatpush.bf16.msra.mxu0 %v1046_v11  ;;  %v861_v44 = vor.u32 %v1021_v40, %v858_v41  ;;  %v889_v47 = vor.u32 %v1029_v46, %v888_v45  ;;  %v868_v48 = vld [vmem:[%s1632_s0 + $0x30] sm:$0xf]  ;;  %v1025_v49 = vld [vmem:[%s1632_s0 + $0x38] sm:$0xf0]  ;;  %v1024_v50 = vld [vmem:[%s1632_s0 + $0x34] sm:$0xf] }
  0x20   :  { %1063 = vmatpush.bf16.msra.mxu3 %v1046_v11  ;;  %451 = vmatpush.bf16.msra.mxu1 %v1054_v12  ;;  %v870_v51 = vld [vmem:[%s1632_s0 + $0x3c] sm:$0xf0]  ;;  %v1036_v52 = vld [vmem:[%s1632_s0 + $0x94] sm:$0xf]  ;;  %v869_v54 = vor.u32 %v1025_v49, %v868_v48  ;;  %v900_v57 = vld [vmem:[%s1632_s0 + $0x68] sm:$0xf] }
  0x21   :  { %v918_v53 = vld [vmem:[%s1632_s0 + $0x9c] sm:$0xf0]  ;;  %v873_v55 = vor.u32 %v1024_v50, %v870_v51  ;;  %v1032_v58 = vld [vmem:[%s1632_s0 + $0x70] sm:$0xf0]  ;;  %v880_v60 = vld [vmem:[%s1632_s0 + $0x48] sm:$0xf] }
  0x22   :  { %v921_v56 = vor.u32 %v1036_v52, %v918_v53  ;;  %v901_v59 = vor.u32 %v1032_v58, %v900_v57  ;;  %v1028_v61 = vld [vmem:[%s1632_s0 + $0x50] sm:$0xf0]  ;;  %v1027_v62 = vld [vmem:[%s1632_s0 + $0x4c] sm:$0xf]  ;;  %v882_v63 = vld [vmem:[%s1632_s0 + $0x54] sm:$0xf0] }
  0x23   :  { %403 = vmatpush.bf16.msra.mxu0 %v1045_v13  ;;  %v1039_v0 = vld [vmem:[%s1632_s0 + $0xac] sm:$0xf]  ;;  %v881_v2 = vor.u32 %v1028_v61, %v880_v60  ;;  %v885_v3 = vor.u32 %v1027_v62, %v882_v63  ;;  %v912_v5 = vld [vmem:[%s1632_s0 + $0x80] sm:$0xf]  ;;  %v894_v11 = vld [vmem:[%s1632_s0 + $0x6c] sm:$0xf0] }
  0x24   :  { %1064 = vmatpush.bf16.msra.mxu3 %v1045_v13  ;;  %452 = vmatpush.bf16.msra.mxu1 %v1053_v14  ;;  %v1035_v6 = vld [vmem:[%s1632_s0 + $0x88] sm:$0xf0]  ;;  %v892_v8 = vld [vmem:[%s1632_s0 + $0x60] sm:$0xf]  ;;  %v904_v17 = vld [vmem:[%s1632_s0 + $0x78] sm:$0xf] }
  0x25   :  { %v913_v7 = vor.u32 %v1035_v6, %v912_v5  ;;  %v1031_v9 = vld [vmem:[%s1632_s0 + $0x68] sm:$0xf0]  ;;  %v1034_v18 = vld [vmem:[%s1632_s0 + $0x80] sm:$0xf0]  ;;  %v1041_v24 = vld [vmem:[%s1632_s0 + $0xb8] sm:$0xf0] }
  0x27   :  { %404 = vmatpush.bf16.msra.mxu0 %v1044_v15 }
  0x28   :  { %1065 = vmatpush.bf16.msra.mxu3 %v1044_v15  ;;  %453 = vmatpush.bf16.msra.mxu1 %v1052_v16  ;;  %v1038_v15 = vld [vmem:[%s1632_s0 + $0xa0] sm:$0xf0] }
  0x2b   :  { %1011 = vmatmul.msk.bf16.gmra.mxu2 %vm374_vm0, %v865_v19  ;;  %405 = vmatpush.bf16.msra.mxu0 %v1043_v20  ;;  %v1033_v19 = vld [vmem:[%s1632_s0 + $0x7c] sm:$0xf] }
  0x2c   :  { %1066 = vmatpush.bf16.msra.mxu3 %v1043_v20  ;;  %454 = vmatpush.bf16.msra.mxu1 %v1051_v21  ;;  %v906_v20 = vld [vmem:[%s1632_s0 + $0x84] sm:$0xf0] }
  0x2f   :  { %406 = vmatpush.bf16.msra.mxu0 %v1042_v22 }
  0x30   :  { %1067 = vmatpush.bf16.msra.mxu3 %v1042_v22  ;;  %455 = vmatpush.bf16.msra.mxu1 %v1050_v23  ;;  %v909_v22 = vor.u32 %v1033_v19, %v906_v20 }
  0x32   :  { %407 = vmatmul.bf16.vlgmr.msra.gmra.mxu0 %v845_v30 }
  0x33   :  { %437 = vmatmul.bf16.vlgmr.msra.gmra.mxu3 %v917_v31  ;;  %456 = vmatmul.bf16.vlgmr.msra.gmra.mxu1 %v849_v32 }
  0x34   :  { %1068 = vmatpush.bf16.msrb.mxu3 %v1057_v1  ;;  %v930_v1 = vld [vmem:[%s1632_s0 + $0xb4] sm:$0xf0] }
  0x38   :  { %1069 = vmatpush.bf16.msrb.mxu3 %v1056_v4  ;;  %v933_v4 = vor.u32 %v1039_v0, %v930_v1 }
  0x3b   :  { %1012 = vmatmul.msk.bf16.gmra.mxu2 %vm374_vm0, %v877_v35 }
  0x3c   :  { %1070 = vmatpush.bf16.msrb.mxu3 %v1055_v10  ;;  %v1030_v10 = vld [vmem:[%s1632_s0 + $0x64] sm:$0xf] }
  0x3d   :  { %v897_v13 = vor.u32 %v1030_v10, %v894_v11 }
  0x40   :  { %1071 = vmatpush.bf16.msrb.mxu3 %v1054_v12  ;;  %v893_v12 = vor.u32 %v1031_v9, %v892_v8 }
  0x42   :  { %412 = vmatmul.bf16.gmra.mxu0 %v857_v42 }
  0x43   :  { %442 = vmatmul.bf16.gmra.mxu3 %v929_v43  ;;  %461 = vmatmul.bf16.gmra.mxu1 %v861_v44 }
  0x44   :  { %1072 = vmatpush.bf16.msrb.mxu3 %v1053_v14  ;;  %v924_v14 = vld [vmem:[%s1632_s0 + $0x98] sm:$0xf] }
  0x48   :  { %1073 = vmatpush.bf16.msrb.mxu3 %v1052_v16  ;;  %v925_v16 = vor.u32 %v1038_v15, %v924_v14 }
  0x4b   :  { %1013 = vmatmul.msk.bf16.gmra.mxu2 %vm374_vm0, %v889_v47 }
  0x4c   :  { %1074 = vmatpush.bf16.msrb.mxu3 %v1051_v21  ;;  %v905_v21 = vor.u32 %v1034_v18, %v904_v17 }
  0x50   :  { %1075 = vmatpush.bf16.msrb.mxu3 %v1050_v23  ;;  %v936_v23 = vld [vmem:[%s1632_s0 + $0xb0] sm:$0xf]  ;;  %s1201_s0 = smov 80  }
  0x51   :  { %v937_v25 = vor.u32 %v1041_v24, %v936_v23 }
  0x52   :  { %417 = vmatmul.bf16.gmra.mxu0 %v869_v54 }
  0x53   :  { %466 = vmatmul.bf16.gmra.mxu1 %v873_v55  ;;  %486 = vmatmul.bf16.vlgmr.msrb.gmra.mxu3 %v921_v56 }
  0x5b   :  { %1014 = vmatmul.msk.bf16.gmra.mxu2 %vm374_vm0, %v901_v59 }
  0x62   :  { %422 = vmatmul.bf16.gmra.mxu0 %v881_v2 }
  0x63   :  { %471 = vmatmul.bf16.gmra.mxu1 %v885_v3  ;;  %491 = vmatmul.bf16.gmra.mxu3 %v933_v4 }
  0x6b   :  { %1015 = vmatmul.msk.bf16.gmra.mxu2 %vm374_vm0, %v913_v7 }
  0x72   :  { %427 = vmatmul.bf16.gmra.mxu0 %v893_v12 }
  0x73   :  { %476 = vmatmul.bf16.gmra.mxu1 %v897_v13 }
  0x7b   :  { %1016 = vmatmul.msk.bf16.gmra.mxu2 %vm374_vm0, %v925_v16 }
  0x82   :  { %432 = vmatmul.bf16.gmra.mxu0 %v905_v21 }
  0x83   :  { %481 = vmatmul.bf16.gmra.mxu1 %v909_v22 }
  0x8b   :  { %1017 = vmatmul.msk.bf16.gmra.mxu2 %vm374_vm0, %v937_v25 }
  0x9e   :  { %v506_v26 = vpop.f32.mrf.mxu2 }
  0xa6   :  { %v508_v27 = vpop.f32.mrf.mxu2 }
  0xae   :  { %v511_v28 = vpop.f32.mrf.mxu2 }
  0xaf   :  { %v408_v29 = vpop.f32.mrf.mxu0 }
  0xb0   :  { %v457_v30 = vpop.f32.mrf.mxu1 }
  0xb1   :  { %v458_v31 = vadd.f32 %v457_v30, %v408_v29 }
  0xb3   :  { %v1402_v32 = vadd.f32 %v506_v26, %v458_v31 }
  0xb5   :  { %v584_v7 = vmul.f32 %v1402_v32, %v1402_v32  ;;  %v547_v14 = vsel %vm546_vm1, %v1402_v32, 0.0 }
  0xb6   :  { %v513_v33 = vpop.f32.mrf.mxu2  ;;  %v1404_v42 = vpop.f32.mrf.mxu3 }
  0xb7   :  { %v410_v34 = vpop.f32.mrf.mxu0  ;;  %v600_v21 = vsel %vm546_vm1, %v584_v7, 0.0 }
  0xb8   :  { %v459_v35 = vpop.f32.mrf.mxu1 }
  0xb9   :  { %v460_v58 = vadd.f32 %v459_v35, %v410_v34 }
  0xbb   :  { %v1412_v63 = vadd.f32 %v508_v27, %v460_v58 }
  0xbd   :  { %v585_v5 = vmul.f32 %v1412_v63, %v1412_v63  ;;  %v548_v10 = vsel %vm546_vm1, %v1412_v63, 0.0 }
  0xbe   :  { %v516_v36 = vpop.f32.mrf.mxu2  ;;  %v1406_v46 = vpop.f32.mrf.mxu3  ;;  %v549_v22 = vadd.f32 %v548_v10, %v547_v14 }
  0xbf   :  { %v413_v37 = vpop.f32.mrf.mxu0  ;;  %v601_v17 = vsel %vm546_vm1, %v585_v5, 0.0 }
  0xc0   :  { %v462_v38 = vpop.f32.mrf.mxu1 }
  0xc1   :  { %v463_v59 = vadd.f32 %v462_v38, %v413_v37 }
  0xc3   :  { %v1414_v1 = vadd.f32 %v511_v28, %v463_v59  ;;  %v602_v28 = vadd.f32 %v601_v17, %v600_v21 }
  0xc5   :  { %v586_v8 = vmul.f32 %v1414_v1, %v1414_v1  ;;  %v550_v18 = vsel %vm546_vm1, %v1414_v1, 0.0 }
  0xc6   :  { %v518_v39 = vpop.f32.mrf.mxu2  ;;  %v1408_v52 = vpop.f32.mrf.mxu3  ;;  %v551_v29 = vadd.f32 %v550_v18, %v549_v22 }
  0xc7   :  { %v415_v40 = vpop.f32.mrf.mxu0  ;;  %v603_v23 = vsel %vm546_vm1, %v586_v8, 0.0 }
  0xc8   :  { %v464_v41 = vpop.f32.mrf.mxu1 }
  0xc9   :  { %v465_v0 = vadd.f32 %v464_v41, %v415_v40 }
  0xcb   :  { %v1420_v6 = vadd.f32 %v513_v33, %v465_v0 }
  0xcd   :  { %v587_v19 = vmul.f32 %v1420_v6, %v1420_v6  ;;  %v552_v24 = vsel %vm546_vm1, %v1420_v6, 0.0 }
  0xce   :  { %v521_v43 = vpop.f32.mrf.mxu2  ;;  %v1410_v57 = vpop.f32.mrf.mxu3  ;;  %v553_v37 = vadd.f32 %v552_v24, %v551_v29 }
  0xcf   :  { %v418_v44 = vpop.f32.mrf.mxu0  ;;  %v605_v31 = vsel %vm546_vm1, %v587_v19, 0.0 }
  0xd0   :  { %v467_v45 = vpop.f32.mrf.mxu1 }
  0xd1   :  { %v468_v2 = vadd.f32 %v467_v45, %v418_v44 }
  0xd3   :  { %v1430_v11 = vadd.f32 %v516_v36, %v468_v2  ;;  %v604_v36 = vadd.f32 %v603_v23, %v602_v28 }
  0xd5   :  { %v588_v25 = vmul.f32 %v1430_v11, %v1430_v11  ;;  %v554_v33 = vsel %vm546_vm1, %v1430_v11, 0.0 }
  0xd6   :  { %v523_v47 = vpop.f32.mrf.mxu2  ;;  %v1416_v3 = vpop.f32.mrf.mxu3 }
  0xd7   :  { %v420_v48 = vpop.f32.mrf.mxu0  ;;  %v607_v40 = vsel %vm546_vm1, %v588_v25, 0.0  ;;  %v488_v14 = vadd.f32 %v1416_v3, %v1404_v42 }
  0xd8   :  { %v469_v49 = vpop.f32.mrf.mxu1 }
  0xd9   :  { %v470_v4 = vadd.f32 %v469_v49, %v420_v48  ;;  %v606_v48 = vadd.f32 %v605_v31, %v604_v36  ;;  %v555_v49 = vadd.f32 %v554_v33, %v553_v37 }
  0xdb   :  { %v1434_v15 = vadd.f32 %v518_v39, %v470_v4  ;;  %v608_v59 = vadd.f32 %v607_v40, %v606_v48 }
  0xdd   :  { %v589_v30 = vmul.f32 %v1434_v15, %v1434_v15  ;;  %v556_v41 = vsel %vm546_vm1, %v1434_v15, 0.0 }
  0xde   :  { %v526_v50 = vpop.f32.mrf.mxu2  ;;  %v489_v38 = vpop.f32.mrf.mxu3 }
  0xdf   :  { %v423_v51 = vpop.f32.mrf.mxu0  ;;  %v490_v28 = vadd.f32 %v489_v38, %v1406_v46 }
  0xe0   :  { %v472_v53 = vpop.f32.mrf.mxu1 }
  0xe1   :  { %v473_v12 = vadd.f32 %v472_v53, %v423_v51 }
  0xe3   :  { %v1447_v26 = vadd.f32 %v521_v43, %v473_v12 }
  0xe5   :  { %v590_v43 = vmul.f32 %v1447_v26, %v1447_v26  ;;  %v558_v53 = vsel %vm546_vm1, %v1447_v26, 0.0 }
  0xe6   :  { %v528_v54 = vpop.f32.mrf.mxu2  ;;  %v492_v19 = vpop.f32.mrf.mxu3 }
  0xe7   :  { %v425_v55 = vpop.f32.mrf.mxu0 }
  0xe8   :  { %v474_v56 = vpop.f32.mrf.mxu1 }
  0xe9   :  { %v475_v20 = vadd.f32 %v474_v56, %v425_v55 }
  0xeb   :  { %v1454_v34 = vadd.f32 %v523_v47, %v475_v20  ;;  %v609_v47 = vsel %vm546_vm1, %v589_v30, 0.0 }
  0xec   :  { %v610_v4 = vadd.f32 %v609_v47, %v608_v59 }
  0xed   :  { %v591_v55 = vmul.f32 %v1454_v34, %v1454_v34 }
  0xee   :  { %v531_v60 = vpop.f32.mrf.mxu2 }
  0xef   :  { %v428_v61 = vpop.f32.mrf.mxu0  ;;  %v613_v7 = vsel %vm546_vm1, %v591_v55, 0.0 }
  0xf0   :  { %v477_v62 = vpop.f32.mrf.mxu1 }
  0xf1   :  { %v478_v27 = vadd.f32 %v477_v62, %v428_v61  ;;  %v557_v61 = vadd.f32 %v556_v41, %v555_v49  ;;  %v560_v62 = vsel %vm546_vm1, %v1454_v34, 0.0  ;;  %v493_v41 = vadd.f32 %v492_v19, %v1408_v52 }
  0xf3   :  { %v1461_v44 = vadd.f32 %v526_v50, %v478_v27  ;;  %v611_v50 = vsel %vm546_vm1, %v590_v43, 0.0  ;;  %v559_v5 = vadd.f32 %v558_v53, %v557_v61  ;;  %v494_v53 = vpop.f32.mrf.mxu3 }
  0xf4   :  { %v612_v10 = vadd.f32 %v611_v50, %v610_v4  ;;  %v495_v59 = vadd.f32 %v494_v53, %v1410_v57 }
  0xf5   :  { %v592_v0 = vmul.f32 %v1461_v44, %v1461_v44  ;;  %v561_v12 = vadd.f32 %v560_v62, %v559_v5 }
  0xf6   :  { %v1426_v9 = vpop.f32.mrf.mxu2  ;;  %v614_v20 = vadd.f32 %v613_v7, %v612_v10 }
  0xf7   :  { %v430_v13 = vpop.f32.mrf.mxu0 }
  0xf8   :  { %v479_v16 = vpop.f32.mrf.mxu1 }
  0xf9   :  { %v480_v35 = vadd.f32 %v479_v16, %v430_v13  ;;  %v615_v16 = vsel %vm546_vm1, %v592_v0, 0.0 }
  0xfa   :  { %v616_v25 = vadd.f32 %v615_v16, %v614_v20 }
  0xfb   :  { %v1468_v56 = vadd.f32 %v528_v54, %v480_v35  ;;  %v562_v54 = vsel %vm546_vm1, %v1461_v44, 0.0 }
  0xfc   :  { %v563_v21 = vadd.f32 %v562_v54, %v561_v12 }
  0xfd   :  { %v593_v8 = vmul.f32 %v1468_v56, %v1468_v56 }
  0xfe   :  { %v536_v39 = vpop.f32.mrf.mxu2 }
  0xff   :  { %v433_v45 = vpop.f32.mrf.mxu0  ;;  %v617_v23 = vsel %vm546_vm1, %v593_v8, 0.0  ;;  %v1490_v24 = vadd.f32 %v536_v39, %v488_v14 }
 0x100   :  { %v482_v51 = vpop.f32.mrf.mxu1  ;;  %v618_v31 = vadd.f32 %v617_v23, %v616_v25 }
 0x101   :  { %v483_v58 = vadd.f32 %v482_v51, %v433_v45  ;;  %v596_v35 = vmul.f32 %v1490_v24, %v1490_v24 }
 0x103   :  { %v1475_v2 = vadd.f32 %v531_v60, %v483_v58  ;;  %v564_v60 = vsel %vm546_vm1, %v1468_v56, 0.0  ;;  %v623_v49 = vsel %vm546_vm1, %v596_v35, 0.0 }
 0x104   :  { %v565_v27 = vadd.f32 %v564_v60, %v563_v21 }
 0x105   :  { %v594_v17 = vmul.f32 %v1475_v2, %v1475_v2  ;;  %v566_v42 = vsel %vm546_vm1, %v1475_v2, 0.0 }
 0x106   :  { %v538_v13 = vpop.f32.mrf.mxu2  ;;  %v567_v33 = vadd.f32 %v566_v42, %v565_v27  ;;  %v1204_v27 = vmov 512.0  }
 0x107   :  { %v435_v18 = vpop.f32.mrf.mxu0  ;;  %v619_v29 = vsel %vm546_vm1, %v594_v17, 0.0  ;;  %v1501_v36 = vadd.f32 %v538_v13, %v490_v28  ;;  %1089 = vrcp.f32 %v1204_v27 }
 0x108   :  { %v484_v22 = vpop.f32.mrf.mxu1  ;;  %v620_v40 = vadd.f32 %v619_v29, %v618_v31 }
 0x109   :  { %v485_v3 = vadd.f32 %v484_v22, %v435_v18  ;;  %v597_v47 = vmul.f32 %v1501_v36, %v1501_v36  ;;  %v572_v58 = vsel %vm546_vm1, %v1501_v36, 0.0 }
 0x10b   :  { %v1497_v30 = vadd.f32 %v1426_v9, %v485_v3  ;;  %v570_v9 = vsel %vm546_vm1, %v1490_v24, 0.0  ;;  %v625_v61 = vsel %vm546_vm1, %v597_v47, 0.0 }
 0x10d   :  { %v568_v37 = vsel %vm546_vm1, %v1497_v30, 0.0  ;;  %v595_v39 = vmul.f32 %v1497_v30, %v1497_v30  ;;  %v1090_v28 = vpop.eup %1089 }
 0x10e   :  { %v569_v46 = vadd.f32 %v568_v37, %v567_v33  ;;  %v541_v38 = vpop.f32.mrf.mxu2  ;;  %v664_v29 = vmul.f32 512.0, %v1090_v28  ;;  %vm668_vm2 = vweird.f32 %v1090_v28 }
 0x10f   :  { %v621_v43 = vsel %vm546_vm1, %v595_v39, 0.0  ;;  %v1514_v51 = vadd.f32 %v541_v38, %v493_v41 }
 0x110   :  { %v622_v45 = vadd.f32 %v621_v43, %v620_v40  ;;  %v571_v48 = vadd.f32 %v570_v9, %v569_v46  ;;  %v665_v31 = vsub.f32 1.0, %v664_v29 }
 0x111   :  { %v598_v50 = vmul.f32 %v1514_v51, %v1514_v51  ;;  %v574_v4 = vsel %vm546_vm1, %v1514_v51, 0.0 }
 0x112   :  { %v624_v55 = vadd.f32 %v623_v49, %v622_v45  ;;  %v573_v52 = vadd.f32 %v572_v58, %v571_v48  ;;  %v666_v35 = vmul.f32 %v1090_v28, %v665_v31 }
 0x113   :  { %v627_v54 = vsel %vm546_vm1, %v598_v50, 0.0 }
 0x114   :  { %v626_v62 = vadd.f32 %v625_v61, %v624_v55  ;;  %v575_v7 = vadd.f32 %v574_v4, %v573_v52  ;;  %v667_v38 = vadd.f32 %v1090_v28, %v666_v35 }
 0x116   :  { %v543_v0 = vpop.f32.mrf.mxu2  ;;  %v628_v10 = vadd.f32 %v627_v54, %v626_v62  ;;  %v669_v9 = vsel %vm668_vm2, %v1090_v28, %v667_v38 }
 0x117   :  { %v1524_v5 = vadd.f32 %v543_v0, %v495_v59 }
 0x119   :  { %v576_v8 = vsel %vm546_vm1, %v1524_v5, 0.0  ;;  %v599_v57 = vmul.f32 %v1524_v5, %v1524_v5 }
 0x11a   :  { %v577_v12 = vadd.f32 %v576_v8, %v575_v7  ;;  %v685_v8 = vld [vmem:[#allocation6] sm:$0x1] }
 0x11b   :  { %v629_v13 = vsel %vm546_vm1, %v599_v57, 0.0 }
 0x11c   :  { %v578_v14 = vrot.slane %v577_v12, 4  ;;  %v630_v16 = vadd.f32 %v629_v13, %v628_v10 }
 0x11e   :  { %v579_v60 = vadd.f32 %v578_v14, %v577_v12  ;;  %v631_v17 = vrot.slane %v630_v16, 4  ;;  %v687_v14 = vld [vmem:[#allocation7] sm:$0x1] }
 0x120   :  { %v580_v18 = vrot.slane %v579_v60, 2  ;;  %v632_v19 = vadd.f32 %v631_v17, %v630_v16 }
 0x122   :  { %v581_v20 = vadd.f32 %v580_v18, %v579_v60  ;;  %v633_v21 = vrot.slane %v632_v19, 2 }
 0x124   :  { %v582_v22 = vrot.slane %v581_v20, 1  ;;  %v634_v42 = vadd.f32 %v633_v21, %v632_v19 }
 0x126   :  { %v583_v23 = vadd.f32 %v582_v22, %v581_v20  ;;  %v635_v3 = vrot.slane %v634_v42, 1 }
 0x128   :  { %655 = vrot.lane.b32.xlu2 %v583_v23, %s1201_s0  ;;  %647 = vrot.lane.b32.xlu1 %v583_v23, %s1202_s20  ;;  %v636_v25 = vadd.f32 %v635_v3, %v634_v42 }
 0x129   :  { %638 = vrot.lane.b32.xlu0 %v583_v23, %s1203_s21 }
 0x130   :  { %659 = vrot.lane.b32.xlu2 %v636_v25, %s1201_s0  ;;  %651 = vrot.lane.b32.xlu1 %v636_v25, %s1202_s20 }
 0x131   :  { %643 = vrot.lane.b32.xlu0 %v636_v25, %s1203_s21 }
 0x182   :  { %v656_v40 = vpop.permute.xlu2 %655 }
 0x18a   :  { %v660_v53 = vpop.permute.xlu2 %659 }
 0x19a   :  { %v648_v33 = vpop.permute.xlu1 %647 }
 0x19b   :  { %v639_v37 = vpop.permute.xlu0 %638 }
 0x19c   :  { %v641_v39 = vadd.f32 %v639_v37, %v583_v23 }
 0x19e   :  { %v650_v46 = vadd.f32 %v648_v33, %v641_v39 }
 0x1a0   :  { %v658_v41 = vadd.f32 %v656_v40, %v650_v46 }
 0x1a2   :  { %v652_v48 = vpop.permute.xlu1 %651  ;;  %v670_v49 = vmul.f32 %v669_v9, %v658_v41 }
 0x1a3   :  { %v644_v43 = vpop.permute.xlu0 %643 }
 0x1a4   :  { %v646_v45 = vadd.f32 %v644_v43, %v636_v25  ;;  %v672_v58 = vmul.f32 %v670_v49, %v670_v49 }
 0x1a6   :  { %v654_v47 = vadd.f32 %v652_v48, %v646_v45 }
 0x1a8   :  { %v662_v55 = vadd.f32 %v660_v53, %v654_v47 }
 0x1aa   :  { %v671_v52 = vmul.f32 %v669_v9, %v662_v55 }
 0x1ac   :  { %v673_v59 = vsub.f32 %v671_v52, %v672_v58 }
 0x1ae   :  { %v674_v61 = vadd.f32 1e-05, %v673_v59 }
 0x1b0   :  { %1091 = vrsqrt.f32 %v674_v61  ;;  %vm681_vm4 = vweird.f32 %v674_v61 }
 0x1b6   :  { %v1092_v50 = vpop.eup %1091 }
 0x1b7   :  { %v676_v62 = vmul.f32 %v1092_v50, %v674_v61  ;;  %vm682_vm3 = vweird.f32 %v1092_v50 }
 0x1b8   :  { %vm683_vm5 = vmor %vm681_vm4, %vm682_vm3 }
 0x1b9   :  { %v677_v0 = vmul.f32 %v1092_v50, %v676_v62 }
 0x1bb   :  { %v678_v4 = vmul.f32 0.5, %v677_v0 }
 0x1bd   :  { %v679_v7 = vsub.f32 1.5, %v678_v4 }
 0x1bf   :  { %v680_v54 = vmul.f32 %v1092_v50, %v679_v7 }
 0x1c1   :  { %v684_v57 = vsel %vm683_vm5, %v1092_v50, %v680_v54 }
 0x1c2   :  { %v686_v10 = vmul.f32 %v685_v8, %v684_v57 }
 0x1c4   :  { %v691_v12 = vperm.slane %v686_v10, 0  ;;  %v688_v13 = vmul.f32 %v686_v10, %v670_v49 }
 0x1c6   :  { %698 = vrot.lane.b32.xlu2 %v691_v12, %s1205_s22  ;;  %695 = vrot.lane.b32.xlu1 %v691_v12, %s1206_s23  ;;  %v689_v16 = vsub.f32 %v687_v14, %v688_v13 }
 0x1c7   :  { %692 = vrot.lane.b32.xlu0 %v691_v12, %s1207_s24 }
 0x1c8   :  { %v707_v60 = vperm.slane %v689_v16, 0 }
 0x1ce   :  { %714 = vrot.lane.b32.xlu2 %v707_v60, %s1205_s22  ;;  %711 = vrot.lane.b32.xlu1 %v707_v60, %s1206_s23 }
 0x1cf   :  { %708 = vrot.lane.b32.xlu0 %v707_v60, %s1207_s24 }
 0x220   :  { %v699_v19 = vpop.permute.xlu2 %698 }
 0x228   :  { %v715_v27 = vpop.permute.xlu2 %714 }
 0x238   :  { %v696_v17 = vpop.permute.xlu1 %695 }
 0x239   :  { %v693_v18 = vpop.permute.xlu0 %692 }
 0x23a   :  { %v702_v20 = vsel %vm701_vm6, %v686_v10, %v693_v18 }
 0x23b   :  { %v703_v21 = vsel %vm374_vm0, %v702_v20, %v696_v17 }
 0x23c   :  { %v705_v42 = vsel %vm704_vm7, %v703_v21, %v699_v19 }
 0x23d   :  { %v720_v28 = vperm.slane %v705_v42, 0 }
 0x23f   :  { %v721_v33 = vmul.f32 %v720_v28, %v1402_v32  ;;  %v722_v35 = vmul.f32 %v720_v28, %v1412_v63  ;;  %v723_v37 = vmul.f32 %v720_v28, %v1414_v1  ;;  %v724_v39 = vmul.f32 %v720_v28, %v1420_v6 }
 0x240   :  { %v712_v22 = vpop.permute.xlu1 %711  ;;  %v725_v40 = vmul.f32 %v720_v28, %v1430_v11  ;;  %v726_v46 = vmul.f32 %v720_v28, %v1434_v15  ;;  %v727_v38 = vmul.f32 %v720_v28, %v1447_v26  ;;  %v728_v41 = vmul.f32 %v720_v28, %v1454_v34 }
 0x241   :  { %v709_v23 = vpop.permute.xlu0 %708  ;;  %v729_v9 = vmul.f32 %v720_v28, %v1461_v44  ;;  %v730_v43 = vmul.f32 %v720_v28, %v1468_v56  ;;  %v731_v32 = vmul.f32 %v720_v28, %v1475_v2  ;;  %v732_v63 = vmul.f32 %v720_v28, %v1497_v30 }
 0x242   :  { %v717_v3 = vsel %vm701_vm6, %v689_v16, %v709_v23  ;;  %v733_v1 = vmul.f32 %v720_v28, %v1490_v24  ;;  %v734_v6 = vmul.f32 %v720_v28, %v1501_v36  ;;  %v735_v15 = vmul.f32 %v720_v28, %v1514_v51 }
 0x243   :  { %v718_v25 = vsel %vm374_vm0, %v717_v3, %v712_v22  ;;  %v736_v26 = vmul.f32 %v720_v28, %v1524_v5 }
 0x244   :  { %v719_v29 = vsel %vm704_vm7, %v718_v25, %v715_v27 }
 0x245   :  { %v737_v31 = vperm.slane %v719_v29, 0 }
 0x247   :  { %v738_v45 = vadd.f32 %v737_v31, %v721_v33  ;;  %v739_v11 = vadd.f32 %v737_v31, %v722_v35  ;;  %v740_v48 = vadd.f32 %v737_v31, %v723_v37  ;;  %v741_v34 = vadd.f32 %v737_v31, %v724_v39 }
 0x248   :  { %v742_v44 = vadd.f32 %v737_v31, %v725_v40  ;;  %v743_v49 = vadd.f32 %v737_v31, %v726_v46  ;;  %v744_v56 = vadd.f32 %v737_v31, %v727_v38  ;;  %v745_v47 = vadd.f32 %v737_v31, %v728_v41 }
 0x249   :  { %v746_v2 = vadd.f32 %v737_v31, %v729_v9  ;;  %v747_v53 = vadd.f32 %v737_v31, %v730_v43  ;;  %v748_v30 = vadd.f32 %v737_v31, %v731_v32  ;;  %v749_v55 = vadd.f32 %v737_v31, %v732_v63 }
 0x24a   :  { %v1550_v24 = vadd.f32 %v737_v31, %v733_v1  ;;  %v1552_v36 = vadd.f32 %v737_v31, %v734_v6  ;;  %v770_v58 = vmul.f32 0.05, %v738_v45  ;;  %v771_v52 = vmul.f32 0.05, %v739_v11 }
 0x24b   :  { %vm754_vm9 = vcmp.ge.f32.partialorder %v738_v45, 0.0  ;;  %vm755_vm10 = vcmp.ge.f32.partialorder %v739_v11, 0.0  ;;  %v772_v51 = vmul.f32 0.05, %v740_v48  ;;  %v773_v5 = vmul.f32 0.05, %v741_v34 }
 0x24c   :  { %v752_v59 = vadd.f32 %v737_v31, %v735_v15  ;;  %vm756_vm11 = vcmp.ge.f32.partialorder %v740_v48, 0.0  ;;  %vm757_vm12 = vcmp.ge.f32.partialorder %v741_v34, 0.0  ;;  %v774_v61 = vmul.f32 0.05, %v742_v44 }
 0x24d   :  { %v753_v50 = vadd.f32 %v737_v31, %v736_v26  ;;  %vm758_vm13 = vcmp.ge.f32.partialorder %v742_v44, 0.0  ;;  %vm759_vm14 = vcmp.ge.f32.partialorder %v743_v49, 0.0  ;;  %v775_v62 = vmul.f32 0.05, %v743_v49 }
 0x24e   :  { %vm760_vm15 = vcmp.ge.f32.partialorder %v744_v56, 0.0  ;;  %v776_v0 = vmul.f32 0.05, %v744_v56  ;;  %v786_v4 = vsel %vm754_vm9, %v738_v45, %v770_v58  ;;  %v787_v7 = vsel %vm755_vm10, %v739_v11, %v771_v52 }
 0x24f   :  { %vm761_vm0 = vcmp.ge.f32.partialorder %v745_v47, 0.0  ;;  %v777_v54 = vmul.f32 0.05, %v745_v47  ;;  %v788_v8 = vsel %vm756_vm11, %v740_v48, %v772_v51  ;;  %v789_v57 = vsel %vm757_vm12, %v741_v34, %v773_v5 }
 0x250   :  { %vm762_vm1 = vcmp.ge.f32.partialorder %v746_v2, 0.0  ;;  %vm763_vm2 = vcmp.ge.f32.partialorder %v747_v53, 0.0  ;;  %v778_v10 = vmul.f32 0.05, %v746_v2  ;;  %v790_v12 = vsel %vm758_vm13, %v742_v44, %v774_v61 }
 0x251   :  { %v779_v13 = vmul.f32 0.05, %v747_v53  ;;  %v791_v14 = vsel %vm759_vm14, %v743_v49, %v775_v62  ;;  %v802_v16 = vpack.c.bf16 %v786_v4, %v786_v4  ;;  %v803_v60 = vpack.c.bf16 %v787_v7, %v787_v7 }
 0x252   :  { %v780_v17 = vmul.f32 0.05, %v748_v30  ;;  %v792_v18 = vsel %vm760_vm15, %v744_v56, %v776_v0  ;;  %v804_v19 = vpack.c.bf16 %v788_v8, %v788_v8  ;;  %v805_v20 = vpack.c.bf16 %v789_v57, %v789_v57 }
 0x253   :  { %vm764_vm3 = vcmp.ge.f32.partialorder %v748_v30, 0.0  ;;  %v781_v21 = vmul.f32 0.05, %v749_v55  ;;  %v793_v22 = vsel %vm761_vm0, %v745_v47, %v777_v54  ;;  %v806_v23 = vpack.c.bf16 %v790_v12, %v790_v12  ;;  %819 = vst.msk [vmem:[%s1637_s5] sm:$0xf] %vm818_vm8, %v802_v16 }
 0x254   :  { %vm765_vm4 = vcmp.ge.f32.partialorder %v749_v55, 0.0  ;;  %v782_v42 = vmul.f32 0.05, %v1550_v24  ;;  %v794_v3 = vsel %vm762_vm1, %v746_v2, %v778_v10  ;;  %v807_v25 = vpack.c.bf16 %v791_v14, %v791_v14  ;;  %820 = vst.msk [vmem:[%s1637_s5 + $0x4] sm:$0xf] %vm818_vm8, %v803_v60 }
 0x255   :  { %vm766_vm5 = vcmp.ge.f32.partialorder %v1550_v24, 0.0  ;;  %v783_v27 = vmul.f32 0.05, %v1552_v36  ;;  %v795_v28 = vsel %vm763_vm2, %v747_v53, %v779_v13  ;;  %v808_v29 = vpack.c.bf16 %v792_v18, %v792_v18  ;;  %821 = vst.msk [vmem:[%s1637_s5 + $0x8] sm:$0xf] %vm818_vm8, %v804_v19 }
 0x256   :  { %vm767_vm6 = vcmp.ge.f32.partialorder %v1552_v36, 0.0  ;;  %v784_v31 = vmul.f32 0.05, %v752_v59  ;;  %v796_v33 = vsel %vm764_vm3, %v748_v30, %v780_v17  ;;  %v809_v35 = vpack.c.bf16 %v793_v22, %v793_v22  ;;  %822 = vst.msk [vmem:[%s1637_s5 + $0xc] sm:$0xf] %vm818_vm8, %v805_v20 }
 0x257   :  { %vm768_vm7 = vcmp.ge.f32.partialorder %v752_v59, 0.0  ;;  %v785_v37 = vmul.f32 0.05, %v753_v50  ;;  %v797_v39 = vsel %vm765_vm4, %v749_v55, %v781_v21  ;;  %v810_v40 = vpack.c.bf16 %v794_v3, %v794_v3  ;;  %823 = vst.msk [vmem:[%s1637_s5 + $0x10] sm:$0xf] %vm818_vm8, %v806_v23 }
 0x258   :  { %vm769_vm9 = vcmp.ge.f32.partialorder %v753_v50, 0.0  ;;  %v798_v46 = vsel %vm766_vm5, %v1550_v24, %v782_v42  ;;  %v811_v38 = vpack.c.bf16 %v795_v28, %v795_v28  ;;  %824 = vst.msk [vmem:[%s1637_s5 + $0x14] sm:$0xf] %vm818_vm8, %v807_v25  ;;  %v799_v41 = vsel %vm767_vm6, %v1552_v36, %v783_v27 }
 0x259   :  { %v812_v9 = vpack.c.bf16 %v796_v33, %v796_v33  ;;  %825 = vst.msk [vmem:[%s1637_s5 + $0x18] sm:$0xf] %vm818_vm8, %v808_v29  ;;  %v800_v43 = vsel %vm768_vm7, %v752_v59, %v784_v31  ;;  %v813_v32 = vpack.c.bf16 %v797_v39, %v797_v39  ;;  %v801_v63 = vsel %vm769_vm9, %v753_v50, %v785_v37 }
 0x25a   :  { %826 = vst.msk [vmem:[%s1637_s5 + $0x1c] sm:$0xf] %vm818_vm8, %v809_v35  ;;  %v814_v1 = vpack.c.bf16 %v798_v46, %v798_v46  ;;  %v815_v6 = vpack.c.bf16 %v799_v41, %v799_v41  ;;  %v816_v45 = vpack.c.bf16 %v800_v43, %v800_v43  ;;  %v817_v11 = vpack.c.bf16 %v801_v63, %v801_v63 }
 0x25b   :  { %827 = vst.msk [vmem:[%s1637_s5 + $0x20] sm:$0xf] %vm818_vm8, %v810_v40 }
 0x25c   :  { %828 = vst.msk [vmem:[%s1637_s5 + $0x24] sm:$0xf] %vm818_vm8, %v811_v38 }
 0x25d   :  { %829 = vst.msk [vmem:[%s1637_s5 + $0x28] sm:$0xf] %vm818_vm8, %v812_v9 }
 0x25e   :  { %830 = vst.msk [vmem:[%s1637_s5 + $0x2c] sm:$0xf] %vm818_vm8, %v813_v32 }
 0x25f   :  { %831 = vst.msk [vmem:[%s1637_s5 + $0x30] sm:$0xf] %vm818_vm8, %v814_v1 }
 0x260   :  { %832 = vst.msk [vmem:[%s1637_s5 + $0x34] sm:$0xf] %vm818_vm8, %v815_v6 }
 0x261   :  { %833 = vst.msk [vmem:[%s1637_s5 + $0x38] sm:$0xf] %vm818_vm8, %v816_v45 }
 0x262   :  { %834 = vst.msk [vmem:[%s1637_s5 + $0x3c] sm:$0xf] %vm818_vm8, %v817_v11 }
 0x263   :  { %839 = vsyncpa [#allocation3], 1 }
 0x264   :  { %840 = vsyncpa [#allocation5], 1 }
 0x265   :  { %841 = vsyncpa [#allocation8], 1 }

// kernel: _lambda_.9
= control target key start
LH: loop header
LB: loop body
LE: loop exit
PB: predicated region body
PF: predicated region fallthrough
CT: control target
= control target key end

     0   :  { %s842_s18 = smov 0   ;;  %s990_s0 = inlined_call_operand.vmem [shape: bf16[512,144], index: 0, kind: input, shape index: {}]   ;;  %s991_s1 = inlined_call_operand.vmem [shape: bf16[144,12], index: 1, kind: input, shape index: {}]   ;;  %s992_s2 = inlined_call_operand.vmem [shape: f32[1,12], index: 2, kind: input, shape index: {}]   ;;  %s993_s3 = inlined_call_operand.vmem [shape: f32[1,12], index: 3, kind: input, shape index: {}]   ;;  %s994_s4 = inlined_call_operand.vmem [shape: f32[1,12], index: 4, kind: input, shape index: {}]   ;;  %s995_s5 = inlined_call_operand.vmem [shape: f32[512,12], index: 5, kind: output, shape index: {}]  }
   0x1 LB: > { %s608_s19 = sadd.s32 4294967295, %s810_s18   ;;  %p612_p0 = scmp.ge.s32.totalorder %s810_s18, 1  ;;  %s810_s18 = sphi %s842_s18, %s15_s18  }
   0x2   : > { %p189_p1 = scmp.lt.s32.totalorder %s810_s18, 5 }
   0x4   : > { %p190_p2 = pnand %p612_p0, %p189_p1 }
   0x5   : > { %s613_s22 = sshll.u32 (!%p190_p2), %s608_s19, 4 }
   0x6   : > { %193 = sbr.rel (%p190_p2) target bundleno = 243 (0xf3), region = 40  ;;  %p219_p3 = scmp.lt.s32.totalorder (!%p190_p2), %s613_s22, 63 }
   0xb   : > { %v752_v0 = vld [vmem:[%s991_s1 + $0x38] sm:$0xff]  ;;  %v753_v1 = vld [vmem:[%s991_s1 + $0x40] sm:$0xff]  ;;  %v751_v2 = vld [vmem:[%s991_s1 + $0x30] sm:$0xff]  ;;  %s997_s22 = smov (!%p219_p3, %s613_s22), 63  ;;  %vm396_vm0 = vcmask 130048   ;;  %vm535_vm1 = vcmask 97280  }
   0xc   : > { %421 = vmatpush.bf16.msra.mxu0 %v752_v0  ;;  %754 = vmatpush.bf16.msra.mxu2 %v752_v0  ;;  %s728_s25 = sshll.u32 %s997_s22, 3  ;;  %v750_v3 = vld [vmem:[%s991_s1 + $0x28] sm:$0xff]  ;;  %v749_v7 = vld [vmem:[%s991_s1 + $0x20] sm:$0xff]  ;;  %v748_v11 = vld [vmem:[%s991_s1 + $0x18] sm:$0xff] }
   0xd   : > { %477 = vmatpush.bf16.msra.mxu1 %v753_v1  ;;  %762 = vmatpush.bf16.msra.mxu3 %v753_v1  ;;  %s867_s28 = scalar_lea.vmem %s990_s0, %s728_s25  ;;  %v747_v12 = vld [vmem:[%s991_s1 + $0x10] sm:$0xff]  ;;  %v746_v16 = vld [vmem:[%s991_s1 + $0x8] sm:$0xff]  ;;  %v745_v19 = vld [vmem:[%s991_s1] sm:$0xff]  ;;  %s938_s4 = scalar_lea.vmem %s995_s5, %s728_s25 }
   0xe   : > { %v729_v4 = vld [vmem:[%s867_s28 + $0x4] sm:$0xf]  ;;  %v622_v5 = vld [vmem:[%s867_s28 + $0x8] sm:$0xf0]  ;;  %v739_v8 = vld [vmem:[%s867_s28 + $0x54] sm:$0xf] }
   0xf   : > { %v625_v6 = vor.u32 %v729_v4, %v622_v5  ;;  %v662_v9 = vld [vmem:[%s867_s28 + $0x58] sm:$0xf0]  ;;  %v731_v13 = vld [vmem:[%s867_s28 + $0x14] sm:$0xf]  ;;  %v741_v17 = vld [vmem:[%s867_s28 + $0x64] sm:$0xf] }
  0x10   : > { %422 = vmatpush.bf16.msra.mxu0 %v751_v2  ;;  %755 = vmatpush.bf16.msra.mxu2 %v751_v2  ;;  %v665_v10 = vor.u32 %v739_v8, %v662_v9  ;;  %v630_v14 = vld [vmem:[%s867_s28 + $0x18] sm:$0xf0]  ;;  %v670_v18 = vld [vmem:[%s867_s28 + $0x68] sm:$0xf0]  ;;  %v620_v20 = vld [vmem:[%s867_s28] sm:$0xf] }
  0x11   : > { %718 = vmatmul.msk.bf16.vlgmr.msra.gmra.mxu1 %vm396_vm0, %v625_v6  ;;  %v633_v15 = vor.u32 %v731_v13, %v630_v14  ;;  %v730_v21 = vld [vmem:[%s867_s28 + $0x4] sm:$0xf0]  ;;  %v673_v22 = vor.u32 %v741_v17, %v670_v18  ;;  %v652_v23 = vld [vmem:[%s867_s28 + $0x40] sm:$0xf]  ;;  %v733_v27 = vld [vmem:[%s867_s28 + $0x24] sm:$0xf] }
  0x12   : > { %723 = vmatmul.msk.bf16.vlgmr.msra.gmra.mxu3 %vm396_vm0, %v665_v10  ;;  %v738_v24 = vld [vmem:[%s867_s28 + $0x44] sm:$0xf0]  ;;  %v621_v25 = vor.u32 %v730_v21, %v620_v20  ;;  %v638_v28 = vld [vmem:[%s867_s28 + $0x28] sm:$0xf0]  ;;  %v743_v30 = vld [vmem:[%s867_s28 + $0x74] sm:$0xf] }
  0x13   : > { %v653_v26 = vor.u32 %v738_v24, %v652_v23  ;;  %v641_v29 = vor.u32 %v733_v27, %v638_v28  ;;  %v678_v31 = vld [vmem:[%s867_s28 + $0x78] sm:$0xf0]  ;;  %v628_v32 = vld [vmem:[%s867_s28 + $0x10] sm:$0xf]  ;;  %v732_v33 = vld [vmem:[%s867_s28 + $0x14] sm:$0xf0] }
  0x14   : > { %423 = vmatpush.bf16.msra.mxu0 %v750_v3  ;;  %756 = vmatpush.bf16.msra.mxu2 %v750_v3  ;;  %v681_v34 = vor.u32 %v743_v30, %v678_v31  ;;  %v660_v35 = vld [vmem:[%s867_s28 + $0x50] sm:$0xf]  ;;  %v740_v36 = vld [vmem:[%s867_s28 + $0x54] sm:$0xf0]  ;;  %v629_v37 = vor.u32 %v732_v33, %v628_v32  ;;  %v735_v39 = vld [vmem:[%s867_s28 + $0x34] sm:$0xf] }
  0x15   : > { %v661_v38 = vor.u32 %v740_v36, %v660_v35  ;;  %v646_v40 = vld [vmem:[%s867_s28 + $0x38] sm:$0xf0]  ;;  %v636_v42 = vld [vmem:[%s867_s28 + $0x20] sm:$0xf]  ;;  %v734_v43 = vld [vmem:[%s867_s28 + $0x24] sm:$0xf0] }
  0x16   : > { %v649_v41 = vor.u32 %v735_v39, %v646_v40  ;;  %v668_v44 = vld [vmem:[%s867_s28 + $0x60] sm:$0xf]  ;;  %v742_v45 = vld [vmem:[%s867_s28 + $0x64] sm:$0xf0]  ;;  %v637_v46 = vor.u32 %v734_v43, %v636_v42  ;;  %v737_v48 = vld [vmem:[%s867_s28 + $0x44] sm:$0xf] }
  0x17   : > { %v669_v47 = vor.u32 %v742_v45, %v668_v44  ;;  %v654_v49 = vld [vmem:[%s867_s28 + $0x48] sm:$0xf0]  ;;  %v644_v51 = vld [vmem:[%s867_s28 + $0x30] sm:$0xf]  ;;  %v736_v52 = vld [vmem:[%s867_s28 + $0x34] sm:$0xf0] }
  0x18   : > { %424 = vmatpush.bf16.msra.mxu0 %v749_v7  ;;  %757 = vmatpush.bf16.msra.mxu2 %v749_v7  ;;  %v657_v50 = vor.u32 %v737_v48, %v654_v49  ;;  %v676_v53 = vld [vmem:[%s867_s28 + $0x70] sm:$0xf]  ;;  %v744_v54 = vld [vmem:[%s867_s28 + $0x74] sm:$0xf0]  ;;  %v645_v55 = vor.u32 %v736_v52, %v644_v51  ;;  %v930_v60 = vld [vmem:[%s992_s2] ss:$0 sm:$0xff] }
  0x19   : > { %v677_v56 = vor.u32 %v744_v54, %v676_v53 }
  0x1c   : > { %425 = vmatpush.bf16.msra.mxu0 %v748_v11  ;;  %758 = vmatpush.bf16.msra.mxu2 %v748_v11 }
  0x20   : > { %426 = vmatpush.bf16.msra.mxu0 %v747_v12  ;;  %759 = vmatpush.bf16.msra.mxu2 %v747_v12 }
  0x21   : > { %719 = vmatmul.msk.bf16.gmra.mxu1 %vm396_vm0, %v633_v15 }
  0x22   : > { %724 = vmatmul.msk.bf16.gmra.mxu3 %vm396_vm0, %v673_v22 }
  0x24   : > { %427 = vmatpush.bf16.msra.mxu0 %v746_v16  ;;  %760 = vmatpush.bf16.msra.mxu2 %v746_v16 }
  0x28   : > { %428 = vmatpush.bf16.msra.mxu0 %v745_v19  ;;  %761 = vmatpush.bf16.msra.mxu2 %v745_v19 }
  0x2b   : > { %429 = vmatmul.bf16.vlgmr.msra.gmra.mxu0 %v621_v25  ;;  %449 = vmatmul.bf16.vlgmr.msra.gmra.mxu2 %v653_v26 }
  0x31   : > { %720 = vmatmul.msk.bf16.gmra.mxu1 %vm396_vm0, %v641_v29 }
  0x32   : > { %725 = vmatmul.msk.bf16.gmra.mxu3 %vm396_vm0, %v681_v34 }
  0x3b   : > { %434 = vmatmul.bf16.gmra.mxu0 %v629_v37  ;;  %454 = vmatmul.bf16.gmra.mxu2 %v661_v38 }
  0x41   : > { %721 = vmatmul.msk.bf16.gmra.mxu1 %vm396_vm0, %v649_v41 }
  0x4b   : > { %439 = vmatmul.bf16.gmra.mxu0 %v637_v46  ;;  %459 = vmatmul.bf16.gmra.mxu2 %v669_v47 }
  0x51   : > { %722 = vmatmul.msk.bf16.gmra.mxu1 %vm396_vm0, %v657_v50 }
  0x5b   : > { %444 = vmatmul.bf16.gmra.mxu0 %v645_v55  ;;  %464 = vmatmul.bf16.gmra.mxu2 %v677_v56 }
  0x8e   : > { %v479_v57 = vpop.f32.mrf.mxu1 }
  0x95   : > { %v504_v8 = vpop.f32.mrf.mxu3 }
  0x96   : > { %v481_v58 = vpop.f32.mrf.mxu1 }
  0x9d   : > { %v506_v19 = vpop.f32.mrf.mxu3 }
  0x9e   : > { %v484_v59 = vpop.f32.mrf.mxu1 }
  0xa5   : > { %v509_v32 = vpop.f32.mrf.mxu3 }
  0xa6   : > { %v486_v63 = vpop.f32.mrf.mxu1 }
  0xa8   : > { %v430_v61 = vpop.f32.mrf.mxu0 }
  0xa9   : > { %v431_v62 = vadd.f32 %v930_v60, %v430_v61 }
  0xab   : > { %v480_v0 = vadd.f32 %v479_v57, %v431_v62 }
  0xad   : > { %772 = vtanh.f32 %v480_v0  ;;  %v511_v44 = vpop.f32.mrf.mxu3 }
  0xae   : > { %v450_v1 = vpop.f32.mrf.mxu2  ;;  %v489_v4 = vpop.f32.mrf.mxu1 }
  0xaf   : > { %v451_v34 = vadd.f32 %v930_v60, %v450_v1 }
  0xb0   : > { %v432_v2 = vpop.f32.mrf.mxu0 }
  0xb1   : > { %v433_v3 = vadd.f32 %v930_v60, %v432_v2 }
  0xb3   : > { %v773_v5 = vpop.eup %772  ;;  %v482_v6 = vadd.f32 %v481_v58, %v433_v3 }
  0xb4   : > { %536 = vst.msk [vmem:[%s938_s4] sm:$0xff] %vm535_vm1, %v773_v5 }
  0xb5   : > { %774 = vtanh.f32 %v482_v6  ;;  %v514_v57 = vpop.f32.mrf.mxu3 }
  0xb6   : > { %v452_v7 = vpop.f32.mrf.mxu2  ;;  %v491_v11 = vpop.f32.mrf.mxu1 }
  0xb7   : > { %v453_v46 = vadd.f32 %v930_v60, %v452_v7 }
  0xb8   : > { %v435_v9 = vpop.f32.mrf.mxu0 }
  0xb9   : > { %v436_v10 = vadd.f32 %v930_v60, %v435_v9 }
  0xbb   : > { %v775_v12 = vpop.eup %774  ;;  %v485_v13 = vadd.f32 %v484_v59, %v436_v10 }
  0xbc   : > { %537 = vst.msk [vmem:[%s938_s4 + $0x8] sm:$0xff] %vm535_vm1, %v775_v12 }
  0xbd   : > { %776 = vtanh.f32 %v485_v13  ;;  %v516_v6 = vpop.f32.mrf.mxu3 }
  0xbe   : > { %v455_v14 = vpop.f32.mrf.mxu2  ;;  %v494_v18 = vpop.f32.mrf.mxu1 }
  0xbf   : > { %v456_v15 = vadd.f32 %v930_v60, %v455_v14 }
  0xc0   : > { %v437_v16 = vpop.f32.mrf.mxu0 }
  0xc1   : > { %v438_v17 = vadd.f32 %v930_v60, %v437_v16  ;;  %v505_v20 = vadd.f32 %v504_v8, %v456_v15 }
  0xc3   : > { %v777_v21 = vpop.eup %776  ;;  %v487_v22 = vadd.f32 %v486_v63, %v438_v17  ;;  %778 = vtanh.f32 %v505_v20 }
  0xc4   : > { %538 = vst.msk [vmem:[%s938_s4 + $0x10] sm:$0xff] %vm535_vm1, %v777_v21 }
  0xc5   : > { %780 = vtanh.f32 %v487_v22 }
  0xc6   : > { %v457_v23 = vpop.f32.mrf.mxu2  ;;  %v496_v27 = vpop.f32.mrf.mxu1 }
  0xc7   : > { %v458_v24 = vadd.f32 %v930_v60, %v457_v23 }
  0xc8   : > { %v440_v25 = vpop.f32.mrf.mxu0 }
  0xc9   : > { %v441_v26 = vadd.f32 %v930_v60, %v440_v25  ;;  %v779_v28 = vpop.eup %778  ;;  %v507_v29 = vadd.f32 %v506_v19, %v458_v24 }
  0xca   : > { %546 = vst.msk [vmem:[%s938_s4 + $0x50] sm:$0xff] %vm535_vm1, %v779_v28 }
  0xcb   : > { %v781_v30 = vpop.eup %780  ;;  %v490_v31 = vadd.f32 %v489_v4, %v441_v26  ;;  %782 = vtanh.f32 %v507_v29 }
  0xcc   : > { %539 = vst.msk [vmem:[%s938_s4 + $0x18] sm:$0xff] %vm535_vm1, %v781_v30 }
  0xcd   : > { %784 = vtanh.f32 %v490_v31 }
  0xce   : > { %v460_v33 = vpop.f32.mrf.mxu2  ;;  %v499_v38 = vpop.f32.mrf.mxu1 }
  0xcf   : > { %v461_v35 = vadd.f32 %v930_v60, %v460_v33  ;;  %v500_v41 = vadd.f32 %v499_v38, %v451_v34 }
  0xd0   : > { %v442_v36 = vpop.f32.mrf.mxu0 }
  0xd1   : > { %v443_v37 = vadd.f32 %v930_v60, %v442_v36  ;;  %v783_v39 = vpop.eup %782  ;;  %v510_v40 = vadd.f32 %v509_v32, %v461_v35 }
  0xd2   : > { %547 = vst.msk [vmem:[%s938_s4 + $0x58] sm:$0xff] %vm535_vm1, %v783_v39 }
  0xd3   : > { %v785_v42 = vpop.eup %784  ;;  %v492_v43 = vadd.f32 %v491_v11, %v443_v37  ;;  %786 = vtanh.f32 %v510_v40 }
  0xd4   : > { %540 = vst.msk [vmem:[%s938_s4 + $0x20] sm:$0xff] %vm535_vm1, %v785_v42 }
  0xd5   : > { %788 = vtanh.f32 %v492_v43 }
  0xd6   : > { %790 = vtanh.f32 %v500_v41  ;;  %v462_v45 = vpop.f32.mrf.mxu2  ;;  %v501_v50 = vpop.f32.mrf.mxu1 }
  0xd7   : > { %v463_v47 = vadd.f32 %v930_v60, %v462_v45  ;;  %v502_v53 = vadd.f32 %v501_v50, %v453_v46 }
  0xd8   : > { %v445_v48 = vpop.f32.mrf.mxu0 }
  0xd9   : > { %v446_v49 = vadd.f32 %v930_v60, %v445_v48  ;;  %v787_v51 = vpop.eup %786  ;;  %v512_v52 = vadd.f32 %v511_v44, %v463_v47 }
  0xda   : > { %548 = vst.msk [vmem:[%s938_s4 + $0x60] sm:$0xff] %vm535_vm1, %v787_v51 }
  0xdb   : > { %v789_v54 = vpop.eup %788  ;;  %v495_v55 = vadd.f32 %v494_v18, %v446_v49  ;;  %792 = vtanh.f32 %v512_v52 }
  0xdc   : > { %v791_v56 = vpop.eup %790  ;;  %541 = vst.msk [vmem:[%s938_s4 + $0x28] sm:$0xff] %vm535_vm1, %v789_v54 }
  0xdd   : > { %544 = vst.msk [vmem:[%s938_s4 + $0x40] sm:$0xff] %vm535_vm1, %v791_v56  ;;  %794 = vtanh.f32 %v495_v55 }
  0xde   : > { %796 = vtanh.f32 %v502_v53  ;;  %v465_v58 = vpop.f32.mrf.mxu2 }
  0xdf   : > { %v466_v59 = vadd.f32 %v930_v60, %v465_v58 }
  0xe0   : > { %v447_v61 = vpop.f32.mrf.mxu0 }
  0xe1   : > { %v448_v62 = vadd.f32 %v930_v60, %v447_v61  ;;  %v793_v63 = vpop.eup %792  ;;  %v515_v0 = vadd.f32 %v514_v57, %v466_v59 }
  0xe2   : > { %549 = vst.msk [vmem:[%s938_s4 + $0x68] sm:$0xff] %vm535_vm1, %v793_v63 }
  0xe3   : > { %v795_v1 = vpop.eup %794  ;;  %v497_v2 = vadd.f32 %v496_v27, %v448_v62  ;;  %798 = vtanh.f32 %v515_v0 }
  0xe4   : > { %v797_v3 = vpop.eup %796  ;;  %542 = vst.msk [vmem:[%s938_s4 + $0x30] sm:$0xff] %vm535_vm1, %v795_v1 }
  0xe5   : > { %545 = vst.msk [vmem:[%s938_s4 + $0x48] sm:$0xff] %vm535_vm1, %v797_v3  ;;  %800 = vtanh.f32 %v497_v2 }
  0xe6   : > { %v467_v4 = vpop.f32.mrf.mxu2 }
  0xe7   : > { %v468_v5 = vadd.f32 %v930_v60, %v467_v4 }
  0xe9   : > { %v799_v7 = vpop.eup %798  ;;  %v517_v8 = vadd.f32 %v516_v6, %v468_v5 }
  0xea   : > { %550 = vst.msk [vmem:[%s938_s4 + $0x70] sm:$0xff] %vm535_vm1, %v799_v7 }
  0xeb   : > { %v801_v9 = vpop.eup %800  ;;  %802 = vtanh.f32 %v517_v8 }
  0xec   : > { %543 = vst.msk [vmem:[%s938_s4 + $0x38] sm:$0xff] %vm535_vm1, %v801_v9 }
  0xf1   : > { %v803_v10 = vpop.eup %802 }
  0xf2   : > { %551 = vst.msk [vmem:[%s938_s4 + $0x78] sm:$0xff] %vm535_vm1, %v803_v10 }
  0xf3 PF: > { %s15_s18 = sadd.s32 1, %s810_s18  }
  0xf4   : > { %p12_p4 = scmp.ge.s32.totalorder %s15_s18, 6  }
  0xf6   :  { %14 = sbr.rel (!%p12_p4) target bundleno = 1 (0x1), region = 70 }

</bundles_post_ra>
